<compile_context>
chip_gen: v7x
topology: tpu7x:2x2x1
jax: 0.10.0
libtpu: 0.0.40
codegen_flags: <defaults>
</compile_context>

<pallas_src>
import jax
import jax.numpy as jnp
from jax.experimental import pallas as pl
from jax.experimental.pallas import tpu as pltpu


LANE = 128


def _ceil_to(x, m):
    return ((x + m - 1) // m) * m


# ---------------------------------------------------------------------------
# Fused kernel: HBM row-gather -> fused convs -> masked max -> ReLU -> fc
# ---------------------------------------------------------------------------
def _make_kernel(S, E, tb, n_branches, F, filter_sizes, fs_max, NPAD, OPAD,
                 compute_dtype):
    TS = tb * S  # rows handled per grid step

    def kernel(ids_ref,     # SMEM scalar prefetch: [B*S] int32 token ids
               emb_hbm,     # HBM (pl.ANY):         [V, E] embedding table
               convw_ref,   # VMEM: [fs_max*E, NPAD] fused per-tap conv weights
               convb_ref,   # VMEM: [1, NPAD]        fused conv bias
               fcw_ref,     # VMEM: [NPAD, OPAD]     folded fc1 @ fc2
               fcb_ref,     # VMEM: [1, OPAD]        folded fc bias
               out_ref,     # VMEM out block: [tb, OPAD]
               emb_vmem,    # scratch VMEM: [TS, E]
               sem):        # scratch: single DMA semaphore
        b = pl.program_id(0)
        base = b * TS

        # ---- embedding lookup: per-row DMA gather from HBM ----------------
        # Issue every row copy first (they overlap), then drain the shared
        # semaphore (all copies are the same size, so wait order is free).
        copies = []
        for i in range(TS):
            cp = pltpu.make_async_copy(
                emb_hbm.at[ids_ref[base + i]], emb_vmem.at[i], sem)
            cp.start()
            copies.append(cp)
        for cp in copies:
            cp.wait()

        emb = emb_vmem[...].astype(compute_dtype)                 # [TS, E]

        # ---- all conv branches in ONE lane-dense accumulator --------------
        # shift-and-accumulate over taps: conv += roll_k(emb) @ W_k
        # (taps k >= fs_i are zero columns for branch i, so cross-sequence
        #  wrap rows only feed masked time positions)
        conv = jnp.dot(emb, convw_ref[0:E, :],
                       preferred_element_type=jnp.float32)        # [TS, NPAD]
        for k in range(1, fs_max):
            x_k = pltpu.roll(emb, shift=TS - k, axis=0)           # row r -> r+k
            conv = conv + jnp.dot(x_k, convw_ref[k * E:(k + 1) * E, :],
                                  preferred_element_type=jnp.float32)

        # ---- masked max over time (valid length is S - fs + 1 per branch) -
        t_idx = jax.lax.broadcasted_iota(jnp.int32, (TS, NPAD), 0) % S
        lane = jax.lax.broadcasted_iota(jnp.int32, (TS, NPAD), 1)
        thr = jnp.full((TS, NPAD), S - filter_sizes[-1], jnp.int32)
        for i in range(n_branches - 2, -1, -1):
            thr = jnp.where(lane < (i + 1) * F, S - filter_sizes[i], thr)
        masked = jnp.where(t_idx <= thr, conv, -1e30)
        pooled = jnp.max(masked.reshape(tb, S, NPAD), axis=1)     # [tb, NPAD]
        # bias-add + ReLU hoisted past the max (bias const in t, ReLU monotone)
        pooled = jnp.maximum(pooled + convb_ref[...], 0.0)

        # ---- folded fc1·fc2 ------------------------------------------------
        # TODO(synk): nn.Dropout implemented as identity (inference semantics).
        y = jnp.dot(pooled.astype(compute_dtype), fcw_ref[...],
                    preferred_element_type=jnp.float32) + fcb_ref[...]
        out_ref[...] = y.astype(out_ref.dtype)

    return kernel


# ---------------------------------------------------------------------------
# Wrapper: weight prep (fuse/pad/fold), grid setup, pallas_call
# ---------------------------------------------------------------------------
def cnn_forward(params, text, filter_sizes, *, batch_tile=None,
                compute_dtype=jnp.float32):
    # text: [S, B] int32 (PyTorch layout); forward does text.permute(1, 0).
    S, B = text.shape
    V, E = params["embedding"].shape
    F = params["convs"][0][0].shape[-1]
    O = params["fc2_w"].shape[1]
    n = len(filter_sizes)
    fss = tuple(int(f) for f in filter_sizes)
    fs_max = max(fss)
    assert S >= fs_max, "sequence shorter than largest filter size"

    # Batch tile: one grid step per `tb` sequences; "parallel" axis -> both
    # v7x TensorCores at realistic batch sizes.
    if batch_tile is None:
        batch_tile = 8 if B % 8 == 0 else B
    tb = batch_tile
    assert B % tb == 0

    NPAD = _ceil_to(max(n * F, LANE), LANE)   # lane-dense conv output width
    OPAD = _ceil_to(max(O, LANE), LANE)       # lane-dense final output width
    K = fs_max * E

    # Token ids -> SMEM scalar prefetch (row-major [B, S]); clamp OOB ids
    # (a real gather would fault, nn.Embedding assumes in-range ids).
    ids = jnp.clip(text.T.reshape(B * S), 0, V - 1).astype(jnp.int32)

    # Fused conv weights [fs_max*E, NPAD]: branch i occupies lanes
    # [i*F, (i+1)*F); taps k >= fs_i are zero rows for that branch.
    conv_w = jnp.zeros((K, NPAD), jnp.float32)
    conv_b = jnp.zeros((1, NPAD), jnp.float32)
    for i, ((w, b), fs) in enumerate(zip(params["convs"], fss)):
        conv_w = conv_w.at[:fs * E, i * F:(i + 1) * F].set(w.reshape(fs * E, F))
        conv_b = conv_b.at[:, i * F:(i + 1) * F].set(b)
    conv_w = conv_w.astype(compute_dtype)

    # Fold fc1 @ fc2 (no nonlinearity in between), then pad to lane-dense.
    fc_w = params["fc1_w"] @ params["fc2_w"]                       # [n*F, O]
    fc_b = params["fc1_b"] @ params["fc2_w"] + params["fc2_b"]     # [1, O]
    fc_w_pad = jnp.zeros((NPAD, OPAD), jnp.float32).at[:n * F, :O].set(fc_w)
    fc_w_pad = fc_w_pad.astype(compute_dtype)
    fc_b_pad = jnp.zeros((1, OPAD), jnp.float32).at[:, :O].set(fc_b)

    kernel = _make_kernel(S, E, tb, n, F, fss, fs_max, NPAD, OPAD, compute_dtype)

    out_padded = pl.pallas_call(
        kernel,
        out_shape=jax.ShapeDtypeStruct((B, OPAD), jnp.float32),
        grid_spec=pltpu.PrefetchScalarGridSpec(
            num_scalar_prefetch=1,
            grid=(B // tb,),
            in_specs=[
                pl.BlockSpec(memory_space=pl.ANY),                  # table stays in HBM
                pl.BlockSpec((K, NPAD), lambda b, ids: (0, 0)),
                pl.BlockSpec((1, NPAD), lambda b, ids: (0, 0)),
                pl.BlockSpec((NPAD, OPAD), lambda b, ids: (0, 0)),
                pl.BlockSpec((1, OPAD), lambda b, ids: (0, 0)),
            ],
            out_specs=pl.BlockSpec((tb, OPAD), lambda b, ids: (b, 0)),
            scratch_shapes=[
                pltpu.VMEM((tb * S, E), jnp.float32),
                pltpu.SemaphoreType.DMA(()),
            ],
        ),
        compiler_params=pltpu.CompilerParams(
            dimension_semantics=("parallel",),
            vmem_limit_bytes=32 * 1024 * 1024,
        ),
    )(ids, params["embedding"], conv_w, conv_b, fc_w_pad, fc_b_pad)

    return out_padded[:, :O]


# ---------------------------------------------------------------------------
# Pure-JAX reference (mirrors CNN.forward) for correctness checking
# ---------------------------------------------------------------------------
def cnn_forward_ref(params, text, filter_sizes):
    emb = params["embedding"][text.T]                              # [B, S, E]
    _, S, _ = emb.shape
    pooled = []
    for (w, b), fs in zip(params["convs"], filter_sizes):
        T = S - fs + 1
        conv = jnp.stack(
            [jnp.einsum("bke,kef->bf", emb[:, t:t + fs, :], w) for t in range(T)],
            axis=1) + b                                            # [B, T, F]
        pooled.append(jnp.max(jax.nn.relu(conv), axis=1))          # [B, F]
    cat = jnp.concatenate(pooled, axis=1)
    h = cat @ params["fc1_w"] + params["fc1_b"]
    return h @ params["fc2_w"] + params["fc2_b"]


# ---------------------------------------------------------------------------
# Deterministic parameter init (distinct PRNG keys for every tensor)
# ---------------------------------------------------------------------------
def init_params(key, vocab_size, embedding_dim, n_filters, filter_sizes, output_dim):
    n = len(filter_sizes)
    keys = jax.random.split(key, 5 + 2 * n)
    params = {
        "embedding": jax.random.normal(keys[0], (vocab_size, embedding_dim),
                                       jnp.float32),
        "convs": [],
    }
    for i, fs in enumerate(filter_sizes):
        kw, kb = keys[1 + 2 * i], keys[2 + 2 * i]
        w = 0.1 * jax.random.normal(kw, (fs, embedding_dim, n_filters), jnp.float32)
        b = 0.1 * jax.random.normal(kb, (1, n_filters), jnp.float32)
        params["convs"].append((w, b))
    kin = n * n_filters
    params["fc1_w"] = 0.1 * jax.random.normal(keys[1 + 2 * n], (kin, n_filters),
                                              jnp.float32)
    params["fc1_b"] = 0.1 * jax.random.normal(keys[2 + 2 * n], (1, n_filters),
                                              jnp.float32)
    params["fc2_w"] = 0.1 * jax.random.normal(keys[3 + 2 * n],
                                              (n_filters, output_dim), jnp.float32)
    params["fc2_b"] = 0.1 * jax.random.normal(keys[4 + 2 * n], (1, output_dim),
                                              jnp.float32)
    return params


if __name__ == "__main__":
    vocab_size = 50
    embedding_dim = 32
    n_filters = 8
    filter_sizes = (2, 3, 4)
    output_dim = 4
    seq_len = 8
    batch = 16          # 2 grid steps of 8 sequences (exercises the parallel axis)

    key = jax.random.PRNGKey(0)
    pkey, tkey = jax.random.split(key)
    params = init_params(pkey, vocab_size, embedding_dim,
                         n_filters, filter_sizes, output_dim)

    # text in PyTorch layout: [seq_len, batch] of token ids
    text = jax.random.randint(tkey, (seq_len, batch), 0, vocab_size,
                              dtype=jnp.int32)

    out = cnn_forward(params, text, filter_sizes)
    out = jax.block_until_ready(out)
    assert out.shape == (batch, output_dim)

    ref = cnn_forward_ref(params, text, filter_sizes)
    assert jnp.allclose(out, ref, atol=1e-3, rtol=1e-3), (out, ref)
    print("KERNEL_OK")
</pallas_src>

<mosaic_0001>
module attributes {stable_mosaic.version = 11 : i64} {
  func.func @kernel(%arg0: i32, %arg1: memref<128xi32, #tpu.memory_space<smem>>, %arg2: memref<50x32xf32, #tpu.memory_space<any>>, %arg3: memref<128x128xf32, #tpu.memory_space<vmem>>, %arg4: memref<1x128xf32, #tpu.memory_space<vmem>>, %arg5: memref<128x128xf32, #tpu.memory_space<vmem>>, %arg6: memref<1x128xf32, #tpu.memory_space<vmem>>, %arg7: memref<8x128xf32, #tpu.memory_space<vmem>>, %arg8: memref<64x32xf32, #tpu.memory_space<vmem>>, %arg9: memref<!tpu.dma_semaphore, #tpu.memory_space<semaphore_mem>>) attributes {dimension_semantics = [#tpu.dimension_semantics<parallel>], iteration_bounds = array<i64: 2>, scalar_prefetch = 1 : i64, scratch_operands = 2 : i64, tpu.core_type = #tpu.core_type<tc>, window_params = [{}, {pipeline_mode = #tpu.pipeline_mode<synchronous>, transform_indices = @transform_1, window_bounds = array<i64: 128, 128>}, {pipeline_mode = #tpu.pipeline_mode<synchronous>, transform_indices = @transform_2, window_bounds = array<i64: 1, 128>}, {pipeline_mode = #tpu.pipeline_mode<synchronous>, transform_indices = @transform_3, window_bounds = array<i64: 128, 128>}, {pipeline_mode = #tpu.pipeline_mode<synchronous>, transform_indices = @transform_4, window_bounds = array<i64: 1, 128>}, {transform_indices = @transform_5, window_bounds = array<i64: 8, 128>}]} {
    %c64_i32 = arith.constant 64 : i32
    %0 = arith.muli %arg0, %c64_i32 : i32
    %c0_i32 = arith.constant 0 : i32
    %1 = arith.addi %0, %c0_i32 : i32
    %2 = arith.index_cast %1 : i32 to index
    %3 = memref.load %arg1[%2] : memref<128xi32, #tpu.memory_space<smem>>
    %c0_i32_0 = arith.constant 0 : i32
    %c0_i32_1 = arith.constant 0 : i32
    %4 = tpu.memref_slice %arg2[%3, %c0_i32_1] : memref<50x32xf32, #tpu.memory_space<any>> -> memref<1x32xf32, #tpu.memory_space<any>>
    %5 = tpu.memref_squeeze %4 : memref<1x32xf32, #tpu.memory_space<any>> -> memref<32xf32, #tpu.memory_space<any>>
    %c0_i32_2 = arith.constant 0 : i32
    %6 = tpu.memref_slice %arg8[%c0_i32_0, %c0_i32_2] : memref<64x32xf32, #tpu.memory_space<vmem>> -> memref<1x32xf32, #tpu.memory_space<vmem>>
    %7 = tpu.memref_squeeze %6 : memref<1x32xf32, #tpu.memory_space<vmem>> -> memref<32xf32, #tpu.memory_space<vmem>>
    tpu.enqueue_dma source(%5 : memref<32xf32, #tpu.memory_space<any>>) target(%7 : memref<32xf32, #tpu.memory_space<vmem>>) target_semaphore(%arg9 : memref<!tpu.dma_semaphore, #tpu.memory_space<semaphore_mem>>)
    %c1_i32 = arith.constant 1 : i32
    %8 = arith.addi %0, %c1_i32 : i32
    %9 = arith.index_cast %8 : i32 to index
    %10 = memref.load %arg1[%9] : memref<128xi32, #tpu.memory_space<smem>>
    %c1_i32_3 = arith.constant 1 : i32
    %c0_i32_4 = arith.constant 0 : i32
    %11 = tpu.memref_slice %arg2[%10, %c0_i32_4] : memref<50x32xf32, #tpu.memory_space<any>> -> memref<1x32xf32, #tpu.memory_space<any>>
    %12 = tpu.memref_squeeze %11 : memref<1x32xf32, #tpu.memory_space<any>> -> memref<32xf32, #tpu.memory_space<any>>
    %c0_i32_5 = arith.constant 0 : i32
    %13 = tpu.memref_slice %arg8[%c1_i32_3, %c0_i32_5] : memref<64x32xf32, #tpu.memory_space<vmem>> -> memref<1x32xf32, #tpu.memory_space<vmem>>
    %14 = tpu.memref_squeeze %13 : memref<1x32xf32, #tpu.memory_space<vmem>> -> memref<32xf32, #tpu.memory_space<vmem>>
    tpu.enqueue_dma source(%12 : memref<32xf32, #tpu.memory_space<any>>) target(%14 : memref<32xf32, #tpu.memory_space<vmem>>) target_semaphore(%arg9 : memref<!tpu.dma_semaphore, #tpu.memory_space<semaphore_mem>>)
    %c2_i32 = arith.constant 2 : i32
    %15 = arith.addi %0, %c2_i32 : i32
    %16 = arith.index_cast %15 : i32 to index
    %17 = memref.load %arg1[%16] : memref<128xi32, #tpu.memory_space<smem>>
    %c2_i32_6 = arith.constant 2 : i32
    %c0_i32_7 = arith.constant 0 : i32
    %18 = tpu.memref_slice %arg2[%17, %c0_i32_7] : memref<50x32xf32, #tpu.memory_space<any>> -> memref<1x32xf32, #tpu.memory_space<any>>
    %19 = tpu.memref_squeeze %18 : memref<1x32xf32, #tpu.memory_space<any>> -> memref<32xf32, #tpu.memory_space<any>>
    %c0_i32_8 = arith.constant 0 : i32
    %20 = tpu.memref_slice %arg8[%c2_i32_6, %c0_i32_8] : memref<64x32xf32, #tpu.memory_space<vmem>> -> memref<1x32xf32, #tpu.memory_space<vmem>>
    %21 = tpu.memref_squeeze %20 : memref<1x32xf32, #tpu.memory_space<vmem>> -> memref<32xf32, #tpu.memory_space<vmem>>
    tpu.enqueue_dma source(%19 : memref<32xf32, #tpu.memory_space<any>>) target(%21 : memref<32xf32, #tpu.memory_space<vmem>>) target_semaphore(%arg9 : memref<!tpu.dma_semaphore, #tpu.memory_space<semaphore_mem>>)
    %c3_i32 = arith.constant 3 : i32
    %22 = arith.addi %0, %c3_i32 : i32
    %23 = arith.index_cast %22 : i32 to index
    %24 = memref.load %arg1[%23] : memref<128xi32, #tpu.memory_space<smem>>
    %c3_i32_9 = arith.constant 3 : i32
    %c0_i32_10 = arith.constant 0 : i32
    %25 = tpu.memref_slice %arg2[%24, %c0_i32_10] : memref<50x32xf32, #tpu.memory_space<any>> -> memref<1x32xf32, #tpu.memory_space<any>>
    %26 = tpu.memref_squeeze %25 : memref<1x32xf32, #tpu.memory_space<any>> -> memref<32xf32, #tpu.memory_space<any>>
    %c0_i32_11 = arith.constant 0 : i32
    %27 = tpu.memref_slice %arg8[%c3_i32_9, %c0_i32_11] : memref<64x32xf32, #tpu.memory_space<vmem>> -> memref<1x32xf32, #tpu.memory_space<vmem>>
    %28 = tpu.memref_squeeze %27 : memref<1x32xf32, #tpu.memory_space<vmem>> -> memref<32xf32, #tpu.memory_space<vmem>>
    tpu.enqueue_dma source(%26 : memref<32xf32, #tpu.memory_space<any>>) target(%28 : memref<32xf32, #tpu.memory_space<vmem>>) target_semaphore(%arg9 : memref<!tpu.dma_semaphore, #tpu.memory_space<semaphore_mem>>)
    %c4_i32 = arith.constant 4 : i32
    %29 = arith.addi %0, %c4_i32 : i32
    %30 = arith.index_cast %29 : i32 to index
    %31 = memref.load %arg1[%30] : memref<128xi32, #tpu.memory_space<smem>>
    %c4_i32_12 = arith.constant 4 : i32
    %c0_i32_13 = arith.constant 0 : i32
    %32 = tpu.memref_slice %arg2[%31, %c0_i32_13] : memref<50x32xf32, #tpu.memory_space<any>> -> memref<1x32xf32, #tpu.memory_space<any>>
    %33 = tpu.memref_squeeze %32 : memref<1x32xf32, #tpu.memory_space<any>> -> memref<32xf32, #tpu.memory_space<any>>
    %c0_i32_14 = arith.constant 0 : i32
    %34 = tpu.memref_slice %arg8[%c4_i32_12, %c0_i32_14] : memref<64x32xf32, #tpu.memory_space<vmem>> -> memref<1x32xf32, #tpu.memory_space<vmem>>
    %35 = tpu.memref_squeeze %34 : memref<1x32xf32, #tpu.memory_space<vmem>> -> memref<32xf32, #tpu.memory_space<vmem>>
    tpu.enqueue_dma source(%33 : memref<32xf32, #tpu.memory_space<any>>) target(%35 : memref<32xf32, #tpu.memory_space<vmem>>) target_semaphore(%arg9 : memref<!tpu.dma_semaphore, #tpu.memory_space<semaphore_mem>>)
    %c5_i32 = arith.constant 5 : i32
    %36 = arith.addi %0, %c5_i32 : i32
    %37 = arith.index_cast %36 : i32 to index
    %38 = memref.load %arg1[%37] : memref<128xi32, #tpu.memory_space<smem>>
    %c5_i32_15 = arith.constant 5 : i32
    %c0_i32_16 = arith.constant 0 : i32
    %39 = tpu.memref_slice %arg2[%38, %c0_i32_16] : memref<50x32xf32, #tpu.memory_space<any>> -> memref<1x32xf32, #tpu.memory_space<any>>
    %40 = tpu.memref_squeeze %39 : memref<1x32xf32, #tpu.memory_space<any>> -> memref<32xf32, #tpu.memory_space<any>>
    %c0_i32_17 = arith.constant 0 : i32
    %41 = tpu.memref_slice %arg8[%c5_i32_15, %c0_i32_17] : memref<64x32xf32, #tpu.memory_space<vmem>> -> memref<1x32xf32, #tpu.memory_space<vmem>>
    %42 = tpu.memref_squeeze %41 : memref<1x32xf32, #tpu.memory_space<vmem>> -> memref<32xf32, #tpu.memory_space<vmem>>
    tpu.enqueue_dma source(%40 : memref<32xf32, #tpu.memory_space<any>>) target(%42 : memref<32xf32, #tpu.memory_space<vmem>>) target_semaphore(%arg9 : memref<!tpu.dma_semaphore, #tpu.memory_space<semaphore_mem>>)
    %c6_i32 = arith.constant 6 : i32
    %43 = arith.addi %0, %c6_i32 : i32
    %44 = arith.index_cast %43 : i32 to index
    %45 = memref.load %arg1[%44] : memref<128xi32, #tpu.memory_space<smem>>
    %c6_i32_18 = arith.constant 6 : i32
    %c0_i32_19 = arith.constant 0 : i32
    %46 = tpu.memref_slice %arg2[%45, %c0_i32_19] : memref<50x32xf32, #tpu.memory_space<any>> -> memref<1x32xf32, #tpu.memory_space<any>>
    %47 = tpu.memref_squeeze %46 : memref<1x32xf32, #tpu.memory_space<any>> -> memref<32xf32, #tpu.memory_space<any>>
    %c0_i32_20 = arith.constant 0 : i32
    %48 = tpu.memref_slice %arg8[%c6_i32_18, %c0_i32_20] : memref<64x32xf32, #tpu.memory_space<vmem>> -> memref<1x32xf32, #tpu.memory_space<vmem>>
    %49 = tpu.memref_squeeze %48 : memref<1x32xf32, #tpu.memory_space<vmem>> -> memref<32xf32, #tpu.memory_space<vmem>>
    tpu.enqueue_dma source(%47 : memref<32xf32, #tpu.memory_space<any>>) target(%49 : memref<32xf32, #tpu.memory_space<vmem>>) target_semaphore(%arg9 : memref<!tpu.dma_semaphore, #tpu.memory_space<semaphore_mem>>)
    %c7_i32 = arith.constant 7 : i32
    %50 = arith.addi %0, %c7_i32 : i32
    %51 = arith.index_cast %50 : i32 to index
    %52 = memref.load %arg1[%51] : memref<128xi32, #tpu.memory_space<smem>>
    %c7_i32_21 = arith.constant 7 : i32
    %c0_i32_22 = arith.constant 0 : i32
    %53 = tpu.memref_slice %arg2[%52, %c0_i32_22] : memref<50x32xf32, #tpu.memory_space<any>> -> memref<1x32xf32, #tpu.memory_space<any>>
    %54 = tpu.memref_squeeze %53 : memref<1x32xf32, #tpu.memory_space<any>> -> memref<32xf32, #tpu.memory_space<any>>
    %c0_i32_23 = arith.constant 0 : i32
    %55 = tpu.memref_slice %arg8[%c7_i32_21, %c0_i32_23] : memref<64x32xf32, #tpu.memory_space<vmem>> -> memref<1x32xf32, #tpu.memory_space<vmem>>
    %56 = tpu.memref_squeeze %55 : memref<1x32xf32, #tpu.memory_space<vmem>> -> memref<32xf32, #tpu.memory_space<vmem>>
    tpu.enqueue_dma source(%54 : memref<32xf32, #tpu.memory_space<any>>) target(%56 : memref<32xf32, #tpu.memory_space<vmem>>) target_semaphore(%arg9 : memref<!tpu.dma_semaphore, #tpu.memory_space<semaphore_mem>>)
    %c8_i32 = arith.constant 8 : i32
    %57 = arith.addi %0, %c8_i32 : i32
    %58 = arith.index_cast %57 : i32 to index
    %59 = memref.load %arg1[%58] : memref<128xi32, #tpu.memory_space<smem>>
    %c8_i32_24 = arith.constant 8 : i32
    %c0_i32_25 = arith.constant 0 : i32
    %60 = tpu.memref_slice %arg2[%59, %c0_i32_25] : memref<50x32xf32, #tpu.memory_space<any>> -> memref<1x32xf32, #tpu.memory_space<any>>
    %61 = tpu.memref_squeeze %60 : memref<1x32xf32, #tpu.memory_space<any>> -> memref<32xf32, #tpu.memory_space<any>>
    %c0_i32_26 = arith.constant 0 : i32
    %62 = tpu.memref_slice %arg8[%c8_i32_24, %c0_i32_26] : memref<64x32xf32, #tpu.memory_space<vmem>> -> memref<1x32xf32, #tpu.memory_space<vmem>>
    %63 = tpu.memref_squeeze %62 : memref<1x32xf32, #tpu.memory_space<vmem>> -> memref<32xf32, #tpu.memory_space<vmem>>
    tpu.enqueue_dma source(%61 : memref<32xf32, #tpu.memory_space<any>>) target(%63 : memref<32xf32, #tpu.memory_space<vmem>>) target_semaphore(%arg9 : memref<!tpu.dma_semaphore, #tpu.memory_space<semaphore_mem>>)
    %c9_i32 = arith.constant 9 : i32
    %64 = arith.addi %0, %c9_i32 : i32
    %65 = arith.index_cast %64 : i32 to index
    %66 = memref.load %arg1[%65] : memref<128xi32, #tpu.memory_space<smem>>
    %c9_i32_27 = arith.constant 9 : i32
    %c0_i32_28 = arith.constant 0 : i32
    %67 = tpu.memref_slice %arg2[%66, %c0_i32_28] : memref<50x32xf32, #tpu.memory_space<any>> -> memref<1x32xf32, #tpu.memory_space<any>>
    %68 = tpu.memref_squeeze %67 : memref<1x32xf32, #tpu.memory_space<any>> -> memref<32xf32, #tpu.memory_space<any>>
    %c0_i32_29 = arith.constant 0 : i32
    %69 = tpu.memref_slice %arg8[%c9_i32_27, %c0_i32_29] : memref<64x32xf32, #tpu.memory_space<vmem>> -> memref<1x32xf32, #tpu.memory_space<vmem>>
    %70 = tpu.memref_squeeze %69 : memref<1x32xf32, #tpu.memory_space<vmem>> -> memref<32xf32, #tpu.memory_space<vmem>>
    tpu.enqueue_dma source(%68 : memref<32xf32, #tpu.memory_space<any>>) target(%70 : memref<32xf32, #tpu.memory_space<vmem>>) target_semaphore(%arg9 : memref<!tpu.dma_semaphore, #tpu.memory_space<semaphore_mem>>)
    %c10_i32 = arith.constant 10 : i32
    %71 = arith.addi %0, %c10_i32 : i32
    %72 = arith.index_cast %71 : i32 to index
    %73 = memref.load %arg1[%72] : memref<128xi32, #tpu.memory_space<smem>>
    %c10_i32_30 = arith.constant 10 : i32
    %c0_i32_31 = arith.constant 0 : i32
    %74 = tpu.memref_slice %arg2[%73, %c0_i32_31] : memref<50x32xf32, #tpu.memory_space<any>> -> memref<1x32xf32, #tpu.memory_space<any>>
    %75 = tpu.memref_squeeze %74 : memref<1x32xf32, #tpu.memory_space<any>> -> memref<32xf32, #tpu.memory_space<any>>
    %c0_i32_32 = arith.constant 0 : i32
    %76 = tpu.memref_slice %arg8[%c10_i32_30, %c0_i32_32] : memref<64x32xf32, #tpu.memory_space<vmem>> -> memref<1x32xf32, #tpu.memory_space<vmem>>
    %77 = tpu.memref_squeeze %76 : memref<1x32xf32, #tpu.memory_space<vmem>> -> memref<32xf32, #tpu.memory_space<vmem>>
    tpu.enqueue_dma source(%75 : memref<32xf32, #tpu.memory_space<any>>) target(%77 : memref<32xf32, #tpu.memory_space<vmem>>) target_semaphore(%arg9 : memref<!tpu.dma_semaphore, #tpu.memory_space<semaphore_mem>>)
    %c11_i32 = arith.constant 11 : i32
    %78 = arith.addi %0, %c11_i32 : i32
    %79 = arith.index_cast %78 : i32 to index
    %80 = memref.load %arg1[%79] : memref<128xi32, #tpu.memory_space<smem>>
    %c11_i32_33 = arith.constant 11 : i32
    %c0_i32_34 = arith.constant 0 : i32
    %81 = tpu.memref_slice %arg2[%80, %c0_i32_34] : memref<50x32xf32, #tpu.memory_space<any>> -> memref<1x32xf32, #tpu.memory_space<any>>
    %82 = tpu.memref_squeeze %81 : memref<1x32xf32, #tpu.memory_space<any>> -> memref<32xf32, #tpu.memory_space<any>>
    %c0_i32_35 = arith.constant 0 : i32
    %83 = tpu.memref_slice %arg8[%c11_i32_33, %c0_i32_35] : memref<64x32xf32, #tpu.memory_space<vmem>> -> memref<1x32xf32, #tpu.memory_space<vmem>>
    %84 = tpu.memref_squeeze %83 : memref<1x32xf32, #tpu.memory_space<vmem>> -> memref<32xf32, #tpu.memory_space<vmem>>
    tpu.enqueue_dma source(%82 : memref<32xf32, #tpu.memory_space<any>>) target(%84 : memref<32xf32, #tpu.memory_space<vmem>>) target_semaphore(%arg9 : memref<!tpu.dma_semaphore, #tpu.memory_space<semaphore_mem>>)
    %c12_i32 = arith.constant 12 : i32
    %85 = arith.addi %0, %c12_i32 : i32
    %86 = arith.index_cast %85 : i32 to index
    %87 = memref.load %arg1[%86] : memref<128xi32, #tpu.memory_space<smem>>
    %c12_i32_36 = arith.constant 12 : i32
    %c0_i32_37 = arith.constant 0 : i32
    %88 = tpu.memref_slice %arg2[%87, %c0_i32_37] : memref<50x32xf32, #tpu.memory_space<any>> -> memref<1x32xf32, #tpu.memory_space<any>>
    %89 = tpu.memref_squeeze %88 : memref<1x32xf32, #tpu.memory_space<any>> -> memref<32xf32, #tpu.memory_space<any>>
    %c0_i32_38 = arith.constant 0 : i32
    %90 = tpu.memref_slice %arg8[%c12_i32_36, %c0_i32_38] : memref<64x32xf32, #tpu.memory_space<vmem>> -> memref<1x32xf32, #tpu.memory_space<vmem>>
    %91 = tpu.memref_squeeze %90 : memref<1x32xf32, #tpu.memory_space<vmem>> -> memref<32xf32, #tpu.memory_space<vmem>>
    tpu.enqueue_dma source(%89 : memref<32xf32, #tpu.memory_space<any>>) target(%91 : memref<32xf32, #tpu.memory_space<vmem>>) target_semaphore(%arg9 : memref<!tpu.dma_semaphore, #tpu.memory_space<semaphore_mem>>)
    %c13_i32 = arith.constant 13 : i32
    %92 = arith.addi %0, %c13_i32 : i32
    %93 = arith.index_cast %92 : i32 to index
    %94 = memref.load %arg1[%93] : memref<128xi32, #tpu.memory_space<smem>>
    %c13_i32_39 = arith.constant 13 : i32
    %c0_i32_40 = arith.constant 0 : i32
    %95 = tpu.memref_slice %arg2[%94, %c0_i32_40] : memref<50x32xf32, #tpu.memory_space<any>> -> memref<1x32xf32, #tpu.memory_space<any>>
    %96 = tpu.memref_squeeze %95 : memref<1x32xf32, #tpu.memory_space<any>> -> memref<32xf32, #tpu.memory_space<any>>
    %c0_i32_41 = arith.constant 0 : i32
    %97 = tpu.memref_slice %arg8[%c13_i32_39, %c0_i32_41] : memref<64x32xf32, #tpu.memory_space<vmem>> -> memref<1x32xf32, #tpu.memory_space<vmem>>
    %98 = tpu.memref_squeeze %97 : memref<1x32xf32, #tpu.memory_space<vmem>> -> memref<32xf32, #tpu.memory_space<vmem>>
    tpu.enqueue_dma source(%96 : memref<32xf32, #tpu.memory_space<any>>) target(%98 : memref<32xf32, #tpu.memory_space<vmem>>) target_semaphore(%arg9 : memref<!tpu.dma_semaphore, #tpu.memory_space<semaphore_mem>>)
    %c14_i32 = arith.constant 14 : i32
    %99 = arith.addi %0, %c14_i32 : i32
    %100 = arith.index_cast %99 : i32 to index
    %101 = memref.load %arg1[%100] : memref<128xi32, #tpu.memory_space<smem>>
    %c14_i32_42 = arith.constant 14 : i32
    %c0_i32_43 = arith.constant 0 : i32
    %102 = tpu.memref_slice %arg2[%101, %c0_i32_43] : memref<50x32xf32, #tpu.memory_space<any>> -> memref<1x32xf32, #tpu.memory_space<any>>
    %103 = tpu.memref_squeeze %102 : memref<1x32xf32, #tpu.memory_space<any>> -> memref<32xf32, #tpu.memory_space<any>>
    %c0_i32_44 = arith.constant 0 : i32
    %104 = tpu.memref_slice %arg8[%c14_i32_42, %c0_i32_44] : memref<64x32xf32, #tpu.memory_space<vmem>> -> memref<1x32xf32, #tpu.memory_space<vmem>>
    %105 = tpu.memref_squeeze %104 : memref<1x32xf32, #tpu.memory_space<vmem>> -> memref<32xf32, #tpu.memory_space<vmem>>
    tpu.enqueue_dma source(%103 : memref<32xf32, #tpu.memory_space<any>>) target(%105 : memref<32xf32, #tpu.memory_space<vmem>>) target_semaphore(%arg9 : memref<!tpu.dma_semaphore, #tpu.memory_space<semaphore_mem>>)
    %c15_i32 = arith.constant 15 : i32
    %106 = arith.addi %0, %c15_i32 : i32
    %107 = arith.index_cast %106 : i32 to index
    %108 = memref.load %arg1[%107] : memref<128xi32, #tpu.memory_space<smem>>
    %c15_i32_45 = arith.constant 15 : i32
    %c0_i32_46 = arith.constant 0 : i32
    %109 = tpu.memref_slice %arg2[%108, %c0_i32_46] : memref<50x32xf32, #tpu.memory_space<any>> -> memref<1x32xf32, #tpu.memory_space<any>>
    %110 = tpu.memref_squeeze %109 : memref<1x32xf32, #tpu.memory_space<any>> -> memref<32xf32, #tpu.memory_space<any>>
    %c0_i32_47 = arith.constant 0 : i32
    %111 = tpu.memref_slice %arg8[%c15_i32_45, %c0_i32_47] : memref<64x32xf32, #tpu.memory_space<vmem>> -> memref<1x32xf32, #tpu.memory_space<vmem>>
    %112 = tpu.memref_squeeze %111 : memref<1x32xf32, #tpu.memory_space<vmem>> -> memref<32xf32, #tpu.memory_space<vmem>>
    tpu.enqueue_dma source(%110 : memref<32xf32, #tpu.memory_space<any>>) target(%112 : memref<32xf32, #tpu.memory_space<vmem>>) target_semaphore(%arg9 : memref<!tpu.dma_semaphore, #tpu.memory_space<semaphore_mem>>)
    %c16_i32 = arith.constant 16 : i32
    %113 = arith.addi %0, %c16_i32 : i32
    %114 = arith.index_cast %113 : i32 to index
    %115 = memref.load %arg1[%114] : memref<128xi32, #tpu.memory_space<smem>>
    %c16_i32_48 = arith.constant 16 : i32
    %c0_i32_49 = arith.constant 0 : i32
    %116 = tpu.memref_slice %arg2[%115, %c0_i32_49] : memref<50x32xf32, #tpu.memory_space<any>> -> memref<1x32xf32, #tpu.memory_space<any>>
    %117 = tpu.memref_squeeze %116 : memref<1x32xf32, #tpu.memory_space<any>> -> memref<32xf32, #tpu.memory_space<any>>
    %c0_i32_50 = arith.constant 0 : i32
    %118 = tpu.memref_slice %arg8[%c16_i32_48, %c0_i32_50] : memref<64x32xf32, #tpu.memory_space<vmem>> -> memref<1x32xf32, #tpu.memory_space<vmem>>
    %119 = tpu.memref_squeeze %118 : memref<1x32xf32, #tpu.memory_space<vmem>> -> memref<32xf32, #tpu.memory_space<vmem>>
    tpu.enqueue_dma source(%117 : memref<32xf32, #tpu.memory_space<any>>) target(%119 : memref<32xf32, #tpu.memory_space<vmem>>) target_semaphore(%arg9 : memref<!tpu.dma_semaphore, #tpu.memory_space<semaphore_mem>>)
    %c17_i32 = arith.constant 17 : i32
    %120 = arith.addi %0, %c17_i32 : i32
    %121 = arith.index_cast %120 : i32 to index
    %122 = memref.load %arg1[%121] : memref<128xi32, #tpu.memory_space<smem>>
    %c17_i32_51 = arith.constant 17 : i32
    %c0_i32_52 = arith.constant 0 : i32
    %123 = tpu.memref_slice %arg2[%122, %c0_i32_52] : memref<50x32xf32, #tpu.memory_space<any>> -> memref<1x32xf32, #tpu.memory_space<any>>
    %124 = tpu.memref_squeeze %123 : memref<1x32xf32, #tpu.memory_space<any>> -> memref<32xf32, #tpu.memory_space<any>>
    %c0_i32_53 = arith.constant 0 : i32
    %125 = tpu.memref_slice %arg8[%c17_i32_51, %c0_i32_53] : memref<64x32xf32, #tpu.memory_space<vmem>> -> memref<1x32xf32, #tpu.memory_space<vmem>>
    %126 = tpu.memref_squeeze %125 : memref<1x32xf32, #tpu.memory_space<vmem>> -> memref<32xf32, #tpu.memory_space<vmem>>
    tpu.enqueue_dma source(%124 : memref<32xf32, #tpu.memory_space<any>>) target(%126 : memref<32xf32, #tpu.memory_space<vmem>>) target_semaphore(%arg9 : memref<!tpu.dma_semaphore, #tpu.memory_space<semaphore_mem>>)
    %c18_i32 = arith.constant 18 : i32
    %127 = arith.addi %0, %c18_i32 : i32
    %128 = arith.index_cast %127 : i32 to index
    %129 = memref.load %arg1[%128] : memref<128xi32, #tpu.memory_space<smem>>
    %c18_i32_54 = arith.constant 18 : i32
    %c0_i32_55 = arith.constant 0 : i32
    %130 = tpu.memref_slice %arg2[%129, %c0_i32_55] : memref<50x32xf32, #tpu.memory_space<any>> -> memref<1x32xf32, #tpu.memory_space<any>>
    %131 = tpu.memref_squeeze %130 : memref<1x32xf32, #tpu.memory_space<any>> -> memref<32xf32, #tpu.memory_space<any>>
    %c0_i32_56 = arith.constant 0 : i32
    %132 = tpu.memref_slice %arg8[%c18_i32_54, %c0_i32_56] : memref<64x32xf32, #tpu.memory_space<vmem>> -> memref<1x32xf32, #tpu.memory_space<vmem>>
    %133 = tpu.memref_squeeze %132 : memref<1x32xf32, #tpu.memory_space<vmem>> -> memref<32xf32, #tpu.memory_space<vmem>>
    tpu.enqueue_dma source(%131 : memref<32xf32, #tpu.memory_space<any>>) target(%133 : memref<32xf32, #tpu.memory_space<vmem>>) target_semaphore(%arg9 : memref<!tpu.dma_semaphore, #tpu.memory_space<semaphore_mem>>)
    %c19_i32 = arith.constant 19 : i32
    %134 = arith.addi %0, %c19_i32 : i32
    %135 = arith.index_cast %134 : i32 to index
    %136 = memref.load %arg1[%135] : memref<128xi32, #tpu.memory_space<smem>>
    %c19_i32_57 = arith.constant 19 : i32
    %c0_i32_58 = arith.constant 0 : i32
    %137 = tpu.memref_slice %arg2[%136, %c0_i32_58] : memref<50x32xf32, #tpu.memory_space<any>> -> memref<1x32xf32, #tpu.memory_space<any>>
    %138 = tpu.memref_squeeze %137 : memref<1x32xf32, #tpu.memory_space<any>> -> memref<32xf32, #tpu.memory_space<any>>
    %c0_i32_59 = arith.constant 0 : i32
    %139 = tpu.memref_slice %arg8[%c19_i32_57, %c0_i32_59] : memref<64x32xf32, #tpu.memory_space<vmem>> -> memref<1x32xf32, #tpu.memory_space<vmem>>
    %140 = tpu.memref_squeeze %139 : memref<1x32xf32, #tpu.memory_space<vmem>> -> memref<32xf32, #tpu.memory_space<vmem>>
    tpu.enqueue_dma source(%138 : memref<32xf32, #tpu.memory_space<any>>) target(%140 : memref<32xf32, #tpu.memory_space<vmem>>) target_semaphore(%arg9 : memref<!tpu.dma_semaphore, #tpu.memory_space<semaphore_mem>>)
    %c20_i32 = arith.constant 20 : i32
    %141 = arith.addi %0, %c20_i32 : i32
    %142 = arith.index_cast %141 : i32 to index
    %143 = memref.load %arg1[%142] : memref<128xi32, #tpu.memory_space<smem>>
    %c20_i32_60 = arith.constant 20 : i32
    %c0_i32_61 = arith.constant 0 : i32
    %144 = tpu.memref_slice %arg2[%143, %c0_i32_61] : memref<50x32xf32, #tpu.memory_space<any>> -> memref<1x32xf32, #tpu.memory_space<any>>
    %145 = tpu.memref_squeeze %144 : memref<1x32xf32, #tpu.memory_space<any>> -> memref<32xf32, #tpu.memory_space<any>>
    %c0_i32_62 = arith.constant 0 : i32
    %146 = tpu.memref_slice %arg8[%c20_i32_60, %c0_i32_62] : memref<64x32xf32, #tpu.memory_space<vmem>> -> memref<1x32xf32, #tpu.memory_space<vmem>>
    %147 = tpu.memref_squeeze %146 : memref<1x32xf32, #tpu.memory_space<vmem>> -> memref<32xf32, #tpu.memory_space<vmem>>
    tpu.enqueue_dma source(%145 : memref<32xf32, #tpu.memory_space<any>>) target(%147 : memref<32xf32, #tpu.memory_space<vmem>>) target_semaphore(%arg9 : memref<!tpu.dma_semaphore, #tpu.memory_space<semaphore_mem>>)
    %c21_i32 = arith.constant 21 : i32
    %148 = arith.addi %0, %c21_i32 : i32
    %149 = arith.index_cast %148 : i32 to index
    %150 = memref.load %arg1[%149] : memref<128xi32, #tpu.memory_space<smem>>
    %c21_i32_63 = arith.constant 21 : i32
    %c0_i32_64 = arith.constant 0 : i32
    %151 = tpu.memref_slice %arg2[%150, %c0_i32_64] : memref<50x32xf32, #tpu.memory_space<any>> -> memref<1x32xf32, #tpu.memory_space<any>>
    %152 = tpu.memref_squeeze %151 : memref<1x32xf32, #tpu.memory_space<any>> -> memref<32xf32, #tpu.memory_space<any>>
    %c0_i32_65 = arith.constant 0 : i32
    %153 = tpu.memref_slice %arg8[%c21_i32_63, %c0_i32_65] : memref<64x32xf32, #tpu.memory_space<vmem>> -> memref<1x32xf32, #tpu.memory_space<vmem>>
    %154 = tpu.memref_squeeze %153 : memref<1x32xf32, #tpu.memory_space<vmem>> -> memref<32xf32, #tpu.memory_space<vmem>>
    tpu.enqueue_dma source(%152 : memref<32xf32, #tpu.memory_space<any>>) target(%154 : memref<32xf32, #tpu.memory_space<vmem>>) target_semaphore(%arg9 : memref<!tpu.dma_semaphore, #tpu.memory_space<semaphore_mem>>)
    %c22_i32 = arith.constant 22 : i32
    %155 = arith.addi %0, %c22_i32 : i32
    %156 = arith.index_cast %155 : i32 to index
    %157 = memref.load %arg1[%156] : memref<128xi32, #tpu.memory_space<smem>>
    %c22_i32_66 = arith.constant 22 : i32
    %c0_i32_67 = arith.constant 0 : i32
    %158 = tpu.memref_slice %arg2[%157, %c0_i32_67] : memref<50x32xf32, #tpu.memory_space<any>> -> memref<1x32xf32, #tpu.memory_space<any>>
    %159 = tpu.memref_squeeze %158 : memref<1x32xf32, #tpu.memory_space<any>> -> memref<32xf32, #tpu.memory_space<any>>
    %c0_i32_68 = arith.constant 0 : i32
    %160 = tpu.memref_slice %arg8[%c22_i32_66, %c0_i32_68] : memref<64x32xf32, #tpu.memory_space<vmem>> -> memref<1x32xf32, #tpu.memory_space<vmem>>
    %161 = tpu.memref_squeeze %160 : memref<1x32xf32, #tpu.memory_space<vmem>> -> memref<32xf32, #tpu.memory_space<vmem>>
    tpu.enqueue_dma source(%159 : memref<32xf32, #tpu.memory_space<any>>) target(%161 : memref<32xf32, #tpu.memory_space<vmem>>) target_semaphore(%arg9 : memref<!tpu.dma_semaphore, #tpu.memory_space<semaphore_mem>>)
    %c23_i32 = arith.constant 23 : i32
    %162 = arith.addi %0, %c23_i32 : i32
    %163 = arith.index_cast %162 : i32 to index
    %164 = memref.load %arg1[%163] : memref<128xi32, #tpu.memory_space<smem>>
    %c23_i32_69 = arith.constant 23 : i32
    %c0_i32_70 = arith.constant 0 : i32
    %165 = tpu.memref_slice %arg2[%164, %c0_i32_70] : memref<50x32xf32, #tpu.memory_space<any>> -> memref<1x32xf32, #tpu.memory_space<any>>
    %166 = tpu.memref_squeeze %165 : memref<1x32xf32, #tpu.memory_space<any>> -> memref<32xf32, #tpu.memory_space<any>>
    %c0_i32_71 = arith.constant 0 : i32
    %167 = tpu.memref_slice %arg8[%c23_i32_69, %c0_i32_71] : memref<64x32xf32, #tpu.memory_space<vmem>> -> memref<1x32xf32, #tpu.memory_space<vmem>>
    %168 = tpu.memref_squeeze %167 : memref<1x32xf32, #tpu.memory_space<vmem>> -> memref<32xf32, #tpu.memory_space<vmem>>
    tpu.enqueue_dma source(%166 : memref<32xf32, #tpu.memory_space<any>>) target(%168 : memref<32xf32, #tpu.memory_space<vmem>>) target_semaphore(%arg9 : memref<!tpu.dma_semaphore, #tpu.memory_space<semaphore_mem>>)
    %c24_i32 = arith.constant 24 : i32
    %169 = arith.addi %0, %c24_i32 : i32
    %170 = arith.index_cast %169 : i32 to index
    %171 = memref.load %arg1[%170] : memref<128xi32, #tpu.memory_space<smem>>
    %c24_i32_72 = arith.constant 24 : i32
    %c0_i32_73 = arith.constant 0 : i32
    %172 = tpu.memref_slice %arg2[%171, %c0_i32_73] : memref<50x32xf32, #tpu.memory_space<any>> -> memref<1x32xf32, #tpu.memory_space<any>>
    %173 = tpu.memref_squeeze %172 : memref<1x32xf32, #tpu.memory_space<any>> -> memref<32xf32, #tpu.memory_space<any>>
    %c0_i32_74 = arith.constant 0 : i32
    %174 = tpu.memref_slice %arg8[%c24_i32_72, %c0_i32_74] : memref<64x32xf32, #tpu.memory_space<vmem>> -> memref<1x32xf32, #tpu.memory_space<vmem>>
    %175 = tpu.memref_squeeze %174 : memref<1x32xf32, #tpu.memory_space<vmem>> -> memref<32xf32, #tpu.memory_space<vmem>>
    tpu.enqueue_dma source(%173 : memref<32xf32, #tpu.memory_space<any>>) target(%175 : memref<32xf32, #tpu.memory_space<vmem>>) target_semaphore(%arg9 : memref<!tpu.dma_semaphore, #tpu.memory_space<semaphore_mem>>)
    %c25_i32 = arith.constant 25 : i32
    %176 = arith.addi %0, %c25_i32 : i32
    %177 = arith.index_cast %176 : i32 to index
    %178 = memref.load %arg1[%177] : memref<128xi32, #tpu.memory_space<smem>>
    %c25_i32_75 = arith.constant 25 : i32
    %c0_i32_76 = arith.constant 0 : i32
    %179 = tpu.memref_slice %arg2[%178, %c0_i32_76] : memref<50x32xf32, #tpu.memory_space<any>> -> memref<1x32xf32, #tpu.memory_space<any>>
    %180 = tpu.memref_squeeze %179 : memref<1x32xf32, #tpu.memory_space<any>> -> memref<32xf32, #tpu.memory_space<any>>
    %c0_i32_77 = arith.constant 0 : i32
    %181 = tpu.memref_slice %arg8[%c25_i32_75, %c0_i32_77] : memref<64x32xf32, #tpu.memory_space<vmem>> -> memref<1x32xf32, #tpu.memory_space<vmem>>
    %182 = tpu.memref_squeeze %181 : memref<1x32xf32, #tpu.memory_space<vmem>> -> memref<32xf32, #tpu.memory_space<vmem>>
    tpu.enqueue_dma source(%180 : memref<32xf32, #tpu.memory_space<any>>) target(%182 : memref<32xf32, #tpu.memory_space<vmem>>) target_semaphore(%arg9 : memref<!tpu.dma_semaphore, #tpu.memory_space<semaphore_mem>>)
    %c26_i32 = arith.constant 26 : i32
    %183 = arith.addi %0, %c26_i32 : i32
    %184 = arith.index_cast %183 : i32 to index
    %185 = memref.load %arg1[%184] : memref<128xi32, #tpu.memory_space<smem>>
    %c26_i32_78 = arith.constant 26 : i32
    %c0_i32_79 = arith.constant 0 : i32
    %186 = tpu.memref_slice %arg2[%185, %c0_i32_79] : memref<50x32xf32, #tpu.memory_space<any>> -> memref<1x32xf32, #tpu.memory_space<any>>
    %187 = tpu.memref_squeeze %186 : memref<1x32xf32, #tpu.memory_space<any>> -> memref<32xf32, #tpu.memory_space<any>>
    %c0_i32_80 = arith.constant 0 : i32
    %188 = tpu.memref_slice %arg8[%c26_i32_78, %c0_i32_80] : memref<64x32xf32, #tpu.memory_space<vmem>> -> memref<1x32xf32, #tpu.memory_space<vmem>>
    %189 = tpu.memref_squeeze %188 : memref<1x32xf32, #tpu.memory_space<vmem>> -> memref<32xf32, #tpu.memory_space<vmem>>
    tpu.enqueue_dma source(%187 : memref<32xf32, #tpu.memory_space<any>>) target(%189 : memref<32xf32, #tpu.memory_space<vmem>>) target_semaphore(%arg9 : memref<!tpu.dma_semaphore, #tpu.memory_space<semaphore_mem>>)
    %c27_i32 = arith.constant 27 : i32
    %190 = arith.addi %0, %c27_i32 : i32
    %191 = arith.index_cast %190 : i32 to index
    %192 = memref.load %arg1[%191] : memref<128xi32, #tpu.memory_space<smem>>
    %c27_i32_81 = arith.constant 27 : i32
    %c0_i32_82 = arith.constant 0 : i32
    %193 = tpu.memref_slice %arg2[%192, %c0_i32_82] : memref<50x32xf32, #tpu.memory_space<any>> -> memref<1x32xf32, #tpu.memory_space<any>>
    %194 = tpu.memref_squeeze %193 : memref<1x32xf32, #tpu.memory_space<any>> -> memref<32xf32, #tpu.memory_space<any>>
    %c0_i32_83 = arith.constant 0 : i32
    %195 = tpu.memref_slice %arg8[%c27_i32_81, %c0_i32_83] : memref<64x32xf32, #tpu.memory_space<vmem>> -> memref<1x32xf32, #tpu.memory_space<vmem>>
    %196 = tpu.memref_squeeze %195 : memref<1x32xf32, #tpu.memory_space<vmem>> -> memref<32xf32, #tpu.memory_space<vmem>>
    tpu.enqueue_dma source(%194 : memref<32xf32, #tpu.memory_space<any>>) target(%196 : memref<32xf32, #tpu.memory_space<vmem>>) target_semaphore(%arg9 : memref<!tpu.dma_semaphore, #tpu.memory_space<semaphore_mem>>)
    %c28_i32 = arith.constant 28 : i32
    %197 = arith.addi %0, %c28_i32 : i32
    %198 = arith.index_cast %197 : i32 to index
    %199 = memref.load %arg1[%198] : memref<128xi32, #tpu.memory_space<smem>>
    %c28_i32_84 = arith.constant 28 : i32
    %c0_i32_85 = arith.constant 0 : i32
    %200 = tpu.memref_slice %arg2[%199, %c0_i32_85] : memref<50x32xf32, #tpu.memory_space<any>> -> memref<1x32xf32, #tpu.memory_space<any>>
    %201 = tpu.memref_squeeze %200 : memref<1x32xf32, #tpu.memory_space<any>> -> memref<32xf32, #tpu.memory_space<any>>
    %c0_i32_86 = arith.constant 0 : i32
    %202 = tpu.memref_slice %arg8[%c28_i32_84, %c0_i32_86] : memref<64x32xf32, #tpu.memory_space<vmem>> -> memref<1x32xf32, #tpu.memory_space<vmem>>
    %203 = tpu.memref_squeeze %202 : memref<1x32xf32, #tpu.memory_space<vmem>> -> memref<32xf32, #tpu.memory_space<vmem>>
    tpu.enqueue_dma source(%201 : memref<32xf32, #tpu.memory_space<any>>) target(%203 : memref<32xf32, #tpu.memory_space<vmem>>) target_semaphore(%arg9 : memref<!tpu.dma_semaphore, #tpu.memory_space<semaphore_mem>>)
    %c29_i32 = arith.constant 29 : i32
    %204 = arith.addi %0, %c29_i32 : i32
    %205 = arith.index_cast %204 : i32 to index
    %206 = memref.load %arg1[%205] : memref<128xi32, #tpu.memory_space<smem>>
    %c29_i32_87 = arith.constant 29 : i32
    %c0_i32_88 = arith.constant 0 : i32
    %207 = tpu.memref_slice %arg2[%206, %c0_i32_88] : memref<50x32xf32, #tpu.memory_space<any>> -> memref<1x32xf32, #tpu.memory_space<any>>
    %208 = tpu.memref_squeeze %207 : memref<1x32xf32, #tpu.memory_space<any>> -> memref<32xf32, #tpu.memory_space<any>>
    %c0_i32_89 = arith.constant 0 : i32
    %209 = tpu.memref_slice %arg8[%c29_i32_87, %c0_i32_89] : memref<64x32xf32, #tpu.memory_space<vmem>> -> memref<1x32xf32, #tpu.memory_space<vmem>>
    %210 = tpu.memref_squeeze %209 : memref<1x32xf32, #tpu.memory_space<vmem>> -> memref<32xf32, #tpu.memory_space<vmem>>
    tpu.enqueue_dma source(%208 : memref<32xf32, #tpu.memory_space<any>>) target(%210 : memref<32xf32, #tpu.memory_space<vmem>>) target_semaphore(%arg9 : memref<!tpu.dma_semaphore, #tpu.memory_space<semaphore_mem>>)
    %c30_i32 = arith.constant 30 : i32
    %211 = arith.addi %0, %c30_i32 : i32
    %212 = arith.index_cast %211 : i32 to index
    %213 = memref.load %arg1[%212] : memref<128xi32, #tpu.memory_space<smem>>
    %c30_i32_90 = arith.constant 30 : i32
    %c0_i32_91 = arith.constant 0 : i32
    %214 = tpu.memref_slice %arg2[%213, %c0_i32_91] : memref<50x32xf32, #tpu.memory_space<any>> -> memref<1x32xf32, #tpu.memory_space<any>>
    %215 = tpu.memref_squeeze %214 : memref<1x32xf32, #tpu.memory_space<any>> -> memref<32xf32, #tpu.memory_space<any>>
    %c0_i32_92 = arith.constant 0 : i32
    %216 = tpu.memref_slice %arg8[%c30_i32_90, %c0_i32_92] : memref<64x32xf32, #tpu.memory_space<vmem>> -> memref<1x32xf32, #tpu.memory_space<vmem>>
    %217 = tpu.memref_squeeze %216 : memref<1x32xf32, #tpu.memory_space<vmem>> -> memref<32xf32, #tpu.memory_space<vmem>>
    tpu.enqueue_dma source(%215 : memref<32xf32, #tpu.memory_space<any>>) target(%217 : memref<32xf32, #tpu.memory_space<vmem>>) target_semaphore(%arg9 : memref<!tpu.dma_semaphore, #tpu.memory_space<semaphore_mem>>)
    %c31_i32 = arith.constant 31 : i32
    %218 = arith.addi %0, %c31_i32 : i32
    %219 = arith.index_cast %218 : i32 to index
    %220 = memref.load %arg1[%219] : memref<128xi32, #tpu.memory_space<smem>>
    %c31_i32_93 = arith.constant 31 : i32
    %c0_i32_94 = arith.constant 0 : i32
    %221 = tpu.memref_slice %arg2[%220, %c0_i32_94] : memref<50x32xf32, #tpu.memory_space<any>> -> memref<1x32xf32, #tpu.memory_space<any>>
    %222 = tpu.memref_squeeze %221 : memref<1x32xf32, #tpu.memory_space<any>> -> memref<32xf32, #tpu.memory_space<any>>
    %c0_i32_95 = arith.constant 0 : i32
    %223 = tpu.memref_slice %arg8[%c31_i32_93, %c0_i32_95] : memref<64x32xf32, #tpu.memory_space<vmem>> -> memref<1x32xf32, #tpu.memory_space<vmem>>
    %224 = tpu.memref_squeeze %223 : memref<1x32xf32, #tpu.memory_space<vmem>> -> memref<32xf32, #tpu.memory_space<vmem>>
    tpu.enqueue_dma source(%222 : memref<32xf32, #tpu.memory_space<any>>) target(%224 : memref<32xf32, #tpu.memory_space<vmem>>) target_semaphore(%arg9 : memref<!tpu.dma_semaphore, #tpu.memory_space<semaphore_mem>>)
    %c32_i32 = arith.constant 32 : i32
    %225 = arith.addi %0, %c32_i32 : i32
    %226 = arith.index_cast %225 : i32 to index
    %227 = memref.load %arg1[%226] : memref<128xi32, #tpu.memory_space<smem>>
    %c32_i32_96 = arith.constant 32 : i32
    %c0_i32_97 = arith.constant 0 : i32
    %228 = tpu.memref_slice %arg2[%227, %c0_i32_97] : memref<50x32xf32, #tpu.memory_space<any>> -> memref<1x32xf32, #tpu.memory_space<any>>
    %229 = tpu.memref_squeeze %228 : memref<1x32xf32, #tpu.memory_space<any>> -> memref<32xf32, #tpu.memory_space<any>>
    %c0_i32_98 = arith.constant 0 : i32
    %230 = tpu.memref_slice %arg8[%c32_i32_96, %c0_i32_98] : memref<64x32xf32, #tpu.memory_space<vmem>> -> memref<1x32xf32, #tpu.memory_space<vmem>>
    %231 = tpu.memref_squeeze %230 : memref<1x32xf32, #tpu.memory_space<vmem>> -> memref<32xf32, #tpu.memory_space<vmem>>
    tpu.enqueue_dma source(%229 : memref<32xf32, #tpu.memory_space<any>>) target(%231 : memref<32xf32, #tpu.memory_space<vmem>>) target_semaphore(%arg9 : memref<!tpu.dma_semaphore, #tpu.memory_space<semaphore_mem>>)
    %c33_i32 = arith.constant 33 : i32
    %232 = arith.addi %0, %c33_i32 : i32
    %233 = arith.index_cast %232 : i32 to index
    %234 = memref.load %arg1[%233] : memref<128xi32, #tpu.memory_space<smem>>
    %c33_i32_99 = arith.constant 33 : i32
    %c0_i32_100 = arith.constant 0 : i32
    %235 = tpu.memref_slice %arg2[%234, %c0_i32_100] : memref<50x32xf32, #tpu.memory_space<any>> -> memref<1x32xf32, #tpu.memory_space<any>>
    %236 = tpu.memref_squeeze %235 : memref<1x32xf32, #tpu.memory_space<any>> -> memref<32xf32, #tpu.memory_space<any>>
    %c0_i32_101 = arith.constant 0 : i32
    %237 = tpu.memref_slice %arg8[%c33_i32_99, %c0_i32_101] : memref<64x32xf32, #tpu.memory_space<vmem>> -> memref<1x32xf32, #tpu.memory_space<vmem>>
    %238 = tpu.memref_squeeze %237 : memref<1x32xf32, #tpu.memory_space<vmem>> -> memref<32xf32, #tpu.memory_space<vmem>>
    tpu.enqueue_dma source(%236 : memref<32xf32, #tpu.memory_space<any>>) target(%238 : memref<32xf32, #tpu.memory_space<vmem>>) target_semaphore(%arg9 : memref<!tpu.dma_semaphore, #tpu.memory_space<semaphore_mem>>)
    %c34_i32 = arith.constant 34 : i32
    %239 = arith.addi %0, %c34_i32 : i32
    %240 = arith.index_cast %239 : i32 to index
    %241 = memref.load %arg1[%240] : memref<128xi32, #tpu.memory_space<smem>>
    %c34_i32_102 = arith.constant 34 : i32
    %c0_i32_103 = arith.constant 0 : i32
    %242 = tpu.memref_slice %arg2[%241, %c0_i32_103] : memref<50x32xf32, #tpu.memory_space<any>> -> memref<1x32xf32, #tpu.memory_space<any>>
    %243 = tpu.memref_squeeze %242 : memref<1x32xf32, #tpu.memory_space<any>> -> memref<32xf32, #tpu.memory_space<any>>
    %c0_i32_104 = arith.constant 0 : i32
    %244 = tpu.memref_slice %arg8[%c34_i32_102, %c0_i32_104] : memref<64x32xf32, #tpu.memory_space<vmem>> -> memref<1x32xf32, #tpu.memory_space<vmem>>
    %245 = tpu.memref_squeeze %244 : memref<1x32xf32, #tpu.memory_space<vmem>> -> memref<32xf32, #tpu.memory_space<vmem>>
    tpu.enqueue_dma source(%243 : memref<32xf32, #tpu.memory_space<any>>) target(%245 : memref<32xf32, #tpu.memory_space<vmem>>) target_semaphore(%arg9 : memref<!tpu.dma_semaphore, #tpu.memory_space<semaphore_mem>>)
    %c35_i32 = arith.constant 35 : i32
    %246 = arith.addi %0, %c35_i32 : i32
    %247 = arith.index_cast %246 : i32 to index
    %248 = memref.load %arg1[%247] : memref<128xi32, #tpu.memory_space<smem>>
    %c35_i32_105 = arith.constant 35 : i32
    %c0_i32_106 = arith.constant 0 : i32
    %249 = tpu.memref_slice %arg2[%248, %c0_i32_106] : memref<50x32xf32, #tpu.memory_space<any>> -> memref<1x32xf32, #tpu.memory_space<any>>
    %250 = tpu.memref_squeeze %249 : memref<1x32xf32, #tpu.memory_space<any>> -> memref<32xf32, #tpu.memory_space<any>>
    %c0_i32_107 = arith.constant 0 : i32
    %251 = tpu.memref_slice %arg8[%c35_i32_105, %c0_i32_107] : memref<64x32xf32, #tpu.memory_space<vmem>> -> memref<1x32xf32, #tpu.memory_space<vmem>>
    %252 = tpu.memref_squeeze %251 : memref<1x32xf32, #tpu.memory_space<vmem>> -> memref<32xf32, #tpu.memory_space<vmem>>
    tpu.enqueue_dma source(%250 : memref<32xf32, #tpu.memory_space<any>>) target(%252 : memref<32xf32, #tpu.memory_space<vmem>>) target_semaphore(%arg9 : memref<!tpu.dma_semaphore, #tpu.memory_space<semaphore_mem>>)
    %c36_i32 = arith.constant 36 : i32
    %253 = arith.addi %0, %c36_i32 : i32
    %254 = arith.index_cast %253 : i32 to index
    %255 = memref.load %arg1[%254] : memref<128xi32, #tpu.memory_space<smem>>
    %c36_i32_108 = arith.constant 36 : i32
    %c0_i32_109 = arith.constant 0 : i32
    %256 = tpu.memref_slice %arg2[%255, %c0_i32_109] : memref<50x32xf32, #tpu.memory_space<any>> -> memref<1x32xf32, #tpu.memory_space<any>>
    %257 = tpu.memref_squeeze %256 : memref<1x32xf32, #tpu.memory_space<any>> -> memref<32xf32, #tpu.memory_space<any>>
    %c0_i32_110 = arith.constant 0 : i32
    %258 = tpu.memref_slice %arg8[%c36_i32_108, %c0_i32_110] : memref<64x32xf32, #tpu.memory_space<vmem>> -> memref<1x32xf32, #tpu.memory_space<vmem>>
    %259 = tpu.memref_squeeze %258 : memref<1x32xf32, #tpu.memory_space<vmem>> -> memref<32xf32, #tpu.memory_space<vmem>>
    tpu.enqueue_dma source(%257 : memref<32xf32, #tpu.memory_space<any>>) target(%259 : memref<32xf32, #tpu.memory_space<vmem>>) target_semaphore(%arg9 : memref<!tpu.dma_semaphore, #tpu.memory_space<semaphore_mem>>)
    %c37_i32 = arith.constant 37 : i32
    %260 = arith.addi %0, %c37_i32 : i32
    %261 = arith.index_cast %260 : i32 to index
    %262 = memref.load %arg1[%261] : memref<128xi32, #tpu.memory_space<smem>>
    %c37_i32_111 = arith.constant 37 : i32
    %c0_i32_112 = arith.constant 0 : i32
    %263 = tpu.memref_slice %arg2[%262, %c0_i32_112] : memref<50x32xf32, #tpu.memory_space<any>> -> memref<1x32xf32, #tpu.memory_space<any>>
    %264 = tpu.memref_squeeze %263 : memref<1x32xf32, #tpu.memory_space<any>> -> memref<32xf32, #tpu.memory_space<any>>
    %c0_i32_113 = arith.constant 0 : i32
    %265 = tpu.memref_slice %arg8[%c37_i32_111, %c0_i32_113] : memref<64x32xf32, #tpu.memory_space<vmem>> -> memref<1x32xf32, #tpu.memory_space<vmem>>
    %266 = tpu.memref_squeeze %265 : memref<1x32xf32, #tpu.memory_space<vmem>> -> memref<32xf32, #tpu.memory_space<vmem>>
    tpu.enqueue_dma source(%264 : memref<32xf32, #tpu.memory_space<any>>) target(%266 : memref<32xf32, #tpu.memory_space<vmem>>) target_semaphore(%arg9 : memref<!tpu.dma_semaphore, #tpu.memory_space<semaphore_mem>>)
    %c38_i32 = arith.constant 38 : i32
    %267 = arith.addi %0, %c38_i32 : i32
    %268 = arith.index_cast %267 : i32 to index
    %269 = memref.load %arg1[%268] : memref<128xi32, #tpu.memory_space<smem>>
    %c38_i32_114 = arith.constant 38 : i32
    %c0_i32_115 = arith.constant 0 : i32
    %270 = tpu.memref_slice %arg2[%269, %c0_i32_115] : memref<50x32xf32, #tpu.memory_space<any>> -> memref<1x32xf32, #tpu.memory_space<any>>
    %271 = tpu.memref_squeeze %270 : memref<1x32xf32, #tpu.memory_space<any>> -> memref<32xf32, #tpu.memory_space<any>>
    %c0_i32_116 = arith.constant 0 : i32
    %272 = tpu.memref_slice %arg8[%c38_i32_114, %c0_i32_116] : memref<64x32xf32, #tpu.memory_space<vmem>> -> memref<1x32xf32, #tpu.memory_space<vmem>>
    %273 = tpu.memref_squeeze %272 : memref<1x32xf32, #tpu.memory_space<vmem>> -> memref<32xf32, #tpu.memory_space<vmem>>
    tpu.enqueue_dma source(%271 : memref<32xf32, #tpu.memory_space<any>>) target(%273 : memref<32xf32, #tpu.memory_space<vmem>>) target_semaphore(%arg9 : memref<!tpu.dma_semaphore, #tpu.memory_space<semaphore_mem>>)
    %c39_i32 = arith.constant 39 : i32
    %274 = arith.addi %0, %c39_i32 : i32
    %275 = arith.index_cast %274 : i32 to index
    %276 = memref.load %arg1[%275] : memref<128xi32, #tpu.memory_space<smem>>
    %c39_i32_117 = arith.constant 39 : i32
    %c0_i32_118 = arith.constant 0 : i32
    %277 = tpu.memref_slice %arg2[%276, %c0_i32_118] : memref<50x32xf32, #tpu.memory_space<any>> -> memref<1x32xf32, #tpu.memory_space<any>>
    %278 = tpu.memref_squeeze %277 : memref<1x32xf32, #tpu.memory_space<any>> -> memref<32xf32, #tpu.memory_space<any>>
    %c0_i32_119 = arith.constant 0 : i32
    %279 = tpu.memref_slice %arg8[%c39_i32_117, %c0_i32_119] : memref<64x32xf32, #tpu.memory_space<vmem>> -> memref<1x32xf32, #tpu.memory_space<vmem>>
    %280 = tpu.memref_squeeze %279 : memref<1x32xf32, #tpu.memory_space<vmem>> -> memref<32xf32, #tpu.memory_space<vmem>>
    tpu.enqueue_dma source(%278 : memref<32xf32, #tpu.memory_space<any>>) target(%280 : memref<32xf32, #tpu.memory_space<vmem>>) target_semaphore(%arg9 : memref<!tpu.dma_semaphore, #tpu.memory_space<semaphore_mem>>)
    %c40_i32 = arith.constant 40 : i32
    %281 = arith.addi %0, %c40_i32 : i32
    %282 = arith.index_cast %281 : i32 to index
    %283 = memref.load %arg1[%282] : memref<128xi32, #tpu.memory_space<smem>>
    %c40_i32_120 = arith.constant 40 : i32
    %c0_i32_121 = arith.constant 0 : i32
    %284 = tpu.memref_slice %arg2[%283, %c0_i32_121] : memref<50x32xf32, #tpu.memory_space<any>> -> memref<1x32xf32, #tpu.memory_space<any>>
    %285 = tpu.memref_squeeze %284 : memref<1x32xf32, #tpu.memory_space<any>> -> memref<32xf32, #tpu.memory_space<any>>
    %c0_i32_122 = arith.constant 0 : i32
    %286 = tpu.memref_slice %arg8[%c40_i32_120, %c0_i32_122] : memref<64x32xf32, #tpu.memory_space<vmem>> -> memref<1x32xf32, #tpu.memory_space<vmem>>
    %287 = tpu.memref_squeeze %286 : memref<1x32xf32, #tpu.memory_space<vmem>> -> memref<32xf32, #tpu.memory_space<vmem>>
    tpu.enqueue_dma source(%285 : memref<32xf32, #tpu.memory_space<any>>) target(%287 : memref<32xf32, #tpu.memory_space<vmem>>) target_semaphore(%arg9 : memref<!tpu.dma_semaphore, #tpu.memory_space<semaphore_mem>>)
    %c41_i32 = arith.constant 41 : i32
    %288 = arith.addi %0, %c41_i32 : i32
    %289 = arith.index_cast %288 : i32 to index
    %290 = memref.load %arg1[%289] : memref<128xi32, #tpu.memory_space<smem>>
    %c41_i32_123 = arith.constant 41 : i32
    %c0_i32_124 = arith.constant 0 : i32
    %291 = tpu.memref_slice %arg2[%290, %c0_i32_124] : memref<50x32xf32, #tpu.memory_space<any>> -> memref<1x32xf32, #tpu.memory_space<any>>
    %292 = tpu.memref_squeeze %291 : memref<1x32xf32, #tpu.memory_space<any>> -> memref<32xf32, #tpu.memory_space<any>>
    %c0_i32_125 = arith.constant 0 : i32
    %293 = tpu.memref_slice %arg8[%c41_i32_123, %c0_i32_125] : memref<64x32xf32, #tpu.memory_space<vmem>> -> memref<1x32xf32, #tpu.memory_space<vmem>>
    %294 = tpu.memref_squeeze %293 : memref<1x32xf32, #tpu.memory_space<vmem>> -> memref<32xf32, #tpu.memory_space<vmem>>
    tpu.enqueue_dma source(%292 : memref<32xf32, #tpu.memory_space<any>>) target(%294 : memref<32xf32, #tpu.memory_space<vmem>>) target_semaphore(%arg9 : memref<!tpu.dma_semaphore, #tpu.memory_space<semaphore_mem>>)
    %c42_i32 = arith.constant 42 : i32
    %295 = arith.addi %0, %c42_i32 : i32
    %296 = arith.index_cast %295 : i32 to index
    %297 = memref.load %arg1[%296] : memref<128xi32, #tpu.memory_space<smem>>
    %c42_i32_126 = arith.constant 42 : i32
    %c0_i32_127 = arith.constant 0 : i32
    %298 = tpu.memref_slice %arg2[%297, %c0_i32_127] : memref<50x32xf32, #tpu.memory_space<any>> -> memref<1x32xf32, #tpu.memory_space<any>>
    %299 = tpu.memref_squeeze %298 : memref<1x32xf32, #tpu.memory_space<any>> -> memref<32xf32, #tpu.memory_space<any>>
    %c0_i32_128 = arith.constant 0 : i32
    %300 = tpu.memref_slice %arg8[%c42_i32_126, %c0_i32_128] : memref<64x32xf32, #tpu.memory_space<vmem>> -> memref<1x32xf32, #tpu.memory_space<vmem>>
    %301 = tpu.memref_squeeze %300 : memref<1x32xf32, #tpu.memory_space<vmem>> -> memref<32xf32, #tpu.memory_space<vmem>>
    tpu.enqueue_dma source(%299 : memref<32xf32, #tpu.memory_space<any>>) target(%301 : memref<32xf32, #tpu.memory_space<vmem>>) target_semaphore(%arg9 : memref<!tpu.dma_semaphore, #tpu.memory_space<semaphore_mem>>)
    %c43_i32 = arith.constant 43 : i32
    %302 = arith.addi %0, %c43_i32 : i32
    %303 = arith.index_cast %302 : i32 to index
    %304 = memref.load %arg1[%303] : memref<128xi32, #tpu.memory_space<smem>>
    %c43_i32_129 = arith.constant 43 : i32
    %c0_i32_130 = arith.constant 0 : i32
    %305 = tpu.memref_slice %arg2[%304, %c0_i32_130] : memref<50x32xf32, #tpu.memory_space<any>> -> memref<1x32xf32, #tpu.memory_space<any>>
    %306 = tpu.memref_squeeze %305 : memref<1x32xf32, #tpu.memory_space<any>> -> memref<32xf32, #tpu.memory_space<any>>
    %c0_i32_131 = arith.constant 0 : i32
    %307 = tpu.memref_slice %arg8[%c43_i32_129, %c0_i32_131] : memref<64x32xf32, #tpu.memory_space<vmem>> -> memref<1x32xf32, #tpu.memory_space<vmem>>
    %308 = tpu.memref_squeeze %307 : memref<1x32xf32, #tpu.memory_space<vmem>> -> memref<32xf32, #tpu.memory_space<vmem>>
    tpu.enqueue_dma source(%306 : memref<32xf32, #tpu.memory_space<any>>) target(%308 : memref<32xf32, #tpu.memory_space<vmem>>) target_semaphore(%arg9 : memref<!tpu.dma_semaphore, #tpu.memory_space<semaphore_mem>>)
    %c44_i32 = arith.constant 44 : i32
    %309 = arith.addi %0, %c44_i32 : i32
    %310 = arith.index_cast %309 : i32 to index
    %311 = memref.load %arg1[%310] : memref<128xi32, #tpu.memory_space<smem>>
    %c44_i32_132 = arith.constant 44 : i32
    %c0_i32_133 = arith.constant 0 : i32
    %312 = tpu.memref_slice %arg2[%311, %c0_i32_133] : memref<50x32xf32, #tpu.memory_space<any>> -> memref<1x32xf32, #tpu.memory_space<any>>
    %313 = tpu.memref_squeeze %312 : memref<1x32xf32, #tpu.memory_space<any>> -> memref<32xf32, #tpu.memory_space<any>>
    %c0_i32_134 = arith.constant 0 : i32
    %314 = tpu.memref_slice %arg8[%c44_i32_132, %c0_i32_134] : memref<64x32xf32, #tpu.memory_space<vmem>> -> memref<1x32xf32, #tpu.memory_space<vmem>>
    %315 = tpu.memref_squeeze %314 : memref<1x32xf32, #tpu.memory_space<vmem>> -> memref<32xf32, #tpu.memory_space<vmem>>
    tpu.enqueue_dma source(%313 : memref<32xf32, #tpu.memory_space<any>>) target(%315 : memref<32xf32, #tpu.memory_space<vmem>>) target_semaphore(%arg9 : memref<!tpu.dma_semaphore, #tpu.memory_space<semaphore_mem>>)
    %c45_i32 = arith.constant 45 : i32
    %316 = arith.addi %0, %c45_i32 : i32
    %317 = arith.index_cast %316 : i32 to index
    %318 = memref.load %arg1[%317] : memref<128xi32, #tpu.memory_space<smem>>
    %c45_i32_135 = arith.constant 45 : i32
    %c0_i32_136 = arith.constant 0 : i32
    %319 = tpu.memref_slice %arg2[%318, %c0_i32_136] : memref<50x32xf32, #tpu.memory_space<any>> -> memref<1x32xf32, #tpu.memory_space<any>>
    %320 = tpu.memref_squeeze %319 : memref<1x32xf32, #tpu.memory_space<any>> -> memref<32xf32, #tpu.memory_space<any>>
    %c0_i32_137 = arith.constant 0 : i32
    %321 = tpu.memref_slice %arg8[%c45_i32_135, %c0_i32_137] : memref<64x32xf32, #tpu.memory_space<vmem>> -> memref<1x32xf32, #tpu.memory_space<vmem>>
    %322 = tpu.memref_squeeze %321 : memref<1x32xf32, #tpu.memory_space<vmem>> -> memref<32xf32, #tpu.memory_space<vmem>>
    tpu.enqueue_dma source(%320 : memref<32xf32, #tpu.memory_space<any>>) target(%322 : memref<32xf32, #tpu.memory_space<vmem>>) target_semaphore(%arg9 : memref<!tpu.dma_semaphore, #tpu.memory_space<semaphore_mem>>)
    %c46_i32 = arith.constant 46 : i32
    %323 = arith.addi %0, %c46_i32 : i32
    %324 = arith.index_cast %323 : i32 to index
    %325 = memref.load %arg1[%324] : memref<128xi32, #tpu.memory_space<smem>>
    %c46_i32_138 = arith.constant 46 : i32
    %c0_i32_139 = arith.constant 0 : i32
    %326 = tpu.memref_slice %arg2[%325, %c0_i32_139] : memref<50x32xf32, #tpu.memory_space<any>> -> memref<1x32xf32, #tpu.memory_space<any>>
    %327 = tpu.memref_squeeze %326 : memref<1x32xf32, #tpu.memory_space<any>> -> memref<32xf32, #tpu.memory_space<any>>
    %c0_i32_140 = arith.constant 0 : i32
    %328 = tpu.memref_slice %arg8[%c46_i32_138, %c0_i32_140] : memref<64x32xf32, #tpu.memory_space<vmem>> -> memref<1x32xf32, #tpu.memory_space<vmem>>
    %329 = tpu.memref_squeeze %328 : memref<1x32xf32, #tpu.memory_space<vmem>> -> memref<32xf32, #tpu.memory_space<vmem>>
    tpu.enqueue_dma source(%327 : memref<32xf32, #tpu.memory_space<any>>) target(%329 : memref<32xf32, #tpu.memory_space<vmem>>) target_semaphore(%arg9 : memref<!tpu.dma_semaphore, #tpu.memory_space<semaphore_mem>>)
    %c47_i32 = arith.constant 47 : i32
    %330 = arith.addi %0, %c47_i32 : i32
    %331 = arith.index_cast %330 : i32 to index
    %332 = memref.load %arg1[%331] : memref<128xi32, #tpu.memory_space<smem>>
    %c47_i32_141 = arith.constant 47 : i32
    %c0_i32_142 = arith.constant 0 : i32
    %333 = tpu.memref_slice %arg2[%332, %c0_i32_142] : memref<50x32xf32, #tpu.memory_space<any>> -> memref<1x32xf32, #tpu.memory_space<any>>
    %334 = tpu.memref_squeeze %333 : memref<1x32xf32, #tpu.memory_space<any>> -> memref<32xf32, #tpu.memory_space<any>>
    %c0_i32_143 = arith.constant 0 : i32
    %335 = tpu.memref_slice %arg8[%c47_i32_141, %c0_i32_143] : memref<64x32xf32, #tpu.memory_space<vmem>> -> memref<1x32xf32, #tpu.memory_space<vmem>>
    %336 = tpu.memref_squeeze %335 : memref<1x32xf32, #tpu.memory_space<vmem>> -> memref<32xf32, #tpu.memory_space<vmem>>
    tpu.enqueue_dma source(%334 : memref<32xf32, #tpu.memory_space<any>>) target(%336 : memref<32xf32, #tpu.memory_space<vmem>>) target_semaphore(%arg9 : memref<!tpu.dma_semaphore, #tpu.memory_space<semaphore_mem>>)
    %c48_i32 = arith.constant 48 : i32
    %337 = arith.addi %0, %c48_i32 : i32
    %338 = arith.index_cast %337 : i32 to index
    %339 = memref.load %arg1[%338] : memref<128xi32, #tpu.memory_space<smem>>
    %c48_i32_144 = arith.constant 48 : i32
    %c0_i32_145 = arith.constant 0 : i32
    %340 = tpu.memref_slice %arg2[%339, %c0_i32_145] : memref<50x32xf32, #tpu.memory_space<any>> -> memref<1x32xf32, #tpu.memory_space<any>>
    %341 = tpu.memref_squeeze %340 : memref<1x32xf32, #tpu.memory_space<any>> -> memref<32xf32, #tpu.memory_space<any>>
    %c0_i32_146 = arith.constant 0 : i32
    %342 = tpu.memref_slice %arg8[%c48_i32_144, %c0_i32_146] : memref<64x32xf32, #tpu.memory_space<vmem>> -> memref<1x32xf32, #tpu.memory_space<vmem>>
    %343 = tpu.memref_squeeze %342 : memref<1x32xf32, #tpu.memory_space<vmem>> -> memref<32xf32, #tpu.memory_space<vmem>>
    tpu.enqueue_dma source(%341 : memref<32xf32, #tpu.memory_space<any>>) target(%343 : memref<32xf32, #tpu.memory_space<vmem>>) target_semaphore(%arg9 : memref<!tpu.dma_semaphore, #tpu.memory_space<semaphore_mem>>)
    %c49_i32 = arith.constant 49 : i32
    %344 = arith.addi %0, %c49_i32 : i32
    %345 = arith.index_cast %344 : i32 to index
    %346 = memref.load %arg1[%345] : memref<128xi32, #tpu.memory_space<smem>>
    %c49_i32_147 = arith.constant 49 : i32
    %c0_i32_148 = arith.constant 0 : i32
    %347 = tpu.memref_slice %arg2[%346, %c0_i32_148] : memref<50x32xf32, #tpu.memory_space<any>> -> memref<1x32xf32, #tpu.memory_space<any>>
    %348 = tpu.memref_squeeze %347 : memref<1x32xf32, #tpu.memory_space<any>> -> memref<32xf32, #tpu.memory_space<any>>
    %c0_i32_149 = arith.constant 0 : i32
    %349 = tpu.memref_slice %arg8[%c49_i32_147, %c0_i32_149] : memref<64x32xf32, #tpu.memory_space<vmem>> -> memref<1x32xf32, #tpu.memory_space<vmem>>
    %350 = tpu.memref_squeeze %349 : memref<1x32xf32, #tpu.memory_space<vmem>> -> memref<32xf32, #tpu.memory_space<vmem>>
    tpu.enqueue_dma source(%348 : memref<32xf32, #tpu.memory_space<any>>) target(%350 : memref<32xf32, #tpu.memory_space<vmem>>) target_semaphore(%arg9 : memref<!tpu.dma_semaphore, #tpu.memory_space<semaphore_mem>>)
    %c50_i32 = arith.constant 50 : i32
    %351 = arith.addi %0, %c50_i32 : i32
    %352 = arith.index_cast %351 : i32 to index
    %353 = memref.load %arg1[%352] : memref<128xi32, #tpu.memory_space<smem>>
    %c50_i32_150 = arith.constant 50 : i32
    %c0_i32_151 = arith.constant 0 : i32
    %354 = tpu.memref_slice %arg2[%353, %c0_i32_151] : memref<50x32xf32, #tpu.memory_space<any>> -> memref<1x32xf32, #tpu.memory_space<any>>
    %355 = tpu.memref_squeeze %354 : memref<1x32xf32, #tpu.memory_space<any>> -> memref<32xf32, #tpu.memory_space<any>>
    %c0_i32_152 = arith.constant 0 : i32
    %356 = tpu.memref_slice %arg8[%c50_i32_150, %c0_i32_152] : memref<64x32xf32, #tpu.memory_space<vmem>> -> memref<1x32xf32, #tpu.memory_space<vmem>>
    %357 = tpu.memref_squeeze %356 : memref<1x32xf32, #tpu.memory_space<vmem>> -> memref<32xf32, #tpu.memory_space<vmem>>
    tpu.enqueue_dma source(%355 : memref<32xf32, #tpu.memory_space<any>>) target(%357 : memref<32xf32, #tpu.memory_space<vmem>>) target_semaphore(%arg9 : memref<!tpu.dma_semaphore, #tpu.memory_space<semaphore_mem>>)
    %c51_i32 = arith.constant 51 : i32
    %358 = arith.addi %0, %c51_i32 : i32
    %359 = arith.index_cast %358 : i32 to index
    %360 = memref.load %arg1[%359] : memref<128xi32, #tpu.memory_space<smem>>
    %c51_i32_153 = arith.constant 51 : i32
    %c0_i32_154 = arith.constant 0 : i32
    %361 = tpu.memref_slice %arg2[%360, %c0_i32_154] : memref<50x32xf32, #tpu.memory_space<any>> -> memref<1x32xf32, #tpu.memory_space<any>>
    %362 = tpu.memref_squeeze %361 : memref<1x32xf32, #tpu.memory_space<any>> -> memref<32xf32, #tpu.memory_space<any>>
    %c0_i32_155 = arith.constant 0 : i32
    %363 = tpu.memref_slice %arg8[%c51_i32_153, %c0_i32_155] : memref<64x32xf32, #tpu.memory_space<vmem>> -> memref<1x32xf32, #tpu.memory_space<vmem>>
    %364 = tpu.memref_squeeze %363 : memref<1x32xf32, #tpu.memory_space<vmem>> -> memref<32xf32, #tpu.memory_space<vmem>>
    tpu.enqueue_dma source(%362 : memref<32xf32, #tpu.memory_space<any>>) target(%364 : memref<32xf32, #tpu.memory_space<vmem>>) target_semaphore(%arg9 : memref<!tpu.dma_semaphore, #tpu.memory_space<semaphore_mem>>)
    %c52_i32 = arith.constant 52 : i32
    %365 = arith.addi %0, %c52_i32 : i32
    %366 = arith.index_cast %365 : i32 to index
    %367 = memref.load %arg1[%366] : memref<128xi32, #tpu.memory_space<smem>>
    %c52_i32_156 = arith.constant 52 : i32
    %c0_i32_157 = arith.constant 0 : i32
    %368 = tpu.memref_slice %arg2[%367, %c0_i32_157] : memref<50x32xf32, #tpu.memory_space<any>> -> memref<1x32xf32, #tpu.memory_space<any>>
    %369 = tpu.memref_squeeze %368 : memref<1x32xf32, #tpu.memory_space<any>> -> memref<32xf32, #tpu.memory_space<any>>
    %c0_i32_158 = arith.constant 0 : i32
    %370 = tpu.memref_slice %arg8[%c52_i32_156, %c0_i32_158] : memref<64x32xf32, #tpu.memory_space<vmem>> -> memref<1x32xf32, #tpu.memory_space<vmem>>
    %371 = tpu.memref_squeeze %370 : memref<1x32xf32, #tpu.memory_space<vmem>> -> memref<32xf32, #tpu.memory_space<vmem>>
    tpu.enqueue_dma source(%369 : memref<32xf32, #tpu.memory_space<any>>) target(%371 : memref<32xf32, #tpu.memory_space<vmem>>) target_semaphore(%arg9 : memref<!tpu.dma_semaphore, #tpu.memory_space<semaphore_mem>>)
    %c53_i32 = arith.constant 53 : i32
    %372 = arith.addi %0, %c53_i32 : i32
    %373 = arith.index_cast %372 : i32 to index
    %374 = memref.load %arg1[%373] : memref<128xi32, #tpu.memory_space<smem>>
    %c53_i32_159 = arith.constant 53 : i32
    %c0_i32_160 = arith.constant 0 : i32
    %375 = tpu.memref_slice %arg2[%374, %c0_i32_160] : memref<50x32xf32, #tpu.memory_space<any>> -> memref<1x32xf32, #tpu.memory_space<any>>
    %376 = tpu.memref_squeeze %375 : memref<1x32xf32, #tpu.memory_space<any>> -> memref<32xf32, #tpu.memory_space<any>>
    %c0_i32_161 = arith.constant 0 : i32
    %377 = tpu.memref_slice %arg8[%c53_i32_159, %c0_i32_161] : memref<64x32xf32, #tpu.memory_space<vmem>> -> memref<1x32xf32, #tpu.memory_space<vmem>>
    %378 = tpu.memref_squeeze %377 : memref<1x32xf32, #tpu.memory_space<vmem>> -> memref<32xf32, #tpu.memory_space<vmem>>
    tpu.enqueue_dma source(%376 : memref<32xf32, #tpu.memory_space<any>>) target(%378 : memref<32xf32, #tpu.memory_space<vmem>>) target_semaphore(%arg9 : memref<!tpu.dma_semaphore, #tpu.memory_space<semaphore_mem>>)
    %c54_i32 = arith.constant 54 : i32
    %379 = arith.addi %0, %c54_i32 : i32
    %380 = arith.index_cast %379 : i32 to index
    %381 = memref.load %arg1[%380] : memref<128xi32, #tpu.memory_space<smem>>
    %c54_i32_162 = arith.constant 54 : i32
    %c0_i32_163 = arith.constant 0 : i32
    %382 = tpu.memref_slice %arg2[%381, %c0_i32_163] : memref<50x32xf32, #tpu.memory_space<any>> -> memref<1x32xf32, #tpu.memory_space<any>>
    %383 = tpu.memref_squeeze %382 : memref<1x32xf32, #tpu.memory_space<any>> -> memref<32xf32, #tpu.memory_space<any>>
    %c0_i32_164 = arith.constant 0 : i32
    %384 = tpu.memref_slice %arg8[%c54_i32_162, %c0_i32_164] : memref<64x32xf32, #tpu.memory_space<vmem>> -> memref<1x32xf32, #tpu.memory_space<vmem>>
    %385 = tpu.memref_squeeze %384 : memref<1x32xf32, #tpu.memory_space<vmem>> -> memref<32xf32, #tpu.memory_space<vmem>>
    tpu.enqueue_dma source(%383 : memref<32xf32, #tpu.memory_space<any>>) target(%385 : memref<32xf32, #tpu.memory_space<vmem>>) target_semaphore(%arg9 : memref<!tpu.dma_semaphore, #tpu.memory_space<semaphore_mem>>)
    %c55_i32 = arith.constant 55 : i32
    %386 = arith.addi %0, %c55_i32 : i32
    %387 = arith.index_cast %386 : i32 to index
    %388 = memref.load %arg1[%387] : memref<128xi32, #tpu.memory_space<smem>>
    %c55_i32_165 = arith.constant 55 : i32
    %c0_i32_166 = arith.constant 0 : i32
    %389 = tpu.memref_slice %arg2[%388, %c0_i32_166] : memref<50x32xf32, #tpu.memory_space<any>> -> memref<1x32xf32, #tpu.memory_space<any>>
    %390 = tpu.memref_squeeze %389 : memref<1x32xf32, #tpu.memory_space<any>> -> memref<32xf32, #tpu.memory_space<any>>
    %c0_i32_167 = arith.constant 0 : i32
    %391 = tpu.memref_slice %arg8[%c55_i32_165, %c0_i32_167] : memref<64x32xf32, #tpu.memory_space<vmem>> -> memref<1x32xf32, #tpu.memory_space<vmem>>
    %392 = tpu.memref_squeeze %391 : memref<1x32xf32, #tpu.memory_space<vmem>> -> memref<32xf32, #tpu.memory_space<vmem>>
    tpu.enqueue_dma source(%390 : memref<32xf32, #tpu.memory_space<any>>) target(%392 : memref<32xf32, #tpu.memory_space<vmem>>) target_semaphore(%arg9 : memref<!tpu.dma_semaphore, #tpu.memory_space<semaphore_mem>>)
    %c56_i32 = arith.constant 56 : i32
    %393 = arith.addi %0, %c56_i32 : i32
    %394 = arith.index_cast %393 : i32 to index
    %395 = memref.load %arg1[%394] : memref<128xi32, #tpu.memory_space<smem>>
    %c56_i32_168 = arith.constant 56 : i32
    %c0_i32_169 = arith.constant 0 : i32
    %396 = tpu.memref_slice %arg2[%395, %c0_i32_169] : memref<50x32xf32, #tpu.memory_space<any>> -> memref<1x32xf32, #tpu.memory_space<any>>
    %397 = tpu.memref_squeeze %396 : memref<1x32xf32, #tpu.memory_space<any>> -> memref<32xf32, #tpu.memory_space<any>>
    %c0_i32_170 = arith.constant 0 : i32
    %398 = tpu.memref_slice %arg8[%c56_i32_168, %c0_i32_170] : memref<64x32xf32, #tpu.memory_space<vmem>> -> memref<1x32xf32, #tpu.memory_space<vmem>>
    %399 = tpu.memref_squeeze %398 : memref<1x32xf32, #tpu.memory_space<vmem>> -> memref<32xf32, #tpu.memory_space<vmem>>
    tpu.enqueue_dma source(%397 : memref<32xf32, #tpu.memory_space<any>>) target(%399 : memref<32xf32, #tpu.memory_space<vmem>>) target_semaphore(%arg9 : memref<!tpu.dma_semaphore, #tpu.memory_space<semaphore_mem>>)
    %c57_i32 = arith.constant 57 : i32
    %400 = arith.addi %0, %c57_i32 : i32
    %401 = arith.index_cast %400 : i32 to index
    %402 = memref.load %arg1[%401] : memref<128xi32, #tpu.memory_space<smem>>
    %c57_i32_171 = arith.constant 57 : i32
    %c0_i32_172 = arith.constant 0 : i32
    %403 = tpu.memref_slice %arg2[%402, %c0_i32_172] : memref<50x32xf32, #tpu.memory_space<any>> -> memref<1x32xf32, #tpu.memory_space<any>>
    %404 = tpu.memref_squeeze %403 : memref<1x32xf32, #tpu.memory_space<any>> -> memref<32xf32, #tpu.memory_space<any>>
    %c0_i32_173 = arith.constant 0 : i32
    %405 = tpu.memref_slice %arg8[%c57_i32_171, %c0_i32_173] : memref<64x32xf32, #tpu.memory_space<vmem>> -> memref<1x32xf32, #tpu.memory_space<vmem>>
    %406 = tpu.memref_squeeze %405 : memref<1x32xf32, #tpu.memory_space<vmem>> -> memref<32xf32, #tpu.memory_space<vmem>>
    tpu.enqueue_dma source(%404 : memref<32xf32, #tpu.memory_space<any>>) target(%406 : memref<32xf32, #tpu.memory_space<vmem>>) target_semaphore(%arg9 : memref<!tpu.dma_semaphore, #tpu.memory_space<semaphore_mem>>)
    %c58_i32 = arith.constant 58 : i32
    %407 = arith.addi %0, %c58_i32 : i32
    %408 = arith.index_cast %407 : i32 to index
    %409 = memref.load %arg1[%408] : memref<128xi32, #tpu.memory_space<smem>>
    %c58_i32_174 = arith.constant 58 : i32
    %c0_i32_175 = arith.constant 0 : i32
    %410 = tpu.memref_slice %arg2[%409, %c0_i32_175] : memref<50x32xf32, #tpu.memory_space<any>> -> memref<1x32xf32, #tpu.memory_space<any>>
    %411 = tpu.memref_squeeze %410 : memref<1x32xf32, #tpu.memory_space<any>> -> memref<32xf32, #tpu.memory_space<any>>
    %c0_i32_176 = arith.constant 0 : i32
    %412 = tpu.memref_slice %arg8[%c58_i32_174, %c0_i32_176] : memref<64x32xf32, #tpu.memory_space<vmem>> -> memref<1x32xf32, #tpu.memory_space<vmem>>
    %413 = tpu.memref_squeeze %412 : memref<1x32xf32, #tpu.memory_space<vmem>> -> memref<32xf32, #tpu.memory_space<vmem>>
    tpu.enqueue_dma source(%411 : memref<32xf32, #tpu.memory_space<any>>) target(%413 : memref<32xf32, #tpu.memory_space<vmem>>) target_semaphore(%arg9 : memref<!tpu.dma_semaphore, #tpu.memory_space<semaphore_mem>>)
    %c59_i32 = arith.constant 59 : i32
    %414 = arith.addi %0, %c59_i32 : i32
    %415 = arith.index_cast %414 : i32 to index
    %416 = memref.load %arg1[%415] : memref<128xi32, #tpu.memory_space<smem>>
    %c59_i32_177 = arith.constant 59 : i32
    %c0_i32_178 = arith.constant 0 : i32
    %417 = tpu.memref_slice %arg2[%416, %c0_i32_178] : memref<50x32xf32, #tpu.memory_space<any>> -> memref<1x32xf32, #tpu.memory_space<any>>
    %418 = tpu.memref_squeeze %417 : memref<1x32xf32, #tpu.memory_space<any>> -> memref<32xf32, #tpu.memory_space<any>>
    %c0_i32_179 = arith.constant 0 : i32
    %419 = tpu.memref_slice %arg8[%c59_i32_177, %c0_i32_179] : memref<64x32xf32, #tpu.memory_space<vmem>> -> memref<1x32xf32, #tpu.memory_space<vmem>>
    %420 = tpu.memref_squeeze %419 : memref<1x32xf32, #tpu.memory_space<vmem>> -> memref<32xf32, #tpu.memory_space<vmem>>
    tpu.enqueue_dma source(%418 : memref<32xf32, #tpu.memory_space<any>>) target(%420 : memref<32xf32, #tpu.memory_space<vmem>>) target_semaphore(%arg9 : memref<!tpu.dma_semaphore, #tpu.memory_space<semaphore_mem>>)
    %c60_i32 = arith.constant 60 : i32
    %421 = arith.addi %0, %c60_i32 : i32
    %422 = arith.index_cast %421 : i32 to index
    %423 = memref.load %arg1[%422] : memref<128xi32, #tpu.memory_space<smem>>
    %c60_i32_180 = arith.constant 60 : i32
    %c0_i32_181 = arith.constant 0 : i32
    %424 = tpu.memref_slice %arg2[%423, %c0_i32_181] : memref<50x32xf32, #tpu.memory_space<any>> -> memref<1x32xf32, #tpu.memory_space<any>>
    %425 = tpu.memref_squeeze %424 : memref<1x32xf32, #tpu.memory_space<any>> -> memref<32xf32, #tpu.memory_space<any>>
    %c0_i32_182 = arith.constant 0 : i32
    %426 = tpu.memref_slice %arg8[%c60_i32_180, %c0_i32_182] : memref<64x32xf32, #tpu.memory_space<vmem>> -> memref<1x32xf32, #tpu.memory_space<vmem>>
    %427 = tpu.memref_squeeze %426 : memref<1x32xf32, #tpu.memory_space<vmem>> -> memref<32xf32, #tpu.memory_space<vmem>>
    tpu.enqueue_dma source(%425 : memref<32xf32, #tpu.memory_space<any>>) target(%427 : memref<32xf32, #tpu.memory_space<vmem>>) target_semaphore(%arg9 : memref<!tpu.dma_semaphore, #tpu.memory_space<semaphore_mem>>)
    %c61_i32 = arith.constant 61 : i32
    %428 = arith.addi %0, %c61_i32 : i32
    %429 = arith.index_cast %428 : i32 to index
    %430 = memref.load %arg1[%429] : memref<128xi32, #tpu.memory_space<smem>>
    %c61_i32_183 = arith.constant 61 : i32
    %c0_i32_184 = arith.constant 0 : i32
    %431 = tpu.memref_slice %arg2[%430, %c0_i32_184] : memref<50x32xf32, #tpu.memory_space<any>> -> memref<1x32xf32, #tpu.memory_space<any>>
    %432 = tpu.memref_squeeze %431 : memref<1x32xf32, #tpu.memory_space<any>> -> memref<32xf32, #tpu.memory_space<any>>
    %c0_i32_185 = arith.constant 0 : i32
    %433 = tpu.memref_slice %arg8[%c61_i32_183, %c0_i32_185] : memref<64x32xf32, #tpu.memory_space<vmem>> -> memref<1x32xf32, #tpu.memory_space<vmem>>
    %434 = tpu.memref_squeeze %433 : memref<1x32xf32, #tpu.memory_space<vmem>> -> memref<32xf32, #tpu.memory_space<vmem>>
    tpu.enqueue_dma source(%432 : memref<32xf32, #tpu.memory_space<any>>) target(%434 : memref<32xf32, #tpu.memory_space<vmem>>) target_semaphore(%arg9 : memref<!tpu.dma_semaphore, #tpu.memory_space<semaphore_mem>>)
    %c62_i32 = arith.constant 62 : i32
    %435 = arith.addi %0, %c62_i32 : i32
    %436 = arith.index_cast %435 : i32 to index
    %437 = memref.load %arg1[%436] : memref<128xi32, #tpu.memory_space<smem>>
    %c62_i32_186 = arith.constant 62 : i32
    %c0_i32_187 = arith.constant 0 : i32
    %438 = tpu.memref_slice %arg2[%437, %c0_i32_187] : memref<50x32xf32, #tpu.memory_space<any>> -> memref<1x32xf32, #tpu.memory_space<any>>
    %439 = tpu.memref_squeeze %438 : memref<1x32xf32, #tpu.memory_space<any>> -> memref<32xf32, #tpu.memory_space<any>>
    %c0_i32_188 = arith.constant 0 : i32
    %440 = tpu.memref_slice %arg8[%c62_i32_186, %c0_i32_188] : memref<64x32xf32, #tpu.memory_space<vmem>> -> memref<1x32xf32, #tpu.memory_space<vmem>>
    %441 = tpu.memref_squeeze %440 : memref<1x32xf32, #tpu.memory_space<vmem>> -> memref<32xf32, #tpu.memory_space<vmem>>
    tpu.enqueue_dma source(%439 : memref<32xf32, #tpu.memory_space<any>>) target(%441 : memref<32xf32, #tpu.memory_space<vmem>>) target_semaphore(%arg9 : memref<!tpu.dma_semaphore, #tpu.memory_space<semaphore_mem>>)
    %c63_i32 = arith.constant 63 : i32
    %442 = arith.addi %0, %c63_i32 : i32
    %443 = arith.index_cast %442 : i32 to index
    %444 = memref.load %arg1[%443] : memref<128xi32, #tpu.memory_space<smem>>
    %c63_i32_189 = arith.constant 63 : i32
    %c0_i32_190 = arith.constant 0 : i32
    %445 = tpu.memref_slice %arg2[%444, %c0_i32_190] : memref<50x32xf32, #tpu.memory_space<any>> -> memref<1x32xf32, #tpu.memory_space<any>>
    %446 = tpu.memref_squeeze %445 : memref<1x32xf32, #tpu.memory_space<any>> -> memref<32xf32, #tpu.memory_space<any>>
    %c0_i32_191 = arith.constant 0 : i32
    %447 = tpu.memref_slice %arg8[%c63_i32_189, %c0_i32_191] : memref<64x32xf32, #tpu.memory_space<vmem>> -> memref<1x32xf32, #tpu.memory_space<vmem>>
    %448 = tpu.memref_squeeze %447 : memref<1x32xf32, #tpu.memory_space<vmem>> -> memref<32xf32, #tpu.memory_space<vmem>>
    tpu.enqueue_dma source(%446 : memref<32xf32, #tpu.memory_space<any>>) target(%448 : memref<32xf32, #tpu.memory_space<vmem>>) target_semaphore(%arg9 : memref<!tpu.dma_semaphore, #tpu.memory_space<semaphore_mem>>)
    %c0_i32_192 = arith.constant 0 : i32
    %c0_i32_193 = arith.constant 0 : i32
    %449 = tpu.memref_slice %arg2[%3, %c0_i32_193] : memref<50x32xf32, #tpu.memory_space<any>> -> memref<1x32xf32, #tpu.memory_space<any>>
    %450 = tpu.memref_squeeze %449 : memref<1x32xf32, #tpu.memory_space<any>> -> memref<32xf32, #tpu.memory_space<any>>
    %c0_i32_194 = arith.constant 0 : i32
    %451 = tpu.memref_slice %arg8[%c0_i32_192, %c0_i32_194] : memref<64x32xf32, #tpu.memory_space<vmem>> -> memref<1x32xf32, #tpu.memory_space<vmem>>
    %452 = tpu.memref_squeeze %451 : memref<1x32xf32, #tpu.memory_space<vmem>> -> memref<32xf32, #tpu.memory_space<vmem>>
    tpu.wait_dma2 semaphore(%arg9 : memref<!tpu.dma_semaphore, #tpu.memory_space<semaphore_mem>>) src(%450 : memref<32xf32, #tpu.memory_space<any>>) dst(%452 : memref<32xf32, #tpu.memory_space<vmem>>)
    %c1_i32_195 = arith.constant 1 : i32
    %c0_i32_196 = arith.constant 0 : i32
    %453 = tpu.memref_slice %arg2[%10, %c0_i32_196] : memref<50x32xf32, #tpu.memory_space<any>> -> memref<1x32xf32, #tpu.memory_space<any>>
    %454 = tpu.memref_squeeze %453 : memref<1x32xf32, #tpu.memory_space<any>> -> memref<32xf32, #tpu.memory_space<any>>
    %c0_i32_197 = arith.constant 0 : i32
    %455 = tpu.memref_slice %arg8[%c1_i32_195, %c0_i32_197] : memref<64x32xf32, #tpu.memory_space<vmem>> -> memref<1x32xf32, #tpu.memory_space<vmem>>
    %456 = tpu.memref_squeeze %455 : memref<1x32xf32, #tpu.memory_space<vmem>> -> memref<32xf32, #tpu.memory_space<vmem>>
    tpu.wait_dma2 semaphore(%arg9 : memref<!tpu.dma_semaphore, #tpu.memory_space<semaphore_mem>>) src(%454 : memref<32xf32, #tpu.memory_space<any>>) dst(%456 : memref<32xf32, #tpu.memory_space<vmem>>)
    %c2_i32_198 = arith.constant 2 : i32
    %c0_i32_199 = arith.constant 0 : i32
    %457 = tpu.memref_slice %arg2[%17, %c0_i32_199] : memref<50x32xf32, #tpu.memory_space<any>> -> memref<1x32xf32, #tpu.memory_space<any>>
    %458 = tpu.memref_squeeze %457 : memref<1x32xf32, #tpu.memory_space<any>> -> memref<32xf32, #tpu.memory_space<any>>
    %c0_i32_200 = arith.constant 0 : i32
    %459 = tpu.memref_slice %arg8[%c2_i32_198, %c0_i32_200] : memref<64x32xf32, #tpu.memory_space<vmem>> -> memref<1x32xf32, #tpu.memory_space<vmem>>
    %460 = tpu.memref_squeeze %459 : memref<1x32xf32, #tpu.memory_space<vmem>> -> memref<32xf32, #tpu.memory_space<vmem>>
    tpu.wait_dma2 semaphore(%arg9 : memref<!tpu.dma_semaphore, #tpu.memory_space<semaphore_mem>>) src(%458 : memref<32xf32, #tpu.memory_space<any>>) dst(%460 : memref<32xf32, #tpu.memory_space<vmem>>)
    %c3_i32_201 = arith.constant 3 : i32
    %c0_i32_202 = arith.constant 0 : i32
    %461 = tpu.memref_slice %arg2[%24, %c0_i32_202] : memref<50x32xf32, #tpu.memory_space<any>> -> memref<1x32xf32, #tpu.memory_space<any>>
    %462 = tpu.memref_squeeze %461 : memref<1x32xf32, #tpu.memory_space<any>> -> memref<32xf32, #tpu.memory_space<any>>
    %c0_i32_203 = arith.constant 0 : i32
    %463 = tpu.memref_slice %arg8[%c3_i32_201, %c0_i32_203] : memref<64x32xf32, #tpu.memory_space<vmem>> -> memref<1x32xf32, #tpu.memory_space<vmem>>
    %464 = tpu.memref_squeeze %463 : memref<1x32xf32, #tpu.memory_space<vmem>> -> memref<32xf32, #tpu.memory_space<vmem>>
    tpu.wait_dma2 semaphore(%arg9 : memref<!tpu.dma_semaphore, #tpu.memory_space<semaphore_mem>>) src(%462 : memref<32xf32, #tpu.memory_space<any>>) dst(%464 : memref<32xf32, #tpu.memory_space<vmem>>)
    %c4_i32_204 = arith.constant 4 : i32
    %c0_i32_205 = arith.constant 0 : i32
    %465 = tpu.memref_slice %arg2[%31, %c0_i32_205] : memref<50x32xf32, #tpu.memory_space<any>> -> memref<1x32xf32, #tpu.memory_space<any>>
    %466 = tpu.memref_squeeze %465 : memref<1x32xf32, #tpu.memory_space<any>> -> memref<32xf32, #tpu.memory_space<any>>
    %c0_i32_206 = arith.constant 0 : i32
    %467 = tpu.memref_slice %arg8[%c4_i32_204, %c0_i32_206] : memref<64x32xf32, #tpu.memory_space<vmem>> -> memref<1x32xf32, #tpu.memory_space<vmem>>
    %468 = tpu.memref_squeeze %467 : memref<1x32xf32, #tpu.memory_space<vmem>> -> memref<32xf32, #tpu.memory_space<vmem>>
    tpu.wait_dma2 semaphore(%arg9 : memref<!tpu.dma_semaphore, #tpu.memory_space<semaphore_mem>>) src(%466 : memref<32xf32, #tpu.memory_space<any>>) dst(%468 : memref<32xf32, #tpu.memory_space<vmem>>)
    %c5_i32_207 = arith.constant 5 : i32
    %c0_i32_208 = arith.constant 0 : i32
    %469 = tpu.memref_slice %arg2[%38, %c0_i32_208] : memref<50x32xf32, #tpu.memory_space<any>> -> memref<1x32xf32, #tpu.memory_space<any>>
    %470 = tpu.memref_squeeze %469 : memref<1x32xf32, #tpu.memory_space<any>> -> memref<32xf32, #tpu.memory_space<any>>
    %c0_i32_209 = arith.constant 0 : i32
    %471 = tpu.memref_slice %arg8[%c5_i32_207, %c0_i32_209] : memref<64x32xf32, #tpu.memory_space<vmem>> -> memref<1x32xf32, #tpu.memory_space<vmem>>
    %472 = tpu.memref_squeeze %471 : memref<1x32xf32, #tpu.memory_space<vmem>> -> memref<32xf32, #tpu.memory_space<vmem>>
    tpu.wait_dma2 semaphore(%arg9 : memref<!tpu.dma_semaphore, #tpu.memory_space<semaphore_mem>>) src(%470 : memref<32xf32, #tpu.memory_space<any>>) dst(%472 : memref<32xf32, #tpu.memory_space<vmem>>)
    %c6_i32_210 = arith.constant 6 : i32
    %c0_i32_211 = arith.constant 0 : i32
    %473 = tpu.memref_slice %arg2[%45, %c0_i32_211] : memref<50x32xf32, #tpu.memory_space<any>> -> memref<1x32xf32, #tpu.memory_space<any>>
    %474 = tpu.memref_squeeze %473 : memref<1x32xf32, #tpu.memory_space<any>> -> memref<32xf32, #tpu.memory_space<any>>
    %c0_i32_212 = arith.constant 0 : i32
    %475 = tpu.memref_slice %arg8[%c6_i32_210, %c0_i32_212] : memref<64x32xf32, #tpu.memory_space<vmem>> -> memref<1x32xf32, #tpu.memory_space<vmem>>
    %476 = tpu.memref_squeeze %475 : memref<1x32xf32, #tpu.memory_space<vmem>> -> memref<32xf32, #tpu.memory_space<vmem>>
    tpu.wait_dma2 semaphore(%arg9 : memref<!tpu.dma_semaphore, #tpu.memory_space<semaphore_mem>>) src(%474 : memref<32xf32, #tpu.memory_space<any>>) dst(%476 : memref<32xf32, #tpu.memory_space<vmem>>)
    %c7_i32_213 = arith.constant 7 : i32
    %c0_i32_214 = arith.constant 0 : i32
    %477 = tpu.memref_slice %arg2[%52, %c0_i32_214] : memref<50x32xf32, #tpu.memory_space<any>> -> memref<1x32xf32, #tpu.memory_space<any>>
    %478 = tpu.memref_squeeze %477 : memref<1x32xf32, #tpu.memory_space<any>> -> memref<32xf32, #tpu.memory_space<any>>
    %c0_i32_215 = arith.constant 0 : i32
    %479 = tpu.memref_slice %arg8[%c7_i32_213, %c0_i32_215] : memref<64x32xf32, #tpu.memory_space<vmem>> -> memref<1x32xf32, #tpu.memory_space<vmem>>
    %480 = tpu.memref_squeeze %479 : memref<1x32xf32, #tpu.memory_space<vmem>> -> memref<32xf32, #tpu.memory_space<vmem>>
    tpu.wait_dma2 semaphore(%arg9 : memref<!tpu.dma_semaphore, #tpu.memory_space<semaphore_mem>>) src(%478 : memref<32xf32, #tpu.memory_space<any>>) dst(%480 : memref<32xf32, #tpu.memory_space<vmem>>)
    %c8_i32_216 = arith.constant 8 : i32
    %c0_i32_217 = arith.constant 0 : i32
    %481 = tpu.memref_slice %arg2[%59, %c0_i32_217] : memref<50x32xf32, #tpu.memory_space<any>> -> memref<1x32xf32, #tpu.memory_space<any>>
    %482 = tpu.memref_squeeze %481 : memref<1x32xf32, #tpu.memory_space<any>> -> memref<32xf32, #tpu.memory_space<any>>
    %c0_i32_218 = arith.constant 0 : i32
    %483 = tpu.memref_slice %arg8[%c8_i32_216, %c0_i32_218] : memref<64x32xf32, #tpu.memory_space<vmem>> -> memref<1x32xf32, #tpu.memory_space<vmem>>
    %484 = tpu.memref_squeeze %483 : memref<1x32xf32, #tpu.memory_space<vmem>> -> memref<32xf32, #tpu.memory_space<vmem>>
    tpu.wait_dma2 semaphore(%arg9 : memref<!tpu.dma_semaphore, #tpu.memory_space<semaphore_mem>>) src(%482 : memref<32xf32, #tpu.memory_space<any>>) dst(%484 : memref<32xf32, #tpu.memory_space<vmem>>)
    %c9_i32_219 = arith.constant 9 : i32
    %c0_i32_220 = arith.constant 0 : i32
    %485 = tpu.memref_slice %arg2[%66, %c0_i32_220] : memref<50x32xf32, #tpu.memory_space<any>> -> memref<1x32xf32, #tpu.memory_space<any>>
    %486 = tpu.memref_squeeze %485 : memref<1x32xf32, #tpu.memory_space<any>> -> memref<32xf32, #tpu.memory_space<any>>
    %c0_i32_221 = arith.constant 0 : i32
    %487 = tpu.memref_slice %arg8[%c9_i32_219, %c0_i32_221] : memref<64x32xf32, #tpu.memory_space<vmem>> -> memref<1x32xf32, #tpu.memory_space<vmem>>
    %488 = tpu.memref_squeeze %487 : memref<1x32xf32, #tpu.memory_space<vmem>> -> memref<32xf32, #tpu.memory_space<vmem>>
    tpu.wait_dma2 semaphore(%arg9 : memref<!tpu.dma_semaphore, #tpu.memory_space<semaphore_mem>>) src(%486 : memref<32xf32, #tpu.memory_space<any>>) dst(%488 : memref<32xf32, #tpu.memory_space<vmem>>)
    %c10_i32_222 = arith.constant 10 : i32
    %c0_i32_223 = arith.constant 0 : i32
    %489 = tpu.memref_slice %arg2[%73, %c0_i32_223] : memref<50x32xf32, #tpu.memory_space<any>> -> memref<1x32xf32, #tpu.memory_space<any>>
    %490 = tpu.memref_squeeze %489 : memref<1x32xf32, #tpu.memory_space<any>> -> memref<32xf32, #tpu.memory_space<any>>
    %c0_i32_224 = arith.constant 0 : i32
    %491 = tpu.memref_slice %arg8[%c10_i32_222, %c0_i32_224] : memref<64x32xf32, #tpu.memory_space<vmem>> -> memref<1x32xf32, #tpu.memory_space<vmem>>
    %492 = tpu.memref_squeeze %491 : memref<1x32xf32, #tpu.memory_space<vmem>> -> memref<32xf32, #tpu.memory_space<vmem>>
    tpu.wait_dma2 semaphore(%arg9 : memref<!tpu.dma_semaphore, #tpu.memory_space<semaphore_mem>>) src(%490 : memref<32xf32, #tpu.memory_space<any>>) dst(%492 : memref<32xf32, #tpu.memory_space<vmem>>)
    %c11_i32_225 = arith.constant 11 : i32
    %c0_i32_226 = arith.constant 0 : i32
    %493 = tpu.memref_slice %arg2[%80, %c0_i32_226] : memref<50x32xf32, #tpu.memory_space<any>> -> memref<1x32xf32, #tpu.memory_space<any>>
    %494 = tpu.memref_squeeze %493 : memref<1x32xf32, #tpu.memory_space<any>> -> memref<32xf32, #tpu.memory_space<any>>
    %c0_i32_227 = arith.constant 0 : i32
    %495 = tpu.memref_slice %arg8[%c11_i32_225, %c0_i32_227] : memref<64x32xf32, #tpu.memory_space<vmem>> -> memref<1x32xf32, #tpu.memory_space<vmem>>
    %496 = tpu.memref_squeeze %495 : memref<1x32xf32, #tpu.memory_space<vmem>> -> memref<32xf32, #tpu.memory_space<vmem>>
    tpu.wait_dma2 semaphore(%arg9 : memref<!tpu.dma_semaphore, #tpu.memory_space<semaphore_mem>>) src(%494 : memref<32xf32, #tpu.memory_space<any>>) dst(%496 : memref<32xf32, #tpu.memory_space<vmem>>)
    %c12_i32_228 = arith.constant 12 : i32
    %c0_i32_229 = arith.constant 0 : i32
    %497 = tpu.memref_slice %arg2[%87, %c0_i32_229] : memref<50x32xf32, #tpu.memory_space<any>> -> memref<1x32xf32, #tpu.memory_space<any>>
    %498 = tpu.memref_squeeze %497 : memref<1x32xf32, #tpu.memory_space<any>> -> memref<32xf32, #tpu.memory_space<any>>
    %c0_i32_230 = arith.constant 0 : i32
    %499 = tpu.memref_slice %arg8[%c12_i32_228, %c0_i32_230] : memref<64x32xf32, #tpu.memory_space<vmem>> -> memref<1x32xf32, #tpu.memory_space<vmem>>
    %500 = tpu.memref_squeeze %499 : memref<1x32xf32, #tpu.memory_space<vmem>> -> memref<32xf32, #tpu.memory_space<vmem>>
    tpu.wait_dma2 semaphore(%arg9 : memref<!tpu.dma_semaphore, #tpu.memory_space<semaphore_mem>>) src(%498 : memref<32xf32, #tpu.memory_space<any>>) dst(%500 : memref<32xf32, #tpu.memory_space<vmem>>)
    %c13_i32_231 = arith.constant 13 : i32
    %c0_i32_232 = arith.constant 0 : i32
    %501 = tpu.memref_slice %arg2[%94, %c0_i32_232] : memref<50x32xf32, #tpu.memory_space<any>> -> memref<1x32xf32, #tpu.memory_space<any>>
    %502 = tpu.memref_squeeze %501 : memref<1x32xf32, #tpu.memory_space<any>> -> memref<32xf32, #tpu.memory_space<any>>
    %c0_i32_233 = arith.constant 0 : i32
    %503 = tpu.memref_slice %arg8[%c13_i32_231, %c0_i32_233] : memref<64x32xf32, #tpu.memory_space<vmem>> -> memref<1x32xf32, #tpu.memory_space<vmem>>
    %504 = tpu.memref_squeeze %503 : memref<1x32xf32, #tpu.memory_space<vmem>> -> memref<32xf32, #tpu.memory_space<vmem>>
    tpu.wait_dma2 semaphore(%arg9 : memref<!tpu.dma_semaphore, #tpu.memory_space<semaphore_mem>>) src(%502 : memref<32xf32, #tpu.memory_space<any>>) dst(%504 : memref<32xf32, #tpu.memory_space<vmem>>)
    %c14_i32_234 = arith.constant 14 : i32
    %c0_i32_235 = arith.constant 0 : i32
    %505 = tpu.memref_slice %arg2[%101, %c0_i32_235] : memref<50x32xf32, #tpu.memory_space<any>> -> memref<1x32xf32, #tpu.memory_space<any>>
    %506 = tpu.memref_squeeze %505 : memref<1x32xf32, #tpu.memory_space<any>> -> memref<32xf32, #tpu.memory_space<any>>
    %c0_i32_236 = arith.constant 0 : i32
    %507 = tpu.memref_slice %arg8[%c14_i32_234, %c0_i32_236] : memref<64x32xf32, #tpu.memory_space<vmem>> -> memref<1x32xf32, #tpu.memory_space<vmem>>
    %508 = tpu.memref_squeeze %507 : memref<1x32xf32, #tpu.memory_space<vmem>> -> memref<32xf32, #tpu.memory_space<vmem>>
    tpu.wait_dma2 semaphore(%arg9 : memref<!tpu.dma_semaphore, #tpu.memory_space<semaphore_mem>>) src(%506 : memref<32xf32, #tpu.memory_space<any>>) dst(%508 : memref<32xf32, #tpu.memory_space<vmem>>)
    %c15_i32_237 = arith.constant 15 : i32
    %c0_i32_238 = arith.constant 0 : i32
    %509 = tpu.memref_slice %arg2[%108, %c0_i32_238] : memref<50x32xf32, #tpu.memory_space<any>> -> memref<1x32xf32, #tpu.memory_space<any>>
    %510 = tpu.memref_squeeze %509 : memref<1x32xf32, #tpu.memory_space<any>> -> memref<32xf32, #tpu.memory_space<any>>
    %c0_i32_239 = arith.constant 0 : i32
    %511 = tpu.memref_slice %arg8[%c15_i32_237, %c0_i32_239] : memref<64x32xf32, #tpu.memory_space<vmem>> -> memref<1x32xf32, #tpu.memory_space<vmem>>
    %512 = tpu.memref_squeeze %511 : memref<1x32xf32, #tpu.memory_space<vmem>> -> memref<32xf32, #tpu.memory_space<vmem>>
    tpu.wait_dma2 semaphore(%arg9 : memref<!tpu.dma_semaphore, #tpu.memory_space<semaphore_mem>>) src(%510 : memref<32xf32, #tpu.memory_space<any>>) dst(%512 : memref<32xf32, #tpu.memory_space<vmem>>)
    %c16_i32_240 = arith.constant 16 : i32
    %c0_i32_241 = arith.constant 0 : i32
    %513 = tpu.memref_slice %arg2[%115, %c0_i32_241] : memref<50x32xf32, #tpu.memory_space<any>> -> memref<1x32xf32, #tpu.memory_space<any>>
    %514 = tpu.memref_squeeze %513 : memref<1x32xf32, #tpu.memory_space<any>> -> memref<32xf32, #tpu.memory_space<any>>
    %c0_i32_242 = arith.constant 0 : i32
    %515 = tpu.memref_slice %arg8[%c16_i32_240, %c0_i32_242] : memref<64x32xf32, #tpu.memory_space<vmem>> -> memref<1x32xf32, #tpu.memory_space<vmem>>
    %516 = tpu.memref_squeeze %515 : memref<1x32xf32, #tpu.memory_space<vmem>> -> memref<32xf32, #tpu.memory_space<vmem>>
    tpu.wait_dma2 semaphore(%arg9 : memref<!tpu.dma_semaphore, #tpu.memory_space<semaphore_mem>>) src(%514 : memref<32xf32, #tpu.memory_space<any>>) dst(%516 : memref<32xf32, #tpu.memory_space<vmem>>)
    %c17_i32_243 = arith.constant 17 : i32
    %c0_i32_244 = arith.constant 0 : i32
    %517 = tpu.memref_slice %arg2[%122, %c0_i32_244] : memref<50x32xf32, #tpu.memory_space<any>> -> memref<1x32xf32, #tpu.memory_space<any>>
    %518 = tpu.memref_squeeze %517 : memref<1x32xf32, #tpu.memory_space<any>> -> memref<32xf32, #tpu.memory_space<any>>
    %c0_i32_245 = arith.constant 0 : i32
    %519 = tpu.memref_slice %arg8[%c17_i32_243, %c0_i32_245] : memref<64x32xf32, #tpu.memory_space<vmem>> -> memref<1x32xf32, #tpu.memory_space<vmem>>
    %520 = tpu.memref_squeeze %519 : memref<1x32xf32, #tpu.memory_space<vmem>> -> memref<32xf32, #tpu.memory_space<vmem>>
    tpu.wait_dma2 semaphore(%arg9 : memref<!tpu.dma_semaphore, #tpu.memory_space<semaphore_mem>>) src(%518 : memref<32xf32, #tpu.memory_space<any>>) dst(%520 : memref<32xf32, #tpu.memory_space<vmem>>)
    %c18_i32_246 = arith.constant 18 : i32
    %c0_i32_247 = arith.constant 0 : i32
    %521 = tpu.memref_slice %arg2[%129, %c0_i32_247] : memref<50x32xf32, #tpu.memory_space<any>> -> memref<1x32xf32, #tpu.memory_space<any>>
    %522 = tpu.memref_squeeze %521 : memref<1x32xf32, #tpu.memory_space<any>> -> memref<32xf32, #tpu.memory_space<any>>
    %c0_i32_248 = arith.constant 0 : i32
    %523 = tpu.memref_slice %arg8[%c18_i32_246, %c0_i32_248] : memref<64x32xf32, #tpu.memory_space<vmem>> -> memref<1x32xf32, #tpu.memory_space<vmem>>
    %524 = tpu.memref_squeeze %523 : memref<1x32xf32, #tpu.memory_space<vmem>> -> memref<32xf32, #tpu.memory_space<vmem>>
    tpu.wait_dma2 semaphore(%arg9 : memref<!tpu.dma_semaphore, #tpu.memory_space<semaphore_mem>>) src(%522 : memref<32xf32, #tpu.memory_space<any>>) dst(%524 : memref<32xf32, #tpu.memory_space<vmem>>)
    %c19_i32_249 = arith.constant 19 : i32
    %c0_i32_250 = arith.constant 0 : i32
    %525 = tpu.memref_slice %arg2[%136, %c0_i32_250] : memref<50x32xf32, #tpu.memory_space<any>> -> memref<1x32xf32, #tpu.memory_space<any>>
    %526 = tpu.memref_squeeze %525 : memref<1x32xf32, #tpu.memory_space<any>> -> memref<32xf32, #tpu.memory_space<any>>
    %c0_i32_251 = arith.constant 0 : i32
    %527 = tpu.memref_slice %arg8[%c19_i32_249, %c0_i32_251] : memref<64x32xf32, #tpu.memory_space<vmem>> -> memref<1x32xf32, #tpu.memory_space<vmem>>
    %528 = tpu.memref_squeeze %527 : memref<1x32xf32, #tpu.memory_space<vmem>> -> memref<32xf32, #tpu.memory_space<vmem>>
    tpu.wait_dma2 semaphore(%arg9 : memref<!tpu.dma_semaphore, #tpu.memory_space<semaphore_mem>>) src(%526 : memref<32xf32, #tpu.memory_space<any>>) dst(%528 : memref<32xf32, #tpu.memory_space<vmem>>)
    %c20_i32_252 = arith.constant 20 : i32
    %c0_i32_253 = arith.constant 0 : i32
    %529 = tpu.memref_slice %arg2[%143, %c0_i32_253] : memref<50x32xf32, #tpu.memory_space<any>> -> memref<1x32xf32, #tpu.memory_space<any>>
    %530 = tpu.memref_squeeze %529 : memref<1x32xf32, #tpu.memory_space<any>> -> memref<32xf32, #tpu.memory_space<any>>
    %c0_i32_254 = arith.constant 0 : i32
    %531 = tpu.memref_slice %arg8[%c20_i32_252, %c0_i32_254] : memref<64x32xf32, #tpu.memory_space<vmem>> -> memref<1x32xf32, #tpu.memory_space<vmem>>
    %532 = tpu.memref_squeeze %531 : memref<1x32xf32, #tpu.memory_space<vmem>> -> memref<32xf32, #tpu.memory_space<vmem>>
    tpu.wait_dma2 semaphore(%arg9 : memref<!tpu.dma_semaphore, #tpu.memory_space<semaphore_mem>>) src(%530 : memref<32xf32, #tpu.memory_space<any>>) dst(%532 : memref<32xf32, #tpu.memory_space<vmem>>)
    %c21_i32_255 = arith.constant 21 : i32
    %c0_i32_256 = arith.constant 0 : i32
    %533 = tpu.memref_slice %arg2[%150, %c0_i32_256] : memref<50x32xf32, #tpu.memory_space<any>> -> memref<1x32xf32, #tpu.memory_space<any>>
    %534 = tpu.memref_squeeze %533 : memref<1x32xf32, #tpu.memory_space<any>> -> memref<32xf32, #tpu.memory_space<any>>
    %c0_i32_257 = arith.constant 0 : i32
    %535 = tpu.memref_slice %arg8[%c21_i32_255, %c0_i32_257] : memref<64x32xf32, #tpu.memory_space<vmem>> -> memref<1x32xf32, #tpu.memory_space<vmem>>
    %536 = tpu.memref_squeeze %535 : memref<1x32xf32, #tpu.memory_space<vmem>> -> memref<32xf32, #tpu.memory_space<vmem>>
    tpu.wait_dma2 semaphore(%arg9 : memref<!tpu.dma_semaphore, #tpu.memory_space<semaphore_mem>>) src(%534 : memref<32xf32, #tpu.memory_space<any>>) dst(%536 : memref<32xf32, #tpu.memory_space<vmem>>)
    %c22_i32_258 = arith.constant 22 : i32
    %c0_i32_259 = arith.constant 0 : i32
    %537 = tpu.memref_slice %arg2[%157, %c0_i32_259] : memref<50x32xf32, #tpu.memory_space<any>> -> memref<1x32xf32, #tpu.memory_space<any>>
    %538 = tpu.memref_squeeze %537 : memref<1x32xf32, #tpu.memory_space<any>> -> memref<32xf32, #tpu.memory_space<any>>
    %c0_i32_260 = arith.constant 0 : i32
    %539 = tpu.memref_slice %arg8[%c22_i32_258, %c0_i32_260] : memref<64x32xf32, #tpu.memory_space<vmem>> -> memref<1x32xf32, #tpu.memory_space<vmem>>
    %540 = tpu.memref_squeeze %539 : memref<1x32xf32, #tpu.memory_space<vmem>> -> memref<32xf32, #tpu.memory_space<vmem>>
    tpu.wait_dma2 semaphore(%arg9 : memref<!tpu.dma_semaphore, #tpu.memory_space<semaphore_mem>>) src(%538 : memref<32xf32, #tpu.memory_space<any>>) dst(%540 : memref<32xf32, #tpu.memory_space<vmem>>)
    %c23_i32_261 = arith.constant 23 : i32
    %c0_i32_262 = arith.constant 0 : i32
    %541 = tpu.memref_slice %arg2[%164, %c0_i32_262] : memref<50x32xf32, #tpu.memory_space<any>> -> memref<1x32xf32, #tpu.memory_space<any>>
    %542 = tpu.memref_squeeze %541 : memref<1x32xf32, #tpu.memory_space<any>> -> memref<32xf32, #tpu.memory_space<any>>
    %c0_i32_263 = arith.constant 0 : i32
    %543 = tpu.memref_slice %arg8[%c23_i32_261, %c0_i32_263] : memref<64x32xf32, #tpu.memory_space<vmem>> -> memref<1x32xf32, #tpu.memory_space<vmem>>
    %544 = tpu.memref_squeeze %543 : memref<1x32xf32, #tpu.memory_space<vmem>> -> memref<32xf32, #tpu.memory_space<vmem>>
    tpu.wait_dma2 semaphore(%arg9 : memref<!tpu.dma_semaphore, #tpu.memory_space<semaphore_mem>>) src(%542 : memref<32xf32, #tpu.memory_space<any>>) dst(%544 : memref<32xf32, #tpu.memory_space<vmem>>)
    %c24_i32_264 = arith.constant 24 : i32
    %c0_i32_265 = arith.constant 0 : i32
    %545 = tpu.memref_slice %arg2[%171, %c0_i32_265] : memref<50x32xf32, #tpu.memory_space<any>> -> memref<1x32xf32, #tpu.memory_space<any>>
    %546 = tpu.memref_squeeze %545 : memref<1x32xf32, #tpu.memory_space<any>> -> memref<32xf32, #tpu.memory_space<any>>
    %c0_i32_266 = arith.constant 0 : i32
    %547 = tpu.memref_slice %arg8[%c24_i32_264, %c0_i32_266] : memref<64x32xf32, #tpu.memory_space<vmem>> -> memref<1x32xf32, #tpu.memory_space<vmem>>
    %548 = tpu.memref_squeeze %547 : memref<1x32xf32, #tpu.memory_space<vmem>> -> memref<32xf32, #tpu.memory_space<vmem>>
    tpu.wait_dma2 semaphore(%arg9 : memref<!tpu.dma_semaphore, #tpu.memory_space<semaphore_mem>>) src(%546 : memref<32xf32, #tpu.memory_space<any>>) dst(%548 : memref<32xf32, #tpu.memory_space<vmem>>)
    %c25_i32_267 = arith.constant 25 : i32
    %c0_i32_268 = arith.constant 0 : i32
    %549 = tpu.memref_slice %arg2[%178, %c0_i32_268] : memref<50x32xf32, #tpu.memory_space<any>> -> memref<1x32xf32, #tpu.memory_space<any>>
    %550 = tpu.memref_squeeze %549 : memref<1x32xf32, #tpu.memory_space<any>> -> memref<32xf32, #tpu.memory_space<any>>
    %c0_i32_269 = arith.constant 0 : i32
    %551 = tpu.memref_slice %arg8[%c25_i32_267, %c0_i32_269] : memref<64x32xf32, #tpu.memory_space<vmem>> -> memref<1x32xf32, #tpu.memory_space<vmem>>
    %552 = tpu.memref_squeeze %551 : memref<1x32xf32, #tpu.memory_space<vmem>> -> memref<32xf32, #tpu.memory_space<vmem>>
    tpu.wait_dma2 semaphore(%arg9 : memref<!tpu.dma_semaphore, #tpu.memory_space<semaphore_mem>>) src(%550 : memref<32xf32, #tpu.memory_space<any>>) dst(%552 : memref<32xf32, #tpu.memory_space<vmem>>)
    %c26_i32_270 = arith.constant 26 : i32
    %c0_i32_271 = arith.constant 0 : i32
    %553 = tpu.memref_slice %arg2[%185, %c0_i32_271] : memref<50x32xf32, #tpu.memory_space<any>> -> memref<1x32xf32, #tpu.memory_space<any>>
    %554 = tpu.memref_squeeze %553 : memref<1x32xf32, #tpu.memory_space<any>> -> memref<32xf32, #tpu.memory_space<any>>
    %c0_i32_272 = arith.constant 0 : i32
    %555 = tpu.memref_slice %arg8[%c26_i32_270, %c0_i32_272] : memref<64x32xf32, #tpu.memory_space<vmem>> -> memref<1x32xf32, #tpu.memory_space<vmem>>
    %556 = tpu.memref_squeeze %555 : memref<1x32xf32, #tpu.memory_space<vmem>> -> memref<32xf32, #tpu.memory_space<vmem>>
    tpu.wait_dma2 semaphore(%arg9 : memref<!tpu.dma_semaphore, #tpu.memory_space<semaphore_mem>>) src(%554 : memref<32xf32, #tpu.memory_space<any>>) dst(%556 : memref<32xf32, #tpu.memory_space<vmem>>)
    %c27_i32_273 = arith.constant 27 : i32
    %c0_i32_274 = arith.constant 0 : i32
    %557 = tpu.memref_slice %arg2[%192, %c0_i32_274] : memref<50x32xf32, #tpu.memory_space<any>> -> memref<1x32xf32, #tpu.memory_space<any>>
    %558 = tpu.memref_squeeze %557 : memref<1x32xf32, #tpu.memory_space<any>> -> memref<32xf32, #tpu.memory_space<any>>
    %c0_i32_275 = arith.constant 0 : i32
    %559 = tpu.memref_slice %arg8[%c27_i32_273, %c0_i32_275] : memref<64x32xf32, #tpu.memory_space<vmem>> -> memref<1x32xf32, #tpu.memory_space<vmem>>
    %560 = tpu.memref_squeeze %559 : memref<1x32xf32, #tpu.memory_space<vmem>> -> memref<32xf32, #tpu.memory_space<vmem>>
    tpu.wait_dma2 semaphore(%arg9 : memref<!tpu.dma_semaphore, #tpu.memory_space<semaphore_mem>>) src(%558 : memref<32xf32, #tpu.memory_space<any>>) dst(%560 : memref<32xf32, #tpu.memory_space<vmem>>)
    %c28_i32_276 = arith.constant 28 : i32
    %c0_i32_277 = arith.constant 0 : i32
    %561 = tpu.memref_slice %arg2[%199, %c0_i32_277] : memref<50x32xf32, #tpu.memory_space<any>> -> memref<1x32xf32, #tpu.memory_space<any>>
    %562 = tpu.memref_squeeze %561 : memref<1x32xf32, #tpu.memory_space<any>> -> memref<32xf32, #tpu.memory_space<any>>
    %c0_i32_278 = arith.constant 0 : i32
    %563 = tpu.memref_slice %arg8[%c28_i32_276, %c0_i32_278] : memref<64x32xf32, #tpu.memory_space<vmem>> -> memref<1x32xf32, #tpu.memory_space<vmem>>
    %564 = tpu.memref_squeeze %563 : memref<1x32xf32, #tpu.memory_space<vmem>> -> memref<32xf32, #tpu.memory_space<vmem>>
    tpu.wait_dma2 semaphore(%arg9 : memref<!tpu.dma_semaphore, #tpu.memory_space<semaphore_mem>>) src(%562 : memref<32xf32, #tpu.memory_space<any>>) dst(%564 : memref<32xf32, #tpu.memory_space<vmem>>)
    %c29_i32_279 = arith.constant 29 : i32
    %c0_i32_280 = arith.constant 0 : i32
    %565 = tpu.memref_slice %arg2[%206, %c0_i32_280] : memref<50x32xf32, #tpu.memory_space<any>> -> memref<1x32xf32, #tpu.memory_space<any>>
    %566 = tpu.memref_squeeze %565 : memref<1x32xf32, #tpu.memory_space<any>> -> memref<32xf32, #tpu.memory_space<any>>
    %c0_i32_281 = arith.constant 0 : i32
    %567 = tpu.memref_slice %arg8[%c29_i32_279, %c0_i32_281] : memref<64x32xf32, #tpu.memory_space<vmem>> -> memref<1x32xf32, #tpu.memory_space<vmem>>
    %568 = tpu.memref_squeeze %567 : memref<1x32xf32, #tpu.memory_space<vmem>> -> memref<32xf32, #tpu.memory_space<vmem>>
    tpu.wait_dma2 semaphore(%arg9 : memref<!tpu.dma_semaphore, #tpu.memory_space<semaphore_mem>>) src(%566 : memref<32xf32, #tpu.memory_space<any>>) dst(%568 : memref<32xf32, #tpu.memory_space<vmem>>)
    %c30_i32_282 = arith.constant 30 : i32
    %c0_i32_283 = arith.constant 0 : i32
    %569 = tpu.memref_slice %arg2[%213, %c0_i32_283] : memref<50x32xf32, #tpu.memory_space<any>> -> memref<1x32xf32, #tpu.memory_space<any>>
    %570 = tpu.memref_squeeze %569 : memref<1x32xf32, #tpu.memory_space<any>> -> memref<32xf32, #tpu.memory_space<any>>
    %c0_i32_284 = arith.constant 0 : i32
    %571 = tpu.memref_slice %arg8[%c30_i32_282, %c0_i32_284] : memref<64x32xf32, #tpu.memory_space<vmem>> -> memref<1x32xf32, #tpu.memory_space<vmem>>
    %572 = tpu.memref_squeeze %571 : memref<1x32xf32, #tpu.memory_space<vmem>> -> memref<32xf32, #tpu.memory_space<vmem>>
    tpu.wait_dma2 semaphore(%arg9 : memref<!tpu.dma_semaphore, #tpu.memory_space<semaphore_mem>>) src(%570 : memref<32xf32, #tpu.memory_space<any>>) dst(%572 : memref<32xf32, #tpu.memory_space<vmem>>)
    %c31_i32_285 = arith.constant 31 : i32
    %c0_i32_286 = arith.constant 0 : i32
    %573 = tpu.memref_slice %arg2[%220, %c0_i32_286] : memref<50x32xf32, #tpu.memory_space<any>> -> memref<1x32xf32, #tpu.memory_space<any>>
    %574 = tpu.memref_squeeze %573 : memref<1x32xf32, #tpu.memory_space<any>> -> memref<32xf32, #tpu.memory_space<any>>
    %c0_i32_287 = arith.constant 0 : i32
    %575 = tpu.memref_slice %arg8[%c31_i32_285, %c0_i32_287] : memref<64x32xf32, #tpu.memory_space<vmem>> -> memref<1x32xf32, #tpu.memory_space<vmem>>
    %576 = tpu.memref_squeeze %575 : memref<1x32xf32, #tpu.memory_space<vmem>> -> memref<32xf32, #tpu.memory_space<vmem>>
    tpu.wait_dma2 semaphore(%arg9 : memref<!tpu.dma_semaphore, #tpu.memory_space<semaphore_mem>>) src(%574 : memref<32xf32, #tpu.memory_space<any>>) dst(%576 : memref<32xf32, #tpu.memory_space<vmem>>)
    %c32_i32_288 = arith.constant 32 : i32
    %c0_i32_289 = arith.constant 0 : i32
    %577 = tpu.memref_slice %arg2[%227, %c0_i32_289] : memref<50x32xf32, #tpu.memory_space<any>> -> memref<1x32xf32, #tpu.memory_space<any>>
    %578 = tpu.memref_squeeze %577 : memref<1x32xf32, #tpu.memory_space<any>> -> memref<32xf32, #tpu.memory_space<any>>
    %c0_i32_290 = arith.constant 0 : i32
    %579 = tpu.memref_slice %arg8[%c32_i32_288, %c0_i32_290] : memref<64x32xf32, #tpu.memory_space<vmem>> -> memref<1x32xf32, #tpu.memory_space<vmem>>
    %580 = tpu.memref_squeeze %579 : memref<1x32xf32, #tpu.memory_space<vmem>> -> memref<32xf32, #tpu.memory_space<vmem>>
    tpu.wait_dma2 semaphore(%arg9 : memref<!tpu.dma_semaphore, #tpu.memory_space<semaphore_mem>>) src(%578 : memref<32xf32, #tpu.memory_space<any>>) dst(%580 : memref<32xf32, #tpu.memory_space<vmem>>)
    %c33_i32_291 = arith.constant 33 : i32
    %c0_i32_292 = arith.constant 0 : i32
    %581 = tpu.memref_slice %arg2[%234, %c0_i32_292] : memref<50x32xf32, #tpu.memory_space<any>> -> memref<1x32xf32, #tpu.memory_space<any>>
    %582 = tpu.memref_squeeze %581 : memref<1x32xf32, #tpu.memory_space<any>> -> memref<32xf32, #tpu.memory_space<any>>
    %c0_i32_293 = arith.constant 0 : i32
    %583 = tpu.memref_slice %arg8[%c33_i32_291, %c0_i32_293] : memref<64x32xf32, #tpu.memory_space<vmem>> -> memref<1x32xf32, #tpu.memory_space<vmem>>
    %584 = tpu.memref_squeeze %583 : memref<1x32xf32, #tpu.memory_space<vmem>> -> memref<32xf32, #tpu.memory_space<vmem>>
    tpu.wait_dma2 semaphore(%arg9 : memref<!tpu.dma_semaphore, #tpu.memory_space<semaphore_mem>>) src(%582 : memref<32xf32, #tpu.memory_space<any>>) dst(%584 : memref<32xf32, #tpu.memory_space<vmem>>)
    %c34_i32_294 = arith.constant 34 : i32
    %c0_i32_295 = arith.constant 0 : i32
    %585 = tpu.memref_slice %arg2[%241, %c0_i32_295] : memref<50x32xf32, #tpu.memory_space<any>> -> memref<1x32xf32, #tpu.memory_space<any>>
    %586 = tpu.memref_squeeze %585 : memref<1x32xf32, #tpu.memory_space<any>> -> memref<32xf32, #tpu.memory_space<any>>
    %c0_i32_296 = arith.constant 0 : i32
    %587 = tpu.memref_slice %arg8[%c34_i32_294, %c0_i32_296] : memref<64x32xf32, #tpu.memory_space<vmem>> -> memref<1x32xf32, #tpu.memory_space<vmem>>
    %588 = tpu.memref_squeeze %587 : memref<1x32xf32, #tpu.memory_space<vmem>> -> memref<32xf32, #tpu.memory_space<vmem>>
    tpu.wait_dma2 semaphore(%arg9 : memref<!tpu.dma_semaphore, #tpu.memory_space<semaphore_mem>>) src(%586 : memref<32xf32, #tpu.memory_space<any>>) dst(%588 : memref<32xf32, #tpu.memory_space<vmem>>)
    %c35_i32_297 = arith.constant 35 : i32
    %c0_i32_298 = arith.constant 0 : i32
    %589 = tpu.memref_slice %arg2[%248, %c0_i32_298] : memref<50x32xf32, #tpu.memory_space<any>> -> memref<1x32xf32, #tpu.memory_space<any>>
    %590 = tpu.memref_squeeze %589 : memref<1x32xf32, #tpu.memory_space<any>> -> memref<32xf32, #tpu.memory_space<any>>
    %c0_i32_299 = arith.constant 0 : i32
    %591 = tpu.memref_slice %arg8[%c35_i32_297, %c0_i32_299] : memref<64x32xf32, #tpu.memory_space<vmem>> -> memref<1x32xf32, #tpu.memory_space<vmem>>
    %592 = tpu.memref_squeeze %591 : memref<1x32xf32, #tpu.memory_space<vmem>> -> memref<32xf32, #tpu.memory_space<vmem>>
    tpu.wait_dma2 semaphore(%arg9 : memref<!tpu.dma_semaphore, #tpu.memory_space<semaphore_mem>>) src(%590 : memref<32xf32, #tpu.memory_space<any>>) dst(%592 : memref<32xf32, #tpu.memory_space<vmem>>)
    %c36_i32_300 = arith.constant 36 : i32
    %c0_i32_301 = arith.constant 0 : i32
    %593 = tpu.memref_slice %arg2[%255, %c0_i32_301] : memref<50x32xf32, #tpu.memory_space<any>> -> memref<1x32xf32, #tpu.memory_space<any>>
    %594 = tpu.memref_squeeze %593 : memref<1x32xf32, #tpu.memory_space<any>> -> memref<32xf32, #tpu.memory_space<any>>
    %c0_i32_302 = arith.constant 0 : i32
    %595 = tpu.memref_slice %arg8[%c36_i32_300, %c0_i32_302] : memref<64x32xf32, #tpu.memory_space<vmem>> -> memref<1x32xf32, #tpu.memory_space<vmem>>
    %596 = tpu.memref_squeeze %595 : memref<1x32xf32, #tpu.memory_space<vmem>> -> memref<32xf32, #tpu.memory_space<vmem>>
    tpu.wait_dma2 semaphore(%arg9 : memref<!tpu.dma_semaphore, #tpu.memory_space<semaphore_mem>>) src(%594 : memref<32xf32, #tpu.memory_space<any>>) dst(%596 : memref<32xf32, #tpu.memory_space<vmem>>)
    %c37_i32_303 = arith.constant 37 : i32
    %c0_i32_304 = arith.constant 0 : i32
    %597 = tpu.memref_slice %arg2[%262, %c0_i32_304] : memref<50x32xf32, #tpu.memory_space<any>> -> memref<1x32xf32, #tpu.memory_space<any>>
    %598 = tpu.memref_squeeze %597 : memref<1x32xf32, #tpu.memory_space<any>> -> memref<32xf32, #tpu.memory_space<any>>
    %c0_i32_305 = arith.constant 0 : i32
    %599 = tpu.memref_slice %arg8[%c37_i32_303, %c0_i32_305] : memref<64x32xf32, #tpu.memory_space<vmem>> -> memref<1x32xf32, #tpu.memory_space<vmem>>
    %600 = tpu.memref_squeeze %599 : memref<1x32xf32, #tpu.memory_space<vmem>> -> memref<32xf32, #tpu.memory_space<vmem>>
    tpu.wait_dma2 semaphore(%arg9 : memref<!tpu.dma_semaphore, #tpu.memory_space<semaphore_mem>>) src(%598 : memref<32xf32, #tpu.memory_space<any>>) dst(%600 : memref<32xf32, #tpu.memory_space<vmem>>)
    %c38_i32_306 = arith.constant 38 : i32
    %c0_i32_307 = arith.constant 0 : i32
    %601 = tpu.memref_slice %arg2[%269, %c0_i32_307] : memref<50x32xf32, #tpu.memory_space<any>> -> memref<1x32xf32, #tpu.memory_space<any>>
    %602 = tpu.memref_squeeze %601 : memref<1x32xf32, #tpu.memory_space<any>> -> memref<32xf32, #tpu.memory_space<any>>
    %c0_i32_308 = arith.constant 0 : i32
    %603 = tpu.memref_slice %arg8[%c38_i32_306, %c0_i32_308] : memref<64x32xf32, #tpu.memory_space<vmem>> -> memref<1x32xf32, #tpu.memory_space<vmem>>
    %604 = tpu.memref_squeeze %603 : memref<1x32xf32, #tpu.memory_space<vmem>> -> memref<32xf32, #tpu.memory_space<vmem>>
    tpu.wait_dma2 semaphore(%arg9 : memref<!tpu.dma_semaphore, #tpu.memory_space<semaphore_mem>>) src(%602 : memref<32xf32, #tpu.memory_space<any>>) dst(%604 : memref<32xf32, #tpu.memory_space<vmem>>)
    %c39_i32_309 = arith.constant 39 : i32
    %c0_i32_310 = arith.constant 0 : i32
    %605 = tpu.memref_slice %arg2[%276, %c0_i32_310] : memref<50x32xf32, #tpu.memory_space<any>> -> memref<1x32xf32, #tpu.memory_space<any>>
    %606 = tpu.memref_squeeze %605 : memref<1x32xf32, #tpu.memory_space<any>> -> memref<32xf32, #tpu.memory_space<any>>
    %c0_i32_311 = arith.constant 0 : i32
    %607 = tpu.memref_slice %arg8[%c39_i32_309, %c0_i32_311] : memref<64x32xf32, #tpu.memory_space<vmem>> -> memref<1x32xf32, #tpu.memory_space<vmem>>
    %608 = tpu.memref_squeeze %607 : memref<1x32xf32, #tpu.memory_space<vmem>> -> memref<32xf32, #tpu.memory_space<vmem>>
    tpu.wait_dma2 semaphore(%arg9 : memref<!tpu.dma_semaphore, #tpu.memory_space<semaphore_mem>>) src(%606 : memref<32xf32, #tpu.memory_space<any>>) dst(%608 : memref<32xf32, #tpu.memory_space<vmem>>)
    %c40_i32_312 = arith.constant 40 : i32
    %c0_i32_313 = arith.constant 0 : i32
    %609 = tpu.memref_slice %arg2[%283, %c0_i32_313] : memref<50x32xf32, #tpu.memory_space<any>> -> memref<1x32xf32, #tpu.memory_space<any>>
    %610 = tpu.memref_squeeze %609 : memref<1x32xf32, #tpu.memory_space<any>> -> memref<32xf32, #tpu.memory_space<any>>
    %c0_i32_314 = arith.constant 0 : i32
    %611 = tpu.memref_slice %arg8[%c40_i32_312, %c0_i32_314] : memref<64x32xf32, #tpu.memory_space<vmem>> -> memref<1x32xf32, #tpu.memory_space<vmem>>
    %612 = tpu.memref_squeeze %611 : memref<1x32xf32, #tpu.memory_space<vmem>> -> memref<32xf32, #tpu.memory_space<vmem>>
    tpu.wait_dma2 semaphore(%arg9 : memref<!tpu.dma_semaphore, #tpu.memory_space<semaphore_mem>>) src(%610 : memref<32xf32, #tpu.memory_space<any>>) dst(%612 : memref<32xf32, #tpu.memory_space<vmem>>)
    %c41_i32_315 = arith.constant 41 : i32
    %c0_i32_316 = arith.constant 0 : i32
    %613 = tpu.memref_slice %arg2[%290, %c0_i32_316] : memref<50x32xf32, #tpu.memory_space<any>> -> memref<1x32xf32, #tpu.memory_space<any>>
    %614 = tpu.memref_squeeze %613 : memref<1x32xf32, #tpu.memory_space<any>> -> memref<32xf32, #tpu.memory_space<any>>
    %c0_i32_317 = arith.constant 0 : i32
    %615 = tpu.memref_slice %arg8[%c41_i32_315, %c0_i32_317] : memref<64x32xf32, #tpu.memory_space<vmem>> -> memref<1x32xf32, #tpu.memory_space<vmem>>
    %616 = tpu.memref_squeeze %615 : memref<1x32xf32, #tpu.memory_space<vmem>> -> memref<32xf32, #tpu.memory_space<vmem>>
    tpu.wait_dma2 semaphore(%arg9 : memref<!tpu.dma_semaphore, #tpu.memory_space<semaphore_mem>>) src(%614 : memref<32xf32, #tpu.memory_space<any>>) dst(%616 : memref<32xf32, #tpu.memory_space<vmem>>)
    %c42_i32_318 = arith.constant 42 : i32
    %c0_i32_319 = arith.constant 0 : i32
    %617 = tpu.memref_slice %arg2[%297, %c0_i32_319] : memref<50x32xf32, #tpu.memory_space<any>> -> memref<1x32xf32, #tpu.memory_space<any>>
    %618 = tpu.memref_squeeze %617 : memref<1x32xf32, #tpu.memory_space<any>> -> memref<32xf32, #tpu.memory_space<any>>
    %c0_i32_320 = arith.constant 0 : i32
    %619 = tpu.memref_slice %arg8[%c42_i32_318, %c0_i32_320] : memref<64x32xf32, #tpu.memory_space<vmem>> -> memref<1x32xf32, #tpu.memory_space<vmem>>
    %620 = tpu.memref_squeeze %619 : memref<1x32xf32, #tpu.memory_space<vmem>> -> memref<32xf32, #tpu.memory_space<vmem>>
    tpu.wait_dma2 semaphore(%arg9 : memref<!tpu.dma_semaphore, #tpu.memory_space<semaphore_mem>>) src(%618 : memref<32xf32, #tpu.memory_space<any>>) dst(%620 : memref<32xf32, #tpu.memory_space<vmem>>)
    %c43_i32_321 = arith.constant 43 : i32
    %c0_i32_322 = arith.constant 0 : i32
    %621 = tpu.memref_slice %arg2[%304, %c0_i32_322] : memref<50x32xf32, #tpu.memory_space<any>> -> memref<1x32xf32, #tpu.memory_space<any>>
    %622 = tpu.memref_squeeze %621 : memref<1x32xf32, #tpu.memory_space<any>> -> memref<32xf32, #tpu.memory_space<any>>
    %c0_i32_323 = arith.constant 0 : i32
    %623 = tpu.memref_slice %arg8[%c43_i32_321, %c0_i32_323] : memref<64x32xf32, #tpu.memory_space<vmem>> -> memref<1x32xf32, #tpu.memory_space<vmem>>
    %624 = tpu.memref_squeeze %623 : memref<1x32xf32, #tpu.memory_space<vmem>> -> memref<32xf32, #tpu.memory_space<vmem>>
    tpu.wait_dma2 semaphore(%arg9 : memref<!tpu.dma_semaphore, #tpu.memory_space<semaphore_mem>>) src(%622 : memref<32xf32, #tpu.memory_space<any>>) dst(%624 : memref<32xf32, #tpu.memory_space<vmem>>)
    %c44_i32_324 = arith.constant 44 : i32
    %c0_i32_325 = arith.constant 0 : i32
    %625 = tpu.memref_slice %arg2[%311, %c0_i32_325] : memref<50x32xf32, #tpu.memory_space<any>> -> memref<1x32xf32, #tpu.memory_space<any>>
    %626 = tpu.memref_squeeze %625 : memref<1x32xf32, #tpu.memory_space<any>> -> memref<32xf32, #tpu.memory_space<any>>
    %c0_i32_326 = arith.constant 0 : i32
    %627 = tpu.memref_slice %arg8[%c44_i32_324, %c0_i32_326] : memref<64x32xf32, #tpu.memory_space<vmem>> -> memref<1x32xf32, #tpu.memory_space<vmem>>
    %628 = tpu.memref_squeeze %627 : memref<1x32xf32, #tpu.memory_space<vmem>> -> memref<32xf32, #tpu.memory_space<vmem>>
    tpu.wait_dma2 semaphore(%arg9 : memref<!tpu.dma_semaphore, #tpu.memory_space<semaphore_mem>>) src(%626 : memref<32xf32, #tpu.memory_space<any>>) dst(%628 : memref<32xf32, #tpu.memory_space<vmem>>)
    %c45_i32_327 = arith.constant 45 : i32
    %c0_i32_328 = arith.constant 0 : i32
    %629 = tpu.memref_slice %arg2[%318, %c0_i32_328] : memref<50x32xf32, #tpu.memory_space<any>> -> memref<1x32xf32, #tpu.memory_space<any>>
    %630 = tpu.memref_squeeze %629 : memref<1x32xf32, #tpu.memory_space<any>> -> memref<32xf32, #tpu.memory_space<any>>
    %c0_i32_329 = arith.constant 0 : i32
    %631 = tpu.memref_slice %arg8[%c45_i32_327, %c0_i32_329] : memref<64x32xf32, #tpu.memory_space<vmem>> -> memref<1x32xf32, #tpu.memory_space<vmem>>
    %632 = tpu.memref_squeeze %631 : memref<1x32xf32, #tpu.memory_space<vmem>> -> memref<32xf32, #tpu.memory_space<vmem>>
    tpu.wait_dma2 semaphore(%arg9 : memref<!tpu.dma_semaphore, #tpu.memory_space<semaphore_mem>>) src(%630 : memref<32xf32, #tpu.memory_space<any>>) dst(%632 : memref<32xf32, #tpu.memory_space<vmem>>)
    %c46_i32_330 = arith.constant 46 : i32
    %c0_i32_331 = arith.constant 0 : i32
    %633 = tpu.memref_slice %arg2[%325, %c0_i32_331] : memref<50x32xf32, #tpu.memory_space<any>> -> memref<1x32xf32, #tpu.memory_space<any>>
    %634 = tpu.memref_squeeze %633 : memref<1x32xf32, #tpu.memory_space<any>> -> memref<32xf32, #tpu.memory_space<any>>
    %c0_i32_332 = arith.constant 0 : i32
    %635 = tpu.memref_slice %arg8[%c46_i32_330, %c0_i32_332] : memref<64x32xf32, #tpu.memory_space<vmem>> -> memref<1x32xf32, #tpu.memory_space<vmem>>
    %636 = tpu.memref_squeeze %635 : memref<1x32xf32, #tpu.memory_space<vmem>> -> memref<32xf32, #tpu.memory_space<vmem>>
    tpu.wait_dma2 semaphore(%arg9 : memref<!tpu.dma_semaphore, #tpu.memory_space<semaphore_mem>>) src(%634 : memref<32xf32, #tpu.memory_space<any>>) dst(%636 : memref<32xf32, #tpu.memory_space<vmem>>)
    %c47_i32_333 = arith.constant 47 : i32
    %c0_i32_334 = arith.constant 0 : i32
    %637 = tpu.memref_slice %arg2[%332, %c0_i32_334] : memref<50x32xf32, #tpu.memory_space<any>> -> memref<1x32xf32, #tpu.memory_space<any>>
    %638 = tpu.memref_squeeze %637 : memref<1x32xf32, #tpu.memory_space<any>> -> memref<32xf32, #tpu.memory_space<any>>
    %c0_i32_335 = arith.constant 0 : i32
    %639 = tpu.memref_slice %arg8[%c47_i32_333, %c0_i32_335] : memref<64x32xf32, #tpu.memory_space<vmem>> -> memref<1x32xf32, #tpu.memory_space<vmem>>
    %640 = tpu.memref_squeeze %639 : memref<1x32xf32, #tpu.memory_space<vmem>> -> memref<32xf32, #tpu.memory_space<vmem>>
    tpu.wait_dma2 semaphore(%arg9 : memref<!tpu.dma_semaphore, #tpu.memory_space<semaphore_mem>>) src(%638 : memref<32xf32, #tpu.memory_space<any>>) dst(%640 : memref<32xf32, #tpu.memory_space<vmem>>)
    %c48_i32_336 = arith.constant 48 : i32
    %c0_i32_337 = arith.constant 0 : i32
    %641 = tpu.memref_slice %arg2[%339, %c0_i32_337] : memref<50x32xf32, #tpu.memory_space<any>> -> memref<1x32xf32, #tpu.memory_space<any>>
    %642 = tpu.memref_squeeze %641 : memref<1x32xf32, #tpu.memory_space<any>> -> memref<32xf32, #tpu.memory_space<any>>
    %c0_i32_338 = arith.constant 0 : i32
    %643 = tpu.memref_slice %arg8[%c48_i32_336, %c0_i32_338] : memref<64x32xf32, #tpu.memory_space<vmem>> -> memref<1x32xf32, #tpu.memory_space<vmem>>
    %644 = tpu.memref_squeeze %643 : memref<1x32xf32, #tpu.memory_space<vmem>> -> memref<32xf32, #tpu.memory_space<vmem>>
    tpu.wait_dma2 semaphore(%arg9 : memref<!tpu.dma_semaphore, #tpu.memory_space<semaphore_mem>>) src(%642 : memref<32xf32, #tpu.memory_space<any>>) dst(%644 : memref<32xf32, #tpu.memory_space<vmem>>)
    %c49_i32_339 = arith.constant 49 : i32
    %c0_i32_340 = arith.constant 0 : i32
    %645 = tpu.memref_slice %arg2[%346, %c0_i32_340] : memref<50x32xf32, #tpu.memory_space<any>> -> memref<1x32xf32, #tpu.memory_space<any>>
    %646 = tpu.memref_squeeze %645 : memref<1x32xf32, #tpu.memory_space<any>> -> memref<32xf32, #tpu.memory_space<any>>
    %c0_i32_341 = arith.constant 0 : i32
    %647 = tpu.memref_slice %arg8[%c49_i32_339, %c0_i32_341] : memref<64x32xf32, #tpu.memory_space<vmem>> -> memref<1x32xf32, #tpu.memory_space<vmem>>
    %648 = tpu.memref_squeeze %647 : memref<1x32xf32, #tpu.memory_space<vmem>> -> memref<32xf32, #tpu.memory_space<vmem>>
    tpu.wait_dma2 semaphore(%arg9 : memref<!tpu.dma_semaphore, #tpu.memory_space<semaphore_mem>>) src(%646 : memref<32xf32, #tpu.memory_space<any>>) dst(%648 : memref<32xf32, #tpu.memory_space<vmem>>)
    %c50_i32_342 = arith.constant 50 : i32
    %c0_i32_343 = arith.constant 0 : i32
    %649 = tpu.memref_slice %arg2[%353, %c0_i32_343] : memref<50x32xf32, #tpu.memory_space<any>> -> memref<1x32xf32, #tpu.memory_space<any>>
    %650 = tpu.memref_squeeze %649 : memref<1x32xf32, #tpu.memory_space<any>> -> memref<32xf32, #tpu.memory_space<any>>
    %c0_i32_344 = arith.constant 0 : i32
    %651 = tpu.memref_slice %arg8[%c50_i32_342, %c0_i32_344] : memref<64x32xf32, #tpu.memory_space<vmem>> -> memref<1x32xf32, #tpu.memory_space<vmem>>
    %652 = tpu.memref_squeeze %651 : memref<1x32xf32, #tpu.memory_space<vmem>> -> memref<32xf32, #tpu.memory_space<vmem>>
    tpu.wait_dma2 semaphore(%arg9 : memref<!tpu.dma_semaphore, #tpu.memory_space<semaphore_mem>>) src(%650 : memref<32xf32, #tpu.memory_space<any>>) dst(%652 : memref<32xf32, #tpu.memory_space<vmem>>)
    %c51_i32_345 = arith.constant 51 : i32
    %c0_i32_346 = arith.constant 0 : i32
    %653 = tpu.memref_slice %arg2[%360, %c0_i32_346] : memref<50x32xf32, #tpu.memory_space<any>> -> memref<1x32xf32, #tpu.memory_space<any>>
    %654 = tpu.memref_squeeze %653 : memref<1x32xf32, #tpu.memory_space<any>> -> memref<32xf32, #tpu.memory_space<any>>
    %c0_i32_347 = arith.constant 0 : i32
    %655 = tpu.memref_slice %arg8[%c51_i32_345, %c0_i32_347] : memref<64x32xf32, #tpu.memory_space<vmem>> -> memref<1x32xf32, #tpu.memory_space<vmem>>
    %656 = tpu.memref_squeeze %655 : memref<1x32xf32, #tpu.memory_space<vmem>> -> memref<32xf32, #tpu.memory_space<vmem>>
    tpu.wait_dma2 semaphore(%arg9 : memref<!tpu.dma_semaphore, #tpu.memory_space<semaphore_mem>>) src(%654 : memref<32xf32, #tpu.memory_space<any>>) dst(%656 : memref<32xf32, #tpu.memory_space<vmem>>)
    %c52_i32_348 = arith.constant 52 : i32
    %c0_i32_349 = arith.constant 0 : i32
    %657 = tpu.memref_slice %arg2[%367, %c0_i32_349] : memref<50x32xf32, #tpu.memory_space<any>> -> memref<1x32xf32, #tpu.memory_space<any>>
    %658 = tpu.memref_squeeze %657 : memref<1x32xf32, #tpu.memory_space<any>> -> memref<32xf32, #tpu.memory_space<any>>
    %c0_i32_350 = arith.constant 0 : i32
    %659 = tpu.memref_slice %arg8[%c52_i32_348, %c0_i32_350] : memref<64x32xf32, #tpu.memory_space<vmem>> -> memref<1x32xf32, #tpu.memory_space<vmem>>
    %660 = tpu.memref_squeeze %659 : memref<1x32xf32, #tpu.memory_space<vmem>> -> memref<32xf32, #tpu.memory_space<vmem>>
    tpu.wait_dma2 semaphore(%arg9 : memref<!tpu.dma_semaphore, #tpu.memory_space<semaphore_mem>>) src(%658 : memref<32xf32, #tpu.memory_space<any>>) dst(%660 : memref<32xf32, #tpu.memory_space<vmem>>)
    %c53_i32_351 = arith.constant 53 : i32
    %c0_i32_352 = arith.constant 0 : i32
    %661 = tpu.memref_slice %arg2[%374, %c0_i32_352] : memref<50x32xf32, #tpu.memory_space<any>> -> memref<1x32xf32, #tpu.memory_space<any>>
    %662 = tpu.memref_squeeze %661 : memref<1x32xf32, #tpu.memory_space<any>> -> memref<32xf32, #tpu.memory_space<any>>
    %c0_i32_353 = arith.constant 0 : i32
    %663 = tpu.memref_slice %arg8[%c53_i32_351, %c0_i32_353] : memref<64x32xf32, #tpu.memory_space<vmem>> -> memref<1x32xf32, #tpu.memory_space<vmem>>
    %664 = tpu.memref_squeeze %663 : memref<1x32xf32, #tpu.memory_space<vmem>> -> memref<32xf32, #tpu.memory_space<vmem>>
    tpu.wait_dma2 semaphore(%arg9 : memref<!tpu.dma_semaphore, #tpu.memory_space<semaphore_mem>>) src(%662 : memref<32xf32, #tpu.memory_space<any>>) dst(%664 : memref<32xf32, #tpu.memory_space<vmem>>)
    %c54_i32_354 = arith.constant 54 : i32
    %c0_i32_355 = arith.constant 0 : i32
    %665 = tpu.memref_slice %arg2[%381, %c0_i32_355] : memref<50x32xf32, #tpu.memory_space<any>> -> memref<1x32xf32, #tpu.memory_space<any>>
    %666 = tpu.memref_squeeze %665 : memref<1x32xf32, #tpu.memory_space<any>> -> memref<32xf32, #tpu.memory_space<any>>
    %c0_i32_356 = arith.constant 0 : i32
    %667 = tpu.memref_slice %arg8[%c54_i32_354, %c0_i32_356] : memref<64x32xf32, #tpu.memory_space<vmem>> -> memref<1x32xf32, #tpu.memory_space<vmem>>
    %668 = tpu.memref_squeeze %667 : memref<1x32xf32, #tpu.memory_space<vmem>> -> memref<32xf32, #tpu.memory_space<vmem>>
    tpu.wait_dma2 semaphore(%arg9 : memref<!tpu.dma_semaphore, #tpu.memory_space<semaphore_mem>>) src(%666 : memref<32xf32, #tpu.memory_space<any>>) dst(%668 : memref<32xf32, #tpu.memory_space<vmem>>)
    %c55_i32_357 = arith.constant 55 : i32
    %c0_i32_358 = arith.constant 0 : i32
    %669 = tpu.memref_slice %arg2[%388, %c0_i32_358] : memref<50x32xf32, #tpu.memory_space<any>> -> memref<1x32xf32, #tpu.memory_space<any>>
    %670 = tpu.memref_squeeze %669 : memref<1x32xf32, #tpu.memory_space<any>> -> memref<32xf32, #tpu.memory_space<any>>
    %c0_i32_359 = arith.constant 0 : i32
    %671 = tpu.memref_slice %arg8[%c55_i32_357, %c0_i32_359] : memref<64x32xf32, #tpu.memory_space<vmem>> -> memref<1x32xf32, #tpu.memory_space<vmem>>
    %672 = tpu.memref_squeeze %671 : memref<1x32xf32, #tpu.memory_space<vmem>> -> memref<32xf32, #tpu.memory_space<vmem>>
    tpu.wait_dma2 semaphore(%arg9 : memref<!tpu.dma_semaphore, #tpu.memory_space<semaphore_mem>>) src(%670 : memref<32xf32, #tpu.memory_space<any>>) dst(%672 : memref<32xf32, #tpu.memory_space<vmem>>)
    %c56_i32_360 = arith.constant 56 : i32
    %c0_i32_361 = arith.constant 0 : i32
    %673 = tpu.memref_slice %arg2[%395, %c0_i32_361] : memref<50x32xf32, #tpu.memory_space<any>> -> memref<1x32xf32, #tpu.memory_space<any>>
    %674 = tpu.memref_squeeze %673 : memref<1x32xf32, #tpu.memory_space<any>> -> memref<32xf32, #tpu.memory_space<any>>
    %c0_i32_362 = arith.constant 0 : i32
    %675 = tpu.memref_slice %arg8[%c56_i32_360, %c0_i32_362] : memref<64x32xf32, #tpu.memory_space<vmem>> -> memref<1x32xf32, #tpu.memory_space<vmem>>
    %676 = tpu.memref_squeeze %675 : memref<1x32xf32, #tpu.memory_space<vmem>> -> memref<32xf32, #tpu.memory_space<vmem>>
    tpu.wait_dma2 semaphore(%arg9 : memref<!tpu.dma_semaphore, #tpu.memory_space<semaphore_mem>>) src(%674 : memref<32xf32, #tpu.memory_space<any>>) dst(%676 : memref<32xf32, #tpu.memory_space<vmem>>)
    %c57_i32_363 = arith.constant 57 : i32
    %c0_i32_364 = arith.constant 0 : i32
    %677 = tpu.memref_slice %arg2[%402, %c0_i32_364] : memref<50x32xf32, #tpu.memory_space<any>> -> memref<1x32xf32, #tpu.memory_space<any>>
    %678 = tpu.memref_squeeze %677 : memref<1x32xf32, #tpu.memory_space<any>> -> memref<32xf32, #tpu.memory_space<any>>
    %c0_i32_365 = arith.constant 0 : i32
    %679 = tpu.memref_slice %arg8[%c57_i32_363, %c0_i32_365] : memref<64x32xf32, #tpu.memory_space<vmem>> -> memref<1x32xf32, #tpu.memory_space<vmem>>
    %680 = tpu.memref_squeeze %679 : memref<1x32xf32, #tpu.memory_space<vmem>> -> memref<32xf32, #tpu.memory_space<vmem>>
    tpu.wait_dma2 semaphore(%arg9 : memref<!tpu.dma_semaphore, #tpu.memory_space<semaphore_mem>>) src(%678 : memref<32xf32, #tpu.memory_space<any>>) dst(%680 : memref<32xf32, #tpu.memory_space<vmem>>)
    %c58_i32_366 = arith.constant 58 : i32
    %c0_i32_367 = arith.constant 0 : i32
    %681 = tpu.memref_slice %arg2[%409, %c0_i32_367] : memref<50x32xf32, #tpu.memory_space<any>> -> memref<1x32xf32, #tpu.memory_space<any>>
    %682 = tpu.memref_squeeze %681 : memref<1x32xf32, #tpu.memory_space<any>> -> memref<32xf32, #tpu.memory_space<any>>
    %c0_i32_368 = arith.constant 0 : i32
    %683 = tpu.memref_slice %arg8[%c58_i32_366, %c0_i32_368] : memref<64x32xf32, #tpu.memory_space<vmem>> -> memref<1x32xf32, #tpu.memory_space<vmem>>
    %684 = tpu.memref_squeeze %683 : memref<1x32xf32, #tpu.memory_space<vmem>> -> memref<32xf32, #tpu.memory_space<vmem>>
    tpu.wait_dma2 semaphore(%arg9 : memref<!tpu.dma_semaphore, #tpu.memory_space<semaphore_mem>>) src(%682 : memref<32xf32, #tpu.memory_space<any>>) dst(%684 : memref<32xf32, #tpu.memory_space<vmem>>)
    %c59_i32_369 = arith.constant 59 : i32
    %c0_i32_370 = arith.constant 0 : i32
    %685 = tpu.memref_slice %arg2[%416, %c0_i32_370] : memref<50x32xf32, #tpu.memory_space<any>> -> memref<1x32xf32, #tpu.memory_space<any>>
    %686 = tpu.memref_squeeze %685 : memref<1x32xf32, #tpu.memory_space<any>> -> memref<32xf32, #tpu.memory_space<any>>
    %c0_i32_371 = arith.constant 0 : i32
    %687 = tpu.memref_slice %arg8[%c59_i32_369, %c0_i32_371] : memref<64x32xf32, #tpu.memory_space<vmem>> -> memref<1x32xf32, #tpu.memory_space<vmem>>
    %688 = tpu.memref_squeeze %687 : memref<1x32xf32, #tpu.memory_space<vmem>> -> memref<32xf32, #tpu.memory_space<vmem>>
    tpu.wait_dma2 semaphore(%arg9 : memref<!tpu.dma_semaphore, #tpu.memory_space<semaphore_mem>>) src(%686 : memref<32xf32, #tpu.memory_space<any>>) dst(%688 : memref<32xf32, #tpu.memory_space<vmem>>)
    %c60_i32_372 = arith.constant 60 : i32
    %c0_i32_373 = arith.constant 0 : i32
    %689 = tpu.memref_slice %arg2[%423, %c0_i32_373] : memref<50x32xf32, #tpu.memory_space<any>> -> memref<1x32xf32, #tpu.memory_space<any>>
    %690 = tpu.memref_squeeze %689 : memref<1x32xf32, #tpu.memory_space<any>> -> memref<32xf32, #tpu.memory_space<any>>
    %c0_i32_374 = arith.constant 0 : i32
    %691 = tpu.memref_slice %arg8[%c60_i32_372, %c0_i32_374] : memref<64x32xf32, #tpu.memory_space<vmem>> -> memref<1x32xf32, #tpu.memory_space<vmem>>
    %692 = tpu.memref_squeeze %691 : memref<1x32xf32, #tpu.memory_space<vmem>> -> memref<32xf32, #tpu.memory_space<vmem>>
    tpu.wait_dma2 semaphore(%arg9 : memref<!tpu.dma_semaphore, #tpu.memory_space<semaphore_mem>>) src(%690 : memref<32xf32, #tpu.memory_space<any>>) dst(%692 : memref<32xf32, #tpu.memory_space<vmem>>)
    %c61_i32_375 = arith.constant 61 : i32
    %c0_i32_376 = arith.constant 0 : i32
    %693 = tpu.memref_slice %arg2[%430, %c0_i32_376] : memref<50x32xf32, #tpu.memory_space<any>> -> memref<1x32xf32, #tpu.memory_space<any>>
    %694 = tpu.memref_squeeze %693 : memref<1x32xf32, #tpu.memory_space<any>> -> memref<32xf32, #tpu.memory_space<any>>
    %c0_i32_377 = arith.constant 0 : i32
    %695 = tpu.memref_slice %arg8[%c61_i32_375, %c0_i32_377] : memref<64x32xf32, #tpu.memory_space<vmem>> -> memref<1x32xf32, #tpu.memory_space<vmem>>
    %696 = tpu.memref_squeeze %695 : memref<1x32xf32, #tpu.memory_space<vmem>> -> memref<32xf32, #tpu.memory_space<vmem>>
    tpu.wait_dma2 semaphore(%arg9 : memref<!tpu.dma_semaphore, #tpu.memory_space<semaphore_mem>>) src(%694 : memref<32xf32, #tpu.memory_space<any>>) dst(%696 : memref<32xf32, #tpu.memory_space<vmem>>)
    %c62_i32_378 = arith.constant 62 : i32
    %c0_i32_379 = arith.constant 0 : i32
    %697 = tpu.memref_slice %arg2[%437, %c0_i32_379] : memref<50x32xf32, #tpu.memory_space<any>> -> memref<1x32xf32, #tpu.memory_space<any>>
    %698 = tpu.memref_squeeze %697 : memref<1x32xf32, #tpu.memory_space<any>> -> memref<32xf32, #tpu.memory_space<any>>
    %c0_i32_380 = arith.constant 0 : i32
    %699 = tpu.memref_slice %arg8[%c62_i32_378, %c0_i32_380] : memref<64x32xf32, #tpu.memory_space<vmem>> -> memref<1x32xf32, #tpu.memory_space<vmem>>
    %700 = tpu.memref_squeeze %699 : memref<1x32xf32, #tpu.memory_space<vmem>> -> memref<32xf32, #tpu.memory_space<vmem>>
    tpu.wait_dma2 semaphore(%arg9 : memref<!tpu.dma_semaphore, #tpu.memory_space<semaphore_mem>>) src(%698 : memref<32xf32, #tpu.memory_space<any>>) dst(%700 : memref<32xf32, #tpu.memory_space<vmem>>)
    %c63_i32_381 = arith.constant 63 : i32
    %c0_i32_382 = arith.constant 0 : i32
    %701 = tpu.memref_slice %arg2[%444, %c0_i32_382] : memref<50x32xf32, #tpu.memory_space<any>> -> memref<1x32xf32, #tpu.memory_space<any>>
    %702 = tpu.memref_squeeze %701 : memref<1x32xf32, #tpu.memory_space<any>> -> memref<32xf32, #tpu.memory_space<any>>
    %c0_i32_383 = arith.constant 0 : i32
    %703 = tpu.memref_slice %arg8[%c63_i32_381, %c0_i32_383] : memref<64x32xf32, #tpu.memory_space<vmem>> -> memref<1x32xf32, #tpu.memory_space<vmem>>
    %704 = tpu.memref_squeeze %703 : memref<1x32xf32, #tpu.memory_space<vmem>> -> memref<32xf32, #tpu.memory_space<vmem>>
    tpu.wait_dma2 semaphore(%arg9 : memref<!tpu.dma_semaphore, #tpu.memory_space<semaphore_mem>>) src(%702 : memref<32xf32, #tpu.memory_space<any>>) dst(%704 : memref<32xf32, #tpu.memory_space<vmem>>)
    %c0 = arith.constant 0 : index
    %c0_384 = arith.constant 0 : index
    %705 = vector.load %arg8[%c0, %c0_384] : memref<64x32xf32, #tpu.memory_space<vmem>>, vector<64x32xf32>
    %c0_385 = arith.constant 0 : index
    %c0_386 = arith.constant 0 : index
    %706 = vector.load %arg3[%c0_385, %c0_386] : memref<128x128xf32, #tpu.memory_space<vmem>>, vector<32x128xf32>
    %cst = arith.constant dense<0.000000e+00> : vector<64x128xf32>
    %707 = tpu.matmul %705, %706, %cst {dimension_numbers = #tpu.dot_dimension_numbers<[1], [0], [0], [1], [0, 0, 1, 1], [], []>} : vector<64x32xf32>, vector<32x128xf32>, vector<64x128xf32> -> vector<64x128xf32>
    %c63_i32_387 = arith.constant 63 : i32
    %708 = tpu.dynamic_rotate %705 by %c63_i32_387 dim 0 : vector<64x32xf32>, i32 -> vector<64x32xf32>
    %c32 = arith.constant 32 : index
    %c0_388 = arith.constant 0 : index
    %709 = vector.load %arg3[%c32, %c0_388] : memref<128x128xf32, #tpu.memory_space<vmem>>, vector<32x128xf32>
    %cst_389 = arith.constant dense<0.000000e+00> : vector<64x128xf32>
    %710 = tpu.matmul %708, %709, %cst_389 {dimension_numbers = #tpu.dot_dimension_numbers<[1], [0], [0], [1], [0, 0, 1, 1], [], []>} : vector<64x32xf32>, vector<32x128xf32>, vector<64x128xf32> -> vector<64x128xf32>
    %711 = arith.addf %707, %710 : vector<64x128xf32>
    %c62_i32_390 = arith.constant 62 : i32
    %712 = tpu.dynamic_rotate %705 by %c62_i32_390 dim 0 : vector<64x32xf32>, i32 -> vector<64x32xf32>
    %c64 = arith.constant 64 : index
    %c0_391 = arith.constant 0 : index
    %713 = vector.load %arg3[%c64, %c0_391] : memref<128x128xf32, #tpu.memory_space<vmem>>, vector<32x128xf32>
    %cst_392 = arith.constant dense<0.000000e+00> : vector<64x128xf32>
    %714 = tpu.matmul %712, %713, %cst_392 {dimension_numbers = #tpu.dot_dimension_numbers<[1], [0], [0], [1], [0, 0, 1, 1], [], []>} : vector<64x32xf32>, vector<32x128xf32>, vector<64x128xf32> -> vector<64x128xf32>
    %715 = arith.addf %711, %714 : vector<64x128xf32>
    %c61_i32_393 = arith.constant 61 : i32
    %716 = tpu.dynamic_rotate %705 by %c61_i32_393 dim 0 : vector<64x32xf32>, i32 -> vector<64x32xf32>
    %c96 = arith.constant 96 : index
    %c0_394 = arith.constant 0 : index
    %717 = vector.load %arg3[%c96, %c0_394] : memref<128x128xf32, #tpu.memory_space<vmem>>, vector<32x128xf32>
    %cst_395 = arith.constant dense<0.000000e+00> : vector<64x128xf32>
    %718 = tpu.matmul %716, %717, %cst_395 {dimension_numbers = #tpu.dot_dimension_numbers<[1], [0], [0], [1], [0, 0, 1, 1], [], []>} : vector<64x32xf32>, vector<32x128xf32>, vector<64x128xf32> -> vector<64x128xf32>
    %719 = arith.addf %715, %718 : vector<64x128xf32>
    %720 = tpu.iota {dimensions = array<i32: 0>} : vector<64x128xi32>
    %c8_i32_396 = arith.constant 8 : i32
    %c0_i32_397 = arith.constant 0 : i32
    %721 = arith.cmpi eq, %c8_i32_396, %c0_i32_397 : i32
    %c1_i32_398 = arith.constant 1 : i32
    %722 = arith.select %721, %c1_i32_398, %c8_i32_396 : i32
    %723 = vector.broadcast %722 : i32 to vector<64x128xi32>
    %724 = arith.remsi %720, %723 : vector<64x128xi32>
    %c0_i32_399 = arith.constant 0 : i32
    %725 = vector.broadcast %c0_i32_399 : i32 to vector<64x128xi32>
    %726 = arith.cmpi ne, %724, %725 : vector<64x128xi32>
    %c0_i32_400 = arith.constant 0 : i32
    %727 = vector.broadcast %c0_i32_400 : i32 to vector<64x128xi32>
    %728 = arith.cmpi slt, %724, %727 : vector<64x128xi32>
    %c0_i32_401 = arith.constant 0 : i32
    %729 = arith.cmpi slt, %722, %c0_i32_401 : i32
    %730 = vector.broadcast %729 : i1 to vector<64x128xi1>
    %731 = vector.broadcast %730 : vector<64x128xi1> to vector<64x128xi1>
    %732 = arith.xori %728, %731 : vector<64x128xi1>
    %733 = arith.andi %732, %726 : vector<64x128xi1>
    %734 = vector.broadcast %722 : i32 to vector<64x128xi32>
    %735 = arith.addi %724, %734 : vector<64x128xi32>
    %736 = arith.select %733, %735, %724 : vector<64x128xi1>, vector<64x128xi32>
    %737 = tpu.iota {dimensions = array<i32: 1>} : vector<64x128xi32>
    %c4_i32_402 = arith.constant 4 : i32
    %738 = vector.broadcast %c4_i32_402 : i32 to vector<64x128xi32>
    %c16_i32_403 = arith.constant 16 : i32
    %739 = vector.broadcast %c16_i32_403 : i32 to vector<64x128xi32>
    %740 = arith.cmpi slt, %737, %739 : vector<64x128xi32>
    %c5_i32_404 = arith.constant 5 : i32
    %741 = vector.broadcast %c5_i32_404 : i32 to vector<64x128xi32>
    %742 = arith.select %740, %741, %738 : vector<64x128xi1>, vector<64x128xi32>
    %c8_i32_405 = arith.constant 8 : i32
    %743 = vector.broadcast %c8_i32_405 : i32 to vector<64x128xi32>
    %744 = arith.cmpi slt, %737, %743 : vector<64x128xi32>
    %c6_i32_406 = arith.constant 6 : i32
    %745 = vector.broadcast %c6_i32_406 : i32 to vector<64x128xi32>
    %746 = arith.select %744, %745, %742 : vector<64x128xi1>, vector<64x128xi32>
    %747 = arith.cmpi sle, %736, %746 : vector<64x128xi32>
    %cst_407 = arith.constant -1.000000e+30 : f32
    %748 = vector.broadcast %cst_407 : f32 to vector<64x128xf32>
    %749 = arith.select %747, %719, %748 : vector<64x128xi1>, vector<64x128xf32>
    %750 = vector.shape_cast %749 : vector<64x128xf32> to vector<8x8x128xf32>
    %cst_408 = arith.constant dense<0xFF800000> : vector<8x128xf32>
    %751 = vector.multi_reduction <maximumf>, %750, %cst_408 [1] : vector<8x8x128xf32> to vector<8x128xf32>
    %c0_409 = arith.constant 0 : index
    %c0_410 = arith.constant 0 : index
    %752 = vector.load %arg4[%c0_409, %c0_410] : memref<1x128xf32, #tpu.memory_space<vmem>>, vector<1x128xf32>
    %753 = vector.broadcast %752 : vector<1x128xf32> to vector<8x128xf32>
    %754 = arith.addf %751, %753 : vector<8x128xf32>
    %cst_411 = arith.constant 0.000000e+00 : f32
    %755 = vector.broadcast %cst_411 : f32 to vector<8x128xf32>
    %756 = arith.maximumf %754, %755 : vector<8x128xf32>
    %c0_412 = arith.constant 0 : index
    %c0_413 = arith.constant 0 : index
    %757 = vector.load %arg5[%c0_412, %c0_413] : memref<128x128xf32, #tpu.memory_space<vmem>>, vector<128x128xf32>
    %cst_414 = arith.constant dense<0.000000e+00> : vector<8x128xf32>
    %758 = tpu.matmul %756, %757, %cst_414 {dimension_numbers = #tpu.dot_dimension_numbers<[1], [0], [0], [1], [0, 0, 1, 1], [], []>} : vector<8x128xf32>, vector<128x128xf32>, vector<8x128xf32> -> vector<8x128xf32>
    %c0_415 = arith.constant 0 : index
    %c0_416 = arith.constant 0 : index
    %759 = vector.load %arg6[%c0_415, %c0_416] : memref<1x128xf32, #tpu.memory_space<vmem>>, vector<1x128xf32>
    %760 = vector.broadcast %759 : vector<1x128xf32> to vector<8x128xf32>
    %761 = arith.addf %758, %760 : vector<8x128xf32>
    %c0_417 = arith.constant 0 : index
    %c0_418 = arith.constant 0 : index
    %762 = vector.load %arg7[%c0_417, %c0_418] : memref<8x128xf32, #tpu.memory_space<vmem>>, vector<8x128xf32>
    tpu.vector_store %arg7[%c0_417, %c0_418], %761 {strides = array<i32>} : memref<8x128xf32, #tpu.memory_space<vmem>>, vector<8x128xf32>,
    return
  }
  func.func @transform_1(%arg0: i32, %arg1: memref<128xi32, #tpu.memory_space<smem>>) -> (i32, i32) {
    %c0_i32 = arith.constant 0 : i32
    %c0_i32_0 = arith.constant 0 : i32
    %c0_i32_1 = arith.constant 0 : i32
    return %c0_i32, %c0_i32_0 : i32, i32
  }
  func.func @transform_2(%arg0: i32, %arg1: memref<128xi32, #tpu.memory_space<smem>>) -> (i32, i32) {
    %c0_i32 = arith.constant 0 : i32
    %c0_i32_0 = arith.constant 0 : i32
    %c0_i32_1 = arith.constant 0 : i32
    return %c0_i32, %c0_i32_0 : i32, i32
  }
  func.func @transform_3(%arg0: i32, %arg1: memref<128xi32, #tpu.memory_space<smem>>) -> (i32, i32) {
    %c0_i32 = arith.constant 0 : i32
    %c0_i32_0 = arith.constant 0 : i32
    %c0_i32_1 = arith.constant 0 : i32
    return %c0_i32, %c0_i32_0 : i32, i32
  }
  func.func @transform_4(%arg0: i32, %arg1: memref<128xi32, #tpu.memory_space<smem>>) -> (i32, i32) {
    %c0_i32 = arith.constant 0 : i32
    %c0_i32_0 = arith.constant 0 : i32
    %c0_i32_1 = arith.constant 0 : i32
    return %c0_i32, %c0_i32_0 : i32, i32
  }
  func.func @transform_5(%arg0: i32, %arg1: memref<128xi32, #tpu.memory_space<smem>>) -> (i32, i32) {
    %c0_i32 = arith.constant 0 : i32
    %c0_i32_0 = arith.constant 0 : i32
    return %arg0, %c0_i32 : i32, i32
  }
}

</mosaic_0001>

<bundles_post_ra>
// kernel: tpu_custom_call.1
= control target key start
LH: loop header
LB: loop body
LE: loop exit
PB: predicated region body
PF: predicated region fallthrough
CT: control target
= control target key end

     0   :  { %s6397_s0 = inlined_call_operand.vmem [shape: s32[128], index: 0, kind: input, shape index: {}]   ;;  %s6398_s1 = inlined_call_operand.vmem [shape: f32[50,32], index: 1, kind: input, shape index: {}]   ;;  %s6399_s2 = inlined_call_operand.hbm [shape: f32[128,128], index: 2, kind: input, shape index: {}]   ;;  %s6400_s3 = inlined_call_operand.vmem [shape: f32[1,128], index: 3, kind: input, shape index: {}]   ;;  %s6401_s4 = inlined_call_operand.hbm [shape: f32[128,128], index: 4, kind: input, shape index: {}]   ;;  %s6402_s5 = inlined_call_operand.vmem [shape: f32[1,128], index: 5, kind: input, shape index: {}]   ;;  %s6403_s6 = inlined_call_operand.hbm [shape: f32[16,128], index: 6, kind: output, shape index: {}]  }
   0x1   :  { %s11_s23 = sshll.u32 %s6397_s0, 4  ;;  %s12_s23 = int_to_ptr.vmem [resolvable:$true] %s11_s23 }
   0x2   :  { %s5574_s24 = scalar_lea.vmem %s12_s23, 16  ;;  %p5579_p1 = scmp.lt.s32.totalorder %s12_s23, %s12_s23 }
   0x3   :  { %p5575_p0 = scmp.ne.s32.totalorder %s12_s23, %s5574_s24  ;;  %p5580_p2 = scmp.lt.s32.totalorder %s5574_s24, %s5574_s24 }
   0x5   :  { %p5581_p3 = por %p5580_p2, %p5579_p1 }
   0x7   :  { %p5582_p4 = pnand %p5581_p3, %p5575_p0 }
   0x9   :  { %5585 = shalt.err (!%p5582_p4)  }
   0xa   :  { %s5718_s25 = smov [#allocation5]  }
   0xb   :  { %14 = dma.vmem_to_smem %s12_s23, 16, %s5718_s25, [#allocation4] }
   0xc   :  { %5686 = dma.done.wait [#allocation4], 16 }
   0xd   :  { %5687 = vsyncadd [#allocation4], 4294967280 }
   0xe   :  { %16 = sfence }
   0xf   :  { %17 = vsyncpa [#allocation7], 0 }
  0x10   :  { %18 = vsyncpa [#allocation10], 0 }
  0x11   :  { %19 = vsyncpa [#allocation8], 0 }
  0x12   :  { %21 = vsyncpa [#allocation8 + $0x1], 0  ;;  %s5766_s26 = smov 0   ;;  %s5768_s0 = smov 0  }
  0x13   :  { %s5770_s27 = smov 0   ;;  %s5772_s28 = smov 0  }
  0x14 LB: > { %s5787_s29 = sadd.s32 4294967295, %s5716_s28   ;;  %s5199_s30 = sadd.s32 4294967294, %s5716_s28   ;;  %s5716_s28 = sphi %s5772_s28, %s6431_s28   ;;  %s5712_s27 = sphi %s5770_s27, %s6430_s27   ;;  %s5708_s0 = sphi %s5768_s0, %s6429_s0   ;;  %s5704_s26 = sphi %s5766_s26, %s6428_s26  }
  0x15   : > { %s5791_s7 = sadd.s32 1, %s5716_s28   ;;  %s118_s8 = sadd.s32 1, %s5712_s27 }
  0x16   : > { %s115_s9 = ssub.s32 %s5716_s28, %s5791_s7  ;;  %p128_p5 = scmp.ne.s32.totalorder %s5712_s27, %s5708_s0 }
  0x17   : > { %p116_p6 = scmp.eq.s32.totalorder %s115_s9, 0  ;;  %p129_p7 = scmp.eq.s32.totalorder %s5787_s29, 1 }
  0x18   : > { %p134_p8 = scmp.ne.s32.totalorder %s5708_s0, %s5704_s26  ;;  %p135_p9 = scmp.eq.s32.totalorder %s5199_s30, 1 }
  0x19   : > { %s5802_s10 = scalar_select %p116_p6, %s5712_s27, %s118_s8  }
  0x1a   : > { %p5804_p10 = por %p129_p7, %p128_p5  ;;  %p5808_p11 = por %p135_p9, %p134_p8 }
  0x1b   : > { %p5200_p12 = scmp.ge.s32.totalorder %s5716_s28, 1  ;;  %p142_p13 = scmp.lt.s32.totalorder %s5716_s28, 3 }
  0x1c   : > { %s6408_s11 = scalar_select %p5804_p10, 1, 0 }
  0x1d   : > { %s6409_s12 = scalar_select %p5808_p11, 1, 0 }
  0x1e   : > { %p6404_p0 = scmp.eq.s32.totalorder %s5787_s29, 0  ;;  %p5815_p1 = pnand %p5200_p12, %p142_p13 }
  0x1f   : > { %s5719_s14 = smov [#allocation6]   ;;  %s5720_s17 = smov [#allocation9]  }
  0x20   : > { %s6410_s13 = scalar_select %p5815_p1, 1, 0 }
  0x21   : > { %s154_s15 = sshll.u32 %s5719_s14, 4  ;;  %p5517_p2 = pneg %p5815_p1  ;;  %s155_s15 = int_to_ptr.vmem [resolvable:$true] %s154_s15 }
  0x22   : > { %s170_s18 = sshll.u32 %s5720_s17, 4  ;;  %s5586_s21 = scalar_lea.hbm %s6399_s2, 2048  ;;  %s5827_s18 = int_to_ptr.vmem [resolvable:$true] %s170_s18 }
  0x23   : > { %p5823_p3 = pnand %p6404_p0, %p5517_p2  ;;  %p5587_p4 = scmp.ne.s32.totalorder %s6399_s2, %s5586_s21 }
  0x24   : > { %p5593_p8 = scmp.lt.u32.totalorder %s5586_s21, %s6399_s2 }
  0x25   : > { %p5588_p5 = pneg %p5823_p3 }
  0x27   : > { %p5589_p6 = pnand %p5588_p5, %p5587_p4 }
  0x29   : > { %p5590_p7 = pneg %p5589_p6 }
  0x2b   : > { %p5595_p9 = pnand %p5593_p8, %p5590_p7 }
  0x2d   : > { %5598 = shalt.err (!%p5595_p9)
}
  0x2e   : > { %s5599_s30 = scalar_lea.vmem %s155_s15, 2048  ;;  %p5607_p0 = scmp.lt.s32.totalorder %s155_s15, %s155_s15 }
  0x2f   : > { %p5600_p12 = scmp.ne.s32.totalorder %s155_s15, %s5599_s30  ;;  %p5608_p11 = scmp.lt.s32.totalorder %s5599_s30, %s5599_s30 }
  0x31   : > { %p5602_p13 = pnand %p5600_p12, %p5588_p5  ;;  %p5609_p10 = por %p5608_p11, %p5607_p0 }
  0x33   : > { %p5603_p2 = pneg %p5602_p13 }
  0x35   : > { %p5610_p1 = pnand %p5609_p10, %p5603_p2 }
  0x37   : > { %5613 = shalt.err (!%p5610_p1)
}
  0x38   : > { %s5721_s8 = smov 128   ;;  %s5722_s9 = smov 8  }
  0x39   : > { %5520 = dma.hbm_to_vmem [thread:$0]  (!%p5823_p3), %s6399_s2, 2048, %s155_s15, [#allocation7], %s5721_s8, %s5721_s8, %s5722_s9  }
  0x3a   : > { %s5614_s21 = scalar_lea.hbm %s6401_s4, 2048 }
  0x3b   : > { %p5615_p4 = scmp.ne.s32.totalorder %s6401_s4, %s5614_s21  ;;  %p5621_p0 = scmp.lt.u32.totalorder %s5614_s21, %s6401_s4 }
  0x3d   : > { %p5617_p10 = pnand %p5615_p4, %p5588_p5 }
  0x3f   : > { %p5618_p11 = pneg %p5617_p10 }
  0x41   : > { %p5623_p1 = pnand %p5621_p0, %p5618_p11 }
  0x43   : > { %5626 = shalt.err (!%p5623_p1)
}
  0x44   : > { %s5627_s15 = scalar_lea.vmem %s5827_s18, 2048  ;;  %p5635_p9 = scmp.lt.s32.totalorder %s5827_s18, %s5827_s18 }
  0x45   : > { %p5628_p6 = scmp.ne.s32.totalorder %s5827_s18, %s5627_s15  ;;  %p5636_p12 = scmp.lt.s32.totalorder %s5627_s15, %s5627_s15 }
  0x47   : > { %p5630_p7 = pnand %p5628_p6, %p5588_p5  ;;  %p5637_p13 = por %p5636_p12, %p5635_p9 }
  0x49   : > { %p5631_p8 = pneg %p5630_p7 }
  0x4b   : > { %p5638_p2 = pnand %p5637_p13, %p5631_p8 }
  0x4d   : > { %5641 = shalt.err (!%p5638_p2)
}
  0x4e   : > { %5523 = dma.hbm_to_vmem [thread:$0]  (!%p5823_p3), %s6401_s4, 2048, %s5827_s18, [#allocation10], %s5721_s8, %s5721_s8, %s5722_s9  }
  0x4f   : > { %p6412_p4 = scmp.ne.s32.totalorder %s6410_s13, 0 }
  0x50   : > { %p6413_p10 = scmp.eq.s32.totalorder (!%p6412_p4), %s5787_s29, 0 }
  0x51   : > { %189 = sbr.rel (%p6412_p4) target bundleno = 1256 (0x4e8), region = 36 }
  0x58   : > { %5689 = dma.done.wait (%p6413_p10), [#allocation7], 2048   ;;  %p6414_p5 = pmov %p6413_p10 }
  0x5a   : > { %5691 = vsyncadd (%p6414_p5), [#allocation7], 4294965248  ;;  %p6415_p11 = pmov %p6414_p5 }
  0x5b   : > { %p6416_p0 = pmov %p6414_p5 }
  0x5c   : > { %5693 = dma.done.wait (%p6415_p11), [#allocation10], 2048  }
  0x5d   : > { %5695 = vsyncadd (%p6416_p0), [#allocation10], 4294965248  ;;  %s5887_s16 = sshll.u32 %s5787_s29, 6  ;;  %s6407_s13 = sand.u32 1, %s5708_s0  }
  0x5e   : > { %s215_s18 = sld [smem:[#allocation5 + %s5887_s16]]  ;;  %s5893_s8 = sshll.u32 %s6407_s13, 3 }
  0x5f   : > { %s213_s20 = scalar_lea.vmem [#allocation11], %s5893_s8 }
  0x64   : > { %s216_s19 = scalar_lea.vmem %s6398_s1, %s215_s18 }
  0x65   : > { %v234_v0 = vld [vmem:[%s216_s19] sm:$0x1] }
  0x66   : > { %235 = vst [vmem:[#allocation2] sm:$0x1] %v234_v0 }
  0x67   : > { %260 = vsyncadd [#allocation3], 16  ;;  %s261_s21 = sadd.s32 1, %s5887_s16 }
  0x68   : > { %s262_s22 = sld [smem:[#allocation5 + %s261_s21]] }
  0x6e   : > { %s263_s25 = scalar_lea.vmem %s6398_s1, %s262_s22 }
  0x6f   : > { %v282_v1 = vld [vmem:[%s263_s25] sm:$0x1] }
  0x70   : > { %283 = vst [vmem:[#allocation2 + $0x1] sm:$0x1] %v282_v1 }
  0x71   : > { %308 = vsyncadd [#allocation3], 16  ;;  %s309_s15 = sadd.s32 2, %s5887_s16 }
  0x72   : > { %s310_s30 = sld [smem:[#allocation5 + %s309_s15]] }
  0x78   : > { %s311_s18 = scalar_lea.vmem %s6398_s1, %s310_s30 }
  0x79   : > { %v330_v2 = vld [vmem:[%s311_s18] sm:$0x1] }
  0x7a   : > { %331 = vst [vmem:[#allocation2 + $0x2] sm:$0x1] %v330_v2 }
  0x7b   : > { %356 = vsyncadd [#allocation3], 16  ;;  %s357_s17 = sadd.s32 3, %s5887_s16 }
  0x7c   : > { %s358_s19 = sld [smem:[#allocation5 + %s357_s17]] }
  0x82   : > { %s359_s22 = scalar_lea.vmem %s6398_s1, %s358_s19 }
  0x83   : > { %v378_v3 = vld [vmem:[%s359_s22] sm:$0x1] }
  0x84   : > { %379 = vst [vmem:[#allocation2 + $0x3] sm:$0x1] %v378_v3 }
  0x85   : > { %404 = vsyncadd [#allocation3], 16  ;;  %s405_s23 = sadd.s32 4, %s5887_s16 }
  0x86   : > { %s406_s24 = sld [smem:[#allocation5 + %s405_s23]] }
  0x8c   : > { %s407_s30 = scalar_lea.vmem %s6398_s1, %s406_s24 }
  0x8d   : > { %v426_v4 = vld [vmem:[%s407_s30] sm:$0x1] }
  0x8e   : > { %427 = vst [vmem:[#allocation2 + $0x4] sm:$0x1] %v426_v4 }
  0x8f   : > { %452 = vsyncadd [#allocation3], 16  ;;  %s453_s14 = sadd.s32 5, %s5887_s16 }
  0x90   : > { %s454_s9 = sld [smem:[#allocation5 + %s453_s14]] }
  0x96   : > { %s455_s13 = scalar_lea.vmem %s6398_s1, %s454_s9 }
  0x97   : > { %v474_v5 = vld [vmem:[%s455_s13] sm:$0x1] }
  0x98   : > { %475 = vst [vmem:[#allocation2 + $0x5] sm:$0x1] %v474_v5 }
  0x99   : > { %500 = vsyncadd [#allocation3], 16  ;;  %s501_s19 = sadd.s32 6, %s5887_s16 }
  0x9a   : > { %s502_s21 = sld [smem:[#allocation5 + %s501_s19]] }
  0xa0   : > { %s503_s24 = scalar_lea.vmem %s6398_s1, %s502_s21 }
  0xa1   : > { %v522_v6 = vld [vmem:[%s503_s24] sm:$0x1] }
  0xa2   : > { %523 = vst [vmem:[#allocation2 + $0x6] sm:$0x1] %v522_v6 }
  0xa3   : > { %548 = vsyncadd [#allocation3], 16  ;;  %s549_s25 = sadd.s32 7, %s5887_s16 }
  0xa4   : > { %s550_s15 = sld [smem:[#allocation5 + %s549_s25]] }
  0xaa   : > { %s551_s9 = scalar_lea.vmem %s6398_s1, %s550_s15 }
  0xab   : > { %v570_v7 = vld [vmem:[%s551_s9] sm:$0x1] }
  0xac   : > { %571 = vst [vmem:[#allocation2 + $0x7] sm:$0x1] %v570_v7 }
  0xad   : > { %596 = vsyncadd [#allocation3], 16  ;;  %s597_s18 = sadd.s32 8, %s5887_s16 }
  0xae   : > { %s598_s17 = sld [smem:[#allocation5 + %s597_s18]] }
  0xb4   : > { %s599_s21 = scalar_lea.vmem %s6398_s1, %s598_s17 }
  0xb5   : > { %v618_v8 = vld [vmem:[%s599_s21] sm:$0x1] }
  0xb6   : > { %619 = vst [vmem:[#allocation2 + $0x8] sm:$0x1] %v618_v8 }
  0xb7   : > { %644 = vsyncadd [#allocation3], 16  ;;  %s645_s22 = sadd.s32 9, %s5887_s16 }
  0xb8   : > { %s646_s23 = sld [smem:[#allocation5 + %s645_s22]] }
  0xbe   : > { %s647_s15 = scalar_lea.vmem %s6398_s1, %s646_s23 }
  0xbf   : > { %v666_v9 = vld [vmem:[%s647_s15] sm:$0x1] }
  0xc0   : > { %667 = vst [vmem:[#allocation2 + $0x9] sm:$0x1] %v666_v9 }
  0xc1   : > { %692 = vsyncadd [#allocation3], 16  ;;  %s693_s30 = sadd.s32 10, %s5887_s16 }
  0xc2   : > { %s694_s14 = sld [smem:[#allocation5 + %s693_s30]] }
  0xc8   : > { %s695_s17 = scalar_lea.vmem %s6398_s1, %s694_s14 }
  0xc9   : > { %v714_v10 = vld [vmem:[%s695_s17] sm:$0x1] }
  0xca   : > { %715 = vst [vmem:[#allocation2 + $0xa] sm:$0x1] %v714_v10 }
  0xcb   : > { %740 = vsyncadd [#allocation3], 16  ;;  %s741_s13 = sadd.s32 11, %s5887_s16 }
  0xcc   : > { %s742_s19 = sld [smem:[#allocation5 + %s741_s13]] }
  0xd2   : > { %s743_s23 = scalar_lea.vmem %s6398_s1, %s742_s19 }
  0xd3   : > { %v762_v11 = vld [vmem:[%s743_s23] sm:$0x1] }
  0xd4   : > { %763 = vst [vmem:[#allocation2 + $0xb] sm:$0x1] %v762_v11 }
  0xd5   : > { %788 = vsyncadd [#allocation3], 16  ;;  %s789_s24 = sadd.s32 12, %s5887_s16 }
  0xd6   : > { %s790_s25 = sld [smem:[#allocation5 + %s789_s24]] }
  0xdc   : > { %s791_s14 = scalar_lea.vmem %s6398_s1, %s790_s25 }
  0xdd   : > { %v810_v12 = vld [vmem:[%s791_s14] sm:$0x1] }
  0xde   : > { %811 = vst [vmem:[#allocation2 + $0xc] sm:$0x1] %v810_v12 }
  0xdf   : > { %836 = vsyncadd [#allocation3], 16  ;;  %s837_s9 = sadd.s32 13, %s5887_s16 }
  0xe0   : > { %s838_s18 = sld [smem:[#allocation5 + %s837_s9]] }
  0xe6   : > { %s839_s19 = scalar_lea.vmem %s6398_s1, %s838_s18 }
  0xe7   : > { %v858_v13 = vld [vmem:[%s839_s19] sm:$0x1] }
  0xe8   : > { %859 = vst [vmem:[#allocation2 + $0xd] sm:$0x1] %v858_v13 }
  0xe9   : > { %884 = vsyncadd [#allocation3], 16  ;;  %s885_s21 = sadd.s32 14, %s5887_s16 }
  0xea   : > { %s886_s22 = sld [smem:[#allocation5 + %s885_s21]] }
  0xf0   : > { %s887_s25 = scalar_lea.vmem %s6398_s1, %s886_s22 }
  0xf1   : > { %v906_v14 = vld [vmem:[%s887_s25] sm:$0x1] }
  0xf2   : > { %907 = vst [vmem:[#allocation2 + $0xe] sm:$0x1] %v906_v14 }
  0xf3   : > { %932 = vsyncadd [#allocation3], 16  ;;  %s933_s15 = sadd.s32 15, %s5887_s16 }
  0xf4   : > { %s934_s30 = sld [smem:[#allocation5 + %s933_s15]] }
  0xfa   : > { %s935_s18 = scalar_lea.vmem %s6398_s1, %s934_s30 }
  0xfb   : > { %v954_v15 = vld [vmem:[%s935_s18] sm:$0x1] }
  0xfc   : > { %955 = vst [vmem:[#allocation2 + $0xf] sm:$0x1] %v954_v15 }
  0xfd   : > { %980 = vsyncadd [#allocation3], 16  ;;  %s981_s17 = sadd.s32 16, %s5887_s16 }
  0xfe   : > { %s982_s13 = sld [smem:[#allocation5 + %s981_s17]] }
 0x104   : > { %s983_s22 = scalar_lea.vmem %s6398_s1, %s982_s13 }
 0x105   : > { %v1002_v16 = vld [vmem:[%s983_s22] sm:$0x1] }
 0x106   : > { %1003 = vst [vmem:[#allocation2 + $0x10] sm:$0x1] %v1002_v16 }
 0x107   : > { %1028 = vsyncadd [#allocation3], 16  ;;  %s1029_s23 = sadd.s32 17, %s5887_s16 }
 0x108   : > { %s1030_s24 = sld [smem:[#allocation5 + %s1029_s23]] }
 0x10e   : > { %s1031_s30 = scalar_lea.vmem %s6398_s1, %s1030_s24 }
 0x10f   : > { %v1050_v17 = vld [vmem:[%s1031_s30] sm:$0x1] }
 0x110   : > { %1051 = vst [vmem:[#allocation2 + $0x11] sm:$0x1] %v1050_v17 }
 0x111   : > { %1076 = vsyncadd [#allocation3], 16  ;;  %s1077_s14 = sadd.s32 18, %s5887_s16 }
 0x112   : > { %s1078_s9 = sld [smem:[#allocation5 + %s1077_s14]] }
 0x118   : > { %s1079_s13 = scalar_lea.vmem %s6398_s1, %s1078_s9 }
 0x119   : > { %v1098_v18 = vld [vmem:[%s1079_s13] sm:$0x1] }
 0x11a   : > { %1099 = vst [vmem:[#allocation2 + $0x12] sm:$0x1] %v1098_v18 }
 0x11b   : > { %1124 = vsyncadd [#allocation3], 16  ;;  %s1125_s19 = sadd.s32 19, %s5887_s16 }
 0x11c   : > { %s1126_s21 = sld [smem:[#allocation5 + %s1125_s19]] }
 0x122   : > { %s1127_s24 = scalar_lea.vmem %s6398_s1, %s1126_s21 }
 0x123   : > { %v1146_v19 = vld [vmem:[%s1127_s24] sm:$0x1] }
 0x124   : > { %1147 = vst [vmem:[#allocation2 + $0x13] sm:$0x1] %v1146_v19 }
 0x125   : > { %1172 = vsyncadd [#allocation3], 16  ;;  %s1173_s25 = sadd.s32 20, %s5887_s16 }
 0x126   : > { %s1174_s15 = sld [smem:[#allocation5 + %s1173_s25]] }
 0x12c   : > { %s1175_s9 = scalar_lea.vmem %s6398_s1, %s1174_s15 }
 0x12d   : > { %v1194_v20 = vld [vmem:[%s1175_s9] sm:$0x1] }
 0x12e   : > { %1195 = vst [vmem:[#allocation2 + $0x14] sm:$0x1] %v1194_v20 }
 0x12f   : > { %1220 = vsyncadd [#allocation3], 16  ;;  %s1221_s18 = sadd.s32 21, %s5887_s16 }
 0x130   : > { %s1222_s17 = sld [smem:[#allocation5 + %s1221_s18]] }
 0x136   : > { %s1223_s21 = scalar_lea.vmem %s6398_s1, %s1222_s17 }
 0x137   : > { %v1242_v21 = vld [vmem:[%s1223_s21] sm:$0x1] }
 0x138   : > { %1243 = vst [vmem:[#allocation2 + $0x15] sm:$0x1] %v1242_v21 }
 0x139   : > { %1268 = vsyncadd [#allocation3], 16  ;;  %s1269_s22 = sadd.s32 22, %s5887_s16 }
 0x13a   : > { %s1270_s23 = sld [smem:[#allocation5 + %s1269_s22]] }
 0x140   : > { %s1271_s15 = scalar_lea.vmem %s6398_s1, %s1270_s23 }
 0x141   : > { %v1290_v22 = vld [vmem:[%s1271_s15] sm:$0x1] }
 0x142   : > { %1291 = vst [vmem:[#allocation2 + $0x16] sm:$0x1] %v1290_v22 }
 0x143   : > { %1316 = vsyncadd [#allocation3], 16  ;;  %s1317_s30 = sadd.s32 23, %s5887_s16 }
 0x144   : > { %s1318_s14 = sld [smem:[#allocation5 + %s1317_s30]] }
 0x14a   : > { %s1319_s17 = scalar_lea.vmem %s6398_s1, %s1318_s14 }
 0x14b   : > { %v1338_v23 = vld [vmem:[%s1319_s17] sm:$0x1] }
 0x14c   : > { %1339 = vst [vmem:[#allocation2 + $0x17] sm:$0x1] %v1338_v23 }
 0x14d   : > { %1364 = vsyncadd [#allocation3], 16  ;;  %s1365_s13 = sadd.s32 24, %s5887_s16 }
 0x14e   : > { %s1366_s19 = sld [smem:[#allocation5 + %s1365_s13]] }
 0x154   : > { %s1367_s23 = scalar_lea.vmem %s6398_s1, %s1366_s19 }
 0x155   : > { %v1386_v24 = vld [vmem:[%s1367_s23] sm:$0x1] }
 0x156   : > { %1387 = vst [vmem:[#allocation2 + $0x18] sm:$0x1] %v1386_v24 }
 0x157   : > { %1412 = vsyncadd [#allocation3], 16  ;;  %s1413_s24 = sadd.s32 25, %s5887_s16 }
 0x158   : > { %s1414_s25 = sld [smem:[#allocation5 + %s1413_s24]] }
 0x15e   : > { %s1415_s14 = scalar_lea.vmem %s6398_s1, %s1414_s25 }
 0x15f   : > { %v1434_v25 = vld [vmem:[%s1415_s14] sm:$0x1] }
 0x160   : > { %1435 = vst [vmem:[#allocation2 + $0x19] sm:$0x1] %v1434_v25 }
 0x161   : > { %1460 = vsyncadd [#allocation3], 16  ;;  %s1461_s9 = sadd.s32 26, %s5887_s16 }
 0x162   : > { %s1462_s18 = sld [smem:[#allocation5 + %s1461_s9]] }
 0x168   : > { %s1463_s19 = scalar_lea.vmem %s6398_s1, %s1462_s18 }
 0x169   : > { %v1482_v26 = vld [vmem:[%s1463_s19] sm:$0x1] }
 0x16a   : > { %1483 = vst [vmem:[#allocation2 + $0x1a] sm:$0x1] %v1482_v26 }
 0x16b   : > { %1508 = vsyncadd [#allocation3], 16  ;;  %s1509_s21 = sadd.s32 27, %s5887_s16 }
 0x16c   : > { %s1510_s22 = sld [smem:[#allocation5 + %s1509_s21]] }
 0x172   : > { %s1511_s25 = scalar_lea.vmem %s6398_s1, %s1510_s22 }
 0x173   : > { %v1530_v27 = vld [vmem:[%s1511_s25] sm:$0x1] }
 0x174   : > { %1531 = vst [vmem:[#allocation2 + $0x1b] sm:$0x1] %v1530_v27 }
 0x175   : > { %1556 = vsyncadd [#allocation3], 16  ;;  %s1557_s15 = sadd.s32 28, %s5887_s16 }
 0x176   : > { %s1558_s30 = sld [smem:[#allocation5 + %s1557_s15]] }
 0x17c   : > { %s1559_s18 = scalar_lea.vmem %s6398_s1, %s1558_s30 }
 0x17d   : > { %v1578_v28 = vld [vmem:[%s1559_s18] sm:$0x1] }
 0x17e   : > { %1579 = vst [vmem:[#allocation2 + $0x1c] sm:$0x1] %v1578_v28 }
 0x17f   : > { %1604 = vsyncadd [#allocation3], 16  ;;  %s1605_s17 = sadd.s32 29, %s5887_s16 }
 0x180   : > { %s1606_s13 = sld [smem:[#allocation5 + %s1605_s17]] }
 0x186   : > { %s1607_s22 = scalar_lea.vmem %s6398_s1, %s1606_s13 }
 0x187   : > { %v1626_v29 = vld [vmem:[%s1607_s22] sm:$0x1] }
 0x188   : > { %1627 = vst [vmem:[#allocation2 + $0x1d] sm:$0x1] %v1626_v29 }
 0x189   : > { %1652 = vsyncadd [#allocation3], 16  ;;  %s1653_s23 = sadd.s32 30, %s5887_s16 }
 0x18a   : > { %s1654_s24 = sld [smem:[#allocation5 + %s1653_s23]] }
 0x190   : > { %s1655_s30 = scalar_lea.vmem %s6398_s1, %s1654_s24 }
 0x191   : > { %v1674_v30 = vld [vmem:[%s1655_s30] sm:$0x1] }
 0x192   : > { %1675 = vst [vmem:[#allocation2 + $0x1e] sm:$0x1] %v1674_v30 }
 0x193   : > { %1700 = vsyncadd [#allocation3], 16  ;;  %s1701_s14 = sadd.s32 31, %s5887_s16 }
 0x194   : > { %s1702_s9 = sld [smem:[#allocation5 + %s1701_s14]] }
 0x19a   : > { %s1703_s13 = scalar_lea.vmem %s6398_s1, %s1702_s9 }
 0x19b   : > { %v1722_v31 = vld [vmem:[%s1703_s13] sm:$0x1] }
 0x19c   : > { %1723 = vst [vmem:[#allocation2 + $0x1f] sm:$0x1] %v1722_v31 }
 0x19d   : > { %1748 = vsyncadd [#allocation3], 16  ;;  %s1749_s19 = sadd.s32 32, %s5887_s16 }
 0x19e   : > { %s1750_s21 = sld [smem:[#allocation5 + %s1749_s19]] }
 0x1a4   : > { %s1751_s24 = scalar_lea.vmem %s6398_s1, %s1750_s21 }
 0x1a5   : > { %v1770_v32 = vld [vmem:[%s1751_s24] sm:$0x1] }
 0x1a6   : > { %1771 = vst [vmem:[#allocation2 + $0x20] sm:$0x1] %v1770_v32 }
 0x1a7   : > { %1796 = vsyncadd [#allocation3], 16  ;;  %s1797_s25 = sadd.s32 33, %s5887_s16 }
 0x1a8   : > { %s1798_s15 = sld [smem:[#allocation5 + %s1797_s25]] }
 0x1ae   : > { %s1799_s9 = scalar_lea.vmem %s6398_s1, %s1798_s15 }
 0x1af   : > { %v1818_v33 = vld [vmem:[%s1799_s9] sm:$0x1] }
 0x1b0   : > { %1819 = vst [vmem:[#allocation2 + $0x21] sm:$0x1] %v1818_v33 }
 0x1b1   : > { %1844 = vsyncadd [#allocation3], 16  ;;  %s1845_s18 = sadd.s32 34, %s5887_s16 }
 0x1b2   : > { %s1846_s17 = sld [smem:[#allocation5 + %s1845_s18]] }
 0x1b8   : > { %s1847_s21 = scalar_lea.vmem %s6398_s1, %s1846_s17 }
 0x1b9   : > { %v1866_v34 = vld [vmem:[%s1847_s21] sm:$0x1] }
 0x1ba   : > { %1867 = vst [vmem:[#allocation2 + $0x22] sm:$0x1] %v1866_v34 }
 0x1bb   : > { %1892 = vsyncadd [#allocation3], 16  ;;  %s1893_s22 = sadd.s32 35, %s5887_s16 }
 0x1bc   : > { %s1894_s23 = sld [smem:[#allocation5 + %s1893_s22]] }
 0x1c2   : > { %s1895_s15 = scalar_lea.vmem %s6398_s1, %s1894_s23 }
 0x1c3   : > { %v1914_v35 = vld [vmem:[%s1895_s15] sm:$0x1] }
 0x1c4   : > { %1915 = vst [vmem:[#allocation2 + $0x23] sm:$0x1] %v1914_v35 }
 0x1c5   : > { %1940 = vsyncadd [#allocation3], 16  ;;  %s1941_s30 = sadd.s32 36, %s5887_s16 }
 0x1c6   : > { %s1942_s14 = sld [smem:[#allocation5 + %s1941_s30]] }
 0x1cc   : > { %s1943_s17 = scalar_lea.vmem %s6398_s1, %s1942_s14 }
 0x1cd   : > { %v1962_v36 = vld [vmem:[%s1943_s17] sm:$0x1] }
 0x1ce   : > { %1963 = vst [vmem:[#allocation2 + $0x24] sm:$0x1] %v1962_v36 }
 0x1cf   : > { %1988 = vsyncadd [#allocation3], 16  ;;  %s1989_s13 = sadd.s32 37, %s5887_s16 }
 0x1d0   : > { %s1990_s19 = sld [smem:[#allocation5 + %s1989_s13]] }
 0x1d6   : > { %s1991_s23 = scalar_lea.vmem %s6398_s1, %s1990_s19 }
 0x1d7   : > { %v2010_v37 = vld [vmem:[%s1991_s23] sm:$0x1] }
 0x1d8   : > { %2011 = vst [vmem:[#allocation2 + $0x25] sm:$0x1] %v2010_v37 }
 0x1d9   : > { %2036 = vsyncadd [#allocation3], 16  ;;  %s2037_s24 = sadd.s32 38, %s5887_s16 }
 0x1da   : > { %s2038_s25 = sld [smem:[#allocation5 + %s2037_s24]] }
 0x1e0   : > { %s2039_s14 = scalar_lea.vmem %s6398_s1, %s2038_s25 }
 0x1e1   : > { %v2058_v38 = vld [vmem:[%s2039_s14] sm:$0x1] }
 0x1e2   : > { %2059 = vst [vmem:[#allocation2 + $0x26] sm:$0x1] %v2058_v38 }
 0x1e3   : > { %2084 = vsyncadd [#allocation3], 16  ;;  %s2085_s9 = sadd.s32 39, %s5887_s16 }
 0x1e4   : > { %s2086_s18 = sld [smem:[#allocation5 + %s2085_s9]] }
 0x1ea   : > { %s2087_s19 = scalar_lea.vmem %s6398_s1, %s2086_s18 }
 0x1eb   : > { %v2106_v39 = vld [vmem:[%s2087_s19] sm:$0x1] }
 0x1ec   : > { %2107 = vst [vmem:[#allocation2 + $0x27] sm:$0x1] %v2106_v39 }
 0x1ed   : > { %2132 = vsyncadd [#allocation3], 16  ;;  %s2133_s21 = sadd.s32 40, %s5887_s16 }
 0x1ee   : > { %s2134_s22 = sld [smem:[#allocation5 + %s2133_s21]] }
 0x1f4   : > { %s2135_s25 = scalar_lea.vmem %s6398_s1, %s2134_s22 }
 0x1f5   : > { %v2154_v40 = vld [vmem:[%s2135_s25] sm:$0x1] }
 0x1f6   : > { %2155 = vst [vmem:[#allocation2 + $0x28] sm:$0x1] %v2154_v40 }
 0x1f7   : > { %2180 = vsyncadd [#allocation3], 16  ;;  %s2181_s15 = sadd.s32 41, %s5887_s16 }
 0x1f8   : > { %s2182_s30 = sld [smem:[#allocation5 + %s2181_s15]] }
 0x1fe   : > { %s2183_s18 = scalar_lea.vmem %s6398_s1, %s2182_s30 }
 0x1ff   : > { %v2202_v41 = vld [vmem:[%s2183_s18] sm:$0x1] }
 0x200   : > { %2203 = vst [vmem:[#allocation2 + $0x29] sm:$0x1] %v2202_v41 }
 0x201   : > { %2228 = vsyncadd [#allocation3], 16  ;;  %s2229_s17 = sadd.s32 42, %s5887_s16 }
 0x202   : > { %s2230_s13 = sld [smem:[#allocation5 + %s2229_s17]] }
 0x208   : > { %s2231_s22 = scalar_lea.vmem %s6398_s1, %s2230_s13 }
 0x209   : > { %v2250_v42 = vld [vmem:[%s2231_s22] sm:$0x1] }
 0x20a   : > { %2251 = vst [vmem:[#allocation2 + $0x2a] sm:$0x1] %v2250_v42 }
 0x20b   : > { %2276 = vsyncadd [#allocation3], 16  ;;  %s2277_s23 = sadd.s32 43, %s5887_s16 }
 0x20c   : > { %s2278_s24 = sld [smem:[#allocation5 + %s2277_s23]] }
 0x212   : > { %s2279_s30 = scalar_lea.vmem %s6398_s1, %s2278_s24 }
 0x213   : > { %v2298_v43 = vld [vmem:[%s2279_s30] sm:$0x1] }
 0x214   : > { %2299 = vst [vmem:[#allocation2 + $0x2b] sm:$0x1] %v2298_v43 }
 0x215   : > { %2324 = vsyncadd [#allocation3], 16  ;;  %s2325_s14 = sadd.s32 44, %s5887_s16 }
 0x216   : > { %s2326_s9 = sld [smem:[#allocation5 + %s2325_s14]] }
 0x21c   : > { %s2327_s13 = scalar_lea.vmem %s6398_s1, %s2326_s9 }
 0x21d   : > { %v2346_v44 = vld [vmem:[%s2327_s13] sm:$0x1] }
 0x21e   : > { %2347 = vst [vmem:[#allocation2 + $0x2c] sm:$0x1] %v2346_v44 }
 0x21f   : > { %2372 = vsyncadd [#allocation3], 16  ;;  %s2373_s19 = sadd.s32 45, %s5887_s16 }
 0x220   : > { %s2374_s21 = sld [smem:[#allocation5 + %s2373_s19]] }
 0x226   : > { %s2375_s24 = scalar_lea.vmem %s6398_s1, %s2374_s21 }
 0x227   : > { %v2394_v45 = vld [vmem:[%s2375_s24] sm:$0x1] }
 0x228   : > { %2395 = vst [vmem:[#allocation2 + $0x2d] sm:$0x1] %v2394_v45 }
 0x229   : > { %2420 = vsyncadd [#allocation3], 16  ;;  %s2421_s25 = sadd.s32 46, %s5887_s16 }
 0x22a   : > { %s2422_s15 = sld [smem:[#allocation5 + %s2421_s25]] }
 0x230   : > { %s2423_s9 = scalar_lea.vmem %s6398_s1, %s2422_s15 }
 0x231   : > { %v2442_v46 = vld [vmem:[%s2423_s9] sm:$0x1] }
 0x232   : > { %2443 = vst [vmem:[#allocation2 + $0x2e] sm:$0x1] %v2442_v46 }
 0x233   : > { %2468 = vsyncadd [#allocation3], 16  ;;  %s2469_s18 = sadd.s32 47, %s5887_s16 }
 0x234   : > { %s2470_s17 = sld [smem:[#allocation5 + %s2469_s18]] }
 0x23a   : > { %s2471_s21 = scalar_lea.vmem %s6398_s1, %s2470_s17 }
 0x23b   : > { %v2490_v47 = vld [vmem:[%s2471_s21] sm:$0x1] }
 0x23c   : > { %2491 = vst [vmem:[#allocation2 + $0x2f] sm:$0x1] %v2490_v47 }
 0x23d   : > { %2516 = vsyncadd [#allocation3], 16  ;;  %s2517_s22 = sadd.s32 48, %s5887_s16 }
 0x23e   : > { %s2518_s23 = sld [smem:[#allocation5 + %s2517_s22]] }
 0x244   : > { %s2519_s15 = scalar_lea.vmem %s6398_s1, %s2518_s23 }
 0x245   : > { %v2538_v48 = vld [vmem:[%s2519_s15] sm:$0x1] }
 0x246   : > { %2539 = vst [vmem:[#allocation2 + $0x30] sm:$0x1] %v2538_v48 }
 0x247   : > { %2564 = vsyncadd [#allocation3], 16  ;;  %s2565_s30 = sadd.s32 49, %s5887_s16 }
 0x248   : > { %s2566_s14 = sld [smem:[#allocation5 + %s2565_s30]] }
 0x24e   : > { %s2567_s17 = scalar_lea.vmem %s6398_s1, %s2566_s14 }
 0x24f   : > { %v2586_v49 = vld [vmem:[%s2567_s17] sm:$0x1] }
 0x250   : > { %2587 = vst [vmem:[#allocation2 + $0x31] sm:$0x1] %v2586_v49 }
 0x251   : > { %2612 = vsyncadd [#allocation3], 16  ;;  %s2613_s13 = sadd.s32 50, %s5887_s16 }
 0x252   : > { %s2614_s19 = sld [smem:[#allocation5 + %s2613_s13]] }
 0x258   : > { %s2615_s23 = scalar_lea.vmem %s6398_s1, %s2614_s19 }
 0x259   : > { %v2634_v50 = vld [vmem:[%s2615_s23] sm:$0x1] }
 0x25a   : > { %2635 = vst [vmem:[#allocation2 + $0x32] sm:$0x1] %v2634_v50 }
 0x25b   : > { %2660 = vsyncadd [#allocation3], 16  ;;  %s2661_s24 = sadd.s32 51, %s5887_s16 }
 0x25c   : > { %s2662_s25 = sld [smem:[#allocation5 + %s2661_s24]] }
 0x262   : > { %s2663_s14 = scalar_lea.vmem %s6398_s1, %s2662_s25 }
 0x263   : > { %v2682_v51 = vld [vmem:[%s2663_s14] sm:$0x1] }
 0x264   : > { %2683 = vst [vmem:[#allocation2 + $0x33] sm:$0x1] %v2682_v51 }
 0x265   : > { %2708 = vsyncadd [#allocation3], 16  ;;  %s2709_s9 = sadd.s32 52, %s5887_s16 }
 0x266   : > { %s2710_s18 = sld [smem:[#allocation5 + %s2709_s9]] }
 0x26c   : > { %s2711_s19 = scalar_lea.vmem %s6398_s1, %s2710_s18 }
 0x26d   : > { %v2730_v52 = vld [vmem:[%s2711_s19] sm:$0x1] }
 0x26e   : > { %2731 = vst [vmem:[#allocation2 + $0x34] sm:$0x1] %v2730_v52 }
 0x26f   : > { %2756 = vsyncadd [#allocation3], 16  ;;  %s2757_s21 = sadd.s32 53, %s5887_s16 }
 0x270   : > { %s2758_s22 = sld [smem:[#allocation5 + %s2757_s21]] }
 0x276   : > { %s2759_s25 = scalar_lea.vmem %s6398_s1, %s2758_s22 }
 0x277   : > { %v2778_v53 = vld [vmem:[%s2759_s25] sm:$0x1] }
 0x278   : > { %2779 = vst [vmem:[#allocation2 + $0x35] sm:$0x1] %v2778_v53 }
 0x279   : > { %2804 = vsyncadd [#allocation3], 16  ;;  %s2805_s15 = sadd.s32 54, %s5887_s16 }
 0x27a   : > { %s2806_s30 = sld [smem:[#allocation5 + %s2805_s15]] }
 0x280   : > { %s2807_s18 = scalar_lea.vmem %s6398_s1, %s2806_s30 }
 0x281   : > { %v2826_v54 = vld [vmem:[%s2807_s18] sm:$0x1] }
 0x282   : > { %2827 = vst [vmem:[#allocation2 + $0x36] sm:$0x1] %v2826_v54 }
 0x283   : > { %2852 = vsyncadd [#allocation3], 16  ;;  %s2853_s17 = sadd.s32 55, %s5887_s16 }
 0x284   : > { %s2854_s13 = sld [smem:[#allocation5 + %s2853_s17]] }
 0x28a   : > { %s2855_s22 = scalar_lea.vmem %s6398_s1, %s2854_s13 }
 0x28b   : > { %v2874_v55 = vld [vmem:[%s2855_s22] sm:$0x1] }
 0x28c   : > { %2875 = vst [vmem:[#allocation2 + $0x37] sm:$0x1] %v2874_v55 }
 0x28d   : > { %2900 = vsyncadd [#allocation3], 16  ;;  %s2901_s23 = sadd.s32 56, %s5887_s16 }
 0x28e   : > { %s2902_s24 = sld [smem:[#allocation5 + %s2901_s23]] }
 0x294   : > { %s2903_s30 = scalar_lea.vmem %s6398_s1, %s2902_s24 }
 0x295   : > { %v2922_v56 = vld [vmem:[%s2903_s30] sm:$0x1] }
 0x296   : > { %2923 = vst [vmem:[#allocation2 + $0x38] sm:$0x1] %v2922_v56 }
 0x297   : > { %2948 = vsyncadd [#allocation3], 16  ;;  %s2949_s14 = sadd.s32 57, %s5887_s16 }
 0x298   : > { %s2950_s9 = sld [smem:[#allocation5 + %s2949_s14]] }
 0x29e   : > { %s2951_s13 = scalar_lea.vmem %s6398_s1, %s2950_s9 }
 0x29f   : > { %v2970_v57 = vld [vmem:[%s2951_s13] sm:$0x1] }
 0x2a0   : > { %2971 = vst [vmem:[#allocation2 + $0x39] sm:$0x1] %v2970_v57 }
 0x2a1   : > { %2996 = vsyncadd [#allocation3], 16  ;;  %s2997_s19 = sadd.s32 58, %s5887_s16 }
 0x2a2   : > { %s2998_s21 = sld [smem:[#allocation5 + %s2997_s19]] }
 0x2a8   : > { %s2999_s24 = scalar_lea.vmem %s6398_s1, %s2998_s21 }
 0x2a9   : > { %v3018_v58 = vld [vmem:[%s2999_s24] sm:$0x1] }
 0x2aa   : > { %3019 = vst [vmem:[#allocation2 + $0x3a] sm:$0x1] %v3018_v58 }
 0x2ab   : > { %3044 = vsyncadd [#allocation3], 16  ;;  %s3045_s25 = sadd.s32 59, %s5887_s16 }
 0x2ac   : > { %s3046_s15 = sld [smem:[#allocation5 + %s3045_s25]] }
 0x2b2   : > { %s3047_s9 = scalar_lea.vmem %s6398_s1, %s3046_s15 }
 0x2b3   : > { %v3066_v59 = vld [vmem:[%s3047_s9] sm:$0x1] }
 0x2b4   : > { %3067 = vst [vmem:[#allocation2 + $0x3b] sm:$0x1] %v3066_v59 }
 0x2b5   : > { %3092 = vsyncadd [#allocation3], 16  ;;  %s3093_s18 = sadd.s32 60, %s5887_s16 }
 0x2b6   : > { %s3094_s17 = sld [smem:[#allocation5 + %s3093_s18]] }
 0x2bc   : > { %s3095_s21 = scalar_lea.vmem %s6398_s1, %s3094_s17 }
 0x2bd   : > { %v3114_v60 = vld [vmem:[%s3095_s21] sm:$0x1] }
 0x2be   : > { %3115 = vst [vmem:[#allocation2 + $0x3c] sm:$0x1] %v3114_v60 }
 0x2bf   : > { %3140 = vsyncadd [#allocation3], 16  ;;  %s3141_s22 = sadd.s32 61, %s5887_s16 }
 0x2c0   : > { %s3142_s23 = sld [smem:[#allocation5 + %s3141_s22]] }
 0x2c6   : > { %s3143_s15 = scalar_lea.vmem %s6398_s1, %s3142_s23 }
 0x2c7   : > { %v3162_v61 = vld [vmem:[%s3143_s15] sm:$0x1] }
 0x2c8   : > { %3163 = vst [vmem:[#allocation2 + $0x3d] sm:$0x1] %v3162_v61 }
 0x2c9   : > { %3188 = vsyncadd [#allocation3], 16  ;;  %s3189_s30 = sadd.s32 62, %s5887_s16 }
 0x2ca   : > { %s3190_s14 = sld [smem:[#allocation5 + %s3189_s30]] }
 0x2d0   : > { %s3191_s17 = scalar_lea.vmem %s6398_s1, %s3190_s14 }
 0x2d1   : > { %v3210_v62 = vld [vmem:[%s3191_s17] sm:$0x1] }
 0x2d2   : > { %3211 = vst [vmem:[#allocation2 + $0x3e] sm:$0x1] %v3210_v62 }
 0x2d3   : > { %3236 = vsyncadd [#allocation3], 16  ;;  %s3237_s13 = sadd.s32 63, %s5887_s16 }
 0x2d4   : > { %s3238_s19 = sld [smem:[#allocation5 + %s3237_s13]] }
 0x2da   : > { %s3239_s23 = scalar_lea.vmem %s6398_s1, %s3238_s19 }
 0x2db   : > { %v3258_v63 = vld [vmem:[%s3239_s23] sm:$0x1] }
 0x2dc   : > { %3259 = vst [vmem:[#allocation2 + $0x3f] sm:$0x1] %v3258_v63 }
 0x2dd   : > { %3284 = vsyncadd [#allocation3], 16 }
 0x2de   : > { %5696 = dma.done.wait [#allocation3], 1024 }
 0x2df   : > { %5697 = vsyncadd [#allocation3], 4294966272  ;;  %vm3448_vm0 = vcmask 261120   ;;  %v3421_v0 = vld [vmem:[#allocation6] sm:$0xff]  ;;  %v3422_v1 = vld [vmem:[#allocation6 + $0x8] sm:$0xff]  ;;  %v3433_v9 = vlaneseq  ;;  %vm5724_vm4 = vmmov 0  }
 0x2e0   : > { %v3423_v2 = vld [vmem:[#allocation6 + $0x10] sm:$0xff]  ;;  %v5435_v3 = vpack.c.bf16 %v3422_v1, %v3421_v0  ;;  %v3424_v4 = vld [vmem:[#allocation6 + $0x18] sm:$0xff]  ;;  %v6151_v5 = vld [vmem:[#allocation2] sm:$0xff]  ;;  %vm4251_vm15 = vcmask 1041409   ;;  %s5243_s30 = sshll.u32 %s5787_s29, 7  ;;  %s4357_s14 = sshll.u32 %s213_s20, 4  ;;  %s6353_s14 = int_to_ptr.vmem [resolvable:$true] %s4357_s14 }
 0x2e1   : > { %v5439_v6 = vpack.c.bf16 %v3424_v4, %v3423_v2  ;;  %5340 = vmatprep.mubr.msk.f32.mxu0 %vm3448_vm0, %v6151_v5  ;;  %v3724_v7 = vld [vmem:[#allocation6 + $0x40] sm:$0xff]  ;;  %v3725_v8 = vld [vmem:[#allocation6 + $0x48] sm:$0xff]  ;;  %v3726_v11 = vld [vmem:[#allocation6 + $0x50] sm:$0xff]  ;;  %v6158_v16 = vshrl.u32 %v3433_v9, 7  ;;  %v3425_v25 = vrot.slane %v6151_v5, 1  ;;  %v3707_v34 = vrot.slane %v6151_v5, 2  ;;  %s6351_s17 = scalar_lea.hbm %s6403_s6, %s5243_s30 }
 0x2e2   : > { %5436 = vmatprep.subr.bf16.mxu0 %v5435_v3  ;;  %v5443_v10 = vpack.c.bf16 %v3725_v8, %v3724_v7  ;;  %v3727_v12 = vld [vmem:[#allocation6 + $0x58] sm:$0xff]  ;;  %v3444_v13 = vld [vmem:[#allocation6 + $0x20] sm:$0xff]  ;;  %v3445_v14 = vld [vmem:[#allocation6 + $0x28] sm:$0xff]  ;;  %v3865_v0 = vrot.slane %v6151_v5, 3  ;;  %s6425_s13 = sand.u32 1, %s5708_s0   ;;  %s5642_s29 = scalar_lea.vmem %s6353_s14, 128 }
 0x2e3   : > { %5438 = vmatpush3.bf16.msra.mxu0 %v5435_v3  ;;  %v6155_v15 = vld [vmem:[#allocation2 + $0x8] sm:$0xff]  ;;  %v3446_v17 = vld [vmem:[#allocation6 + $0x30] sm:$0xff]  ;;  %v3447_v18 = vld [vmem:[#allocation6 + $0x38] sm:$0xff]  ;;  %v5447_v20 = vpack.c.bf16 %v3727_v12, %v3726_v11  ;;  %v5427_v21 = vpack.c.bf16 %v3445_v14, %v3444_v13  ;;  %vm3435_vm1 = vcmp.lt.s32.totalorder %v6158_v16, 7  ;;  %vm3715_vm2 = vcmp.lt.s32.totalorder %v6158_v16, 6  ;;  %s4344_s19 = scalar_lea.sflag [#allocation8], %s6425_s13  ;;  %p5643_p3 = scmp.ne.s32.totalorder %s6353_s14, %s5642_s29 }
 0x2e4   : > { %5440 = vmatprep.subr.bf16.mxu0 %v5439_v6  ;;  %v6160_v19 = vld [vmem:[#allocation2 + $0x10] sm:$0xff]  ;;  %v3882_v22 = vld [vmem:[#allocation6 + $0x60] sm:$0xff]  ;;  %v3883_v23 = vld [vmem:[#allocation6 + $0x68] sm:$0xff]  ;;  %v5431_v24 = vpack.c.bf16 %v3447_v18, %v3446_v17  ;;  %v3426_v26 = vrot.slane %v6155_v15, 1  ;;  %v3708_v35 = vrot.slane %v6155_v15, 2  ;;  %v3866_v1 = vrot.slane %v6155_v15, 3 }
 0x2e5   : > { %5428 = vmatprep.subr.bf16.mxu1 %v5427_v21  ;;  %v6169_v27 = vld [vmem:[#allocation2 + $0x18] sm:$0xff]  ;;  %v3427_v28 = vrot.slane %v6160_v19, 1  ;;  %v6172_v29 = vld [vmem:[#allocation2 + $0x20] sm:$0xff]  ;;  %v5451_v30 = vpack.c.bf16 %v3883_v23, %v3882_v22  ;;  %v6184_v33 = vld [vmem:[#allocation2 + $0x28] sm:$0xff]  ;;  %v3709_v41 = vrot.slane %v6160_v19, 2  ;;  %vm3873_vm3 = vcmp.lt.s32.totalorder %v6158_v16, 5 }
 0x2e6   : > { %5430 = vmatpush3.bf16.msra.mxu1 %v5427_v21  ;;  %v3442_v31 = vsel %vm3435_vm1, %v3425_v25, %v3426_v26  ;;  %v3428_v32 = vrot.slane %v6169_v27, 1  ;;  %v3429_v36 = vrot.slane %v6172_v29, 1  ;;  %v6189_v37 = vld [vmem:[#allocation2 + $0x30] sm:$0xff]  ;;  %v3430_v39 = vrot.slane %v6184_v33, 1  ;;  %v6202_v42 = vld [vmem:[#allocation2 + $0x38] sm:$0xff]  ;;  %v4220_v21 = vld [vmem:[#allocation9 + $0x8] sm:$0xff] }
 0x2e7   : > { %5442 = vmatpush3.bf16.msra.mxu0 %v5439_v6  ;;  %5432 = vmatprep.subr.bf16.mxu1 %v5431_v24  ;;  %v3441_v38 = vsel %vm3435_vm1, %v3426_v26, %v3427_v28  ;;  %v3710_v43 = vrot.slane %v6169_v27, 2  ;;  %v3722_v44 = vsel %vm3715_vm2, %v3707_v34, %v3708_v35  ;;  %v3431_v46 = vrot.slane %v6189_v37, 1  ;;  %v3884_v47 = vld [vmem:[#allocation6 + $0x70] sm:$0xff]  ;;  %v3885_v48 = vld [vmem:[#allocation6 + $0x78] sm:$0xff]  ;;  %p6426_p1 = scmp.ne.s32.totalorder %s6408_s11, 0  ;;  %s5727_s21 = smov [#allocation11]  }
 0x2e8   : > { %5444 = vmatprep.subr.bf16.mxu0 %v5443_v10  ;;  %5320 = vmatprep.mubr.msk.f32.mxu1 %vm3448_vm0, %v3442_v31  ;;  %v3440_v40 = vsel %vm3435_vm1, %v3427_v28, %v3428_v32  ;;  %v3439_v45 = vsel %vm3435_vm1, %v3428_v32, %v3429_v36  ;;  %v3438_v49 = vsel %vm3435_vm1, %v3429_v36, %v3430_v39  ;;  %v3432_v50 = vrot.slane %v6202_v42, 1  ;;  %v4224_v28 = vld [vmem:[#allocation9 + $0x28] sm:$0xff]  ;;  %v4226_v31 = vld [vmem:[#allocation9 + $0x38] sm:$0xff]  ;;  %v4229_v36 = vld [vmem:[#allocation9 + $0x50] sm:$0xff]  ;;  %s5646_s22 = sshll.u32 %s5727_s21, 4  ;;  %s5647_s22 = int_to_ptr.vmem [resolvable:$false] %s5646_s22 }
 0x2e9   : > { %v3711_v51 = vrot.slane %v6172_v29, 2  ;;  %v3721_v52 = vsel %vm3715_vm2, %v3708_v35, %v3709_v41  ;;  %v3712_v53 = vrot.slane %v6184_v33, 2  ;;  %v3720_v54 = vsel %vm3715_vm2, %v3709_v41, %v3710_v43  ;;  %p5644_p6 = pnand %p5643_p3, %p6426_p1  ;;  %s5648_s23 = scalar_lea.vmem %s5647_s22, 256 }
 0x2ea   : > { %5341 = vmatmul.mubr.msk.f32.vlgmr.msra.gmra.mrb[0].mxu0 %vm3448_vm0, %v6155_v15  ;;  %5434 = vmatpush3.bf16.msra.mxu1 %v5431_v24  ;;  %v5455_v55 = vpack.c.bf16 %v3885_v48, %v3884_v47  ;;  %v3437_v56 = vsel %vm3435_vm1, %v3430_v39, %v3431_v46  ;;  %v3436_v57 = vsel %vm3435_vm1, %v3431_v46, %v3432_v50  ;;  %v3713_v58 = vrot.slane %v6189_v37, 2  ;;  %v4221_v24 = vld [vmem:[#allocation9 + $0x10] sm:$0xff]  ;;  %v4231_v39 = vld [vmem:[#allocation9 + $0x60] sm:$0xff]  ;;  %p5649_p8 = scmp.lt.s32.totalorder %s6353_s14, %s5647_s22  ;;  %p5650_p9 = scmp.lt.s32.totalorder %s5648_s23, %s5642_s29 }
 0x2eb   : > { %5446 = vmatpush3.bf16.msra.mxu0 %v5443_v10  ;;  %5343 = vmatprep.mubr.msk.f32.mxu0 %vm3448_vm0, %v6160_v19  ;;  %v3719_v59 = vsel %vm3715_vm2, %v3710_v43, %v3711_v51  ;;  %v3714_v60 = vrot.slane %v6202_v42, 2  ;;  %v3718_v61 = vsel %vm3715_vm2, %v3711_v51, %v3712_v53  ;;  %v3443_v62 = vsel %vm3435_vm1, %v3432_v50, %v3425_v25  ;;  %v4222_v25 = vld [vmem:[#allocation9 + $0x18] sm:$0xff]  ;;  %p5645_p7 = pneg %p5644_p6 }
 0x2ec   : > { %5448 = vmatprep.subr.bf16.mxu0 %v5447_v20  ;;  %v3717_v63 = vsel %vm3715_vm2, %v3712_v53, %v3713_v58  ;;  %v3867_v3 = vrot.slane %v6160_v19, 3  ;;  %v3868_v5 = vrot.slane %v6169_v27, 3  ;;  %v3880_v6 = vsel %vm3873_vm3, %v3865_v0, %v3866_v1  ;;  %v4234_v43 = vld [vmem:[#allocation9 + $0x78] sm:$0xff]  ;;  %p5651_p12 = por %p5650_p9, %p5649_p8 }
 0x2ed   : > { %5321 = vmatmul.mubr.msk.f32.vlgmr.msra.gmra.mrb[0].mxu1 %vm3448_vm0, %v3441_v38  ;;  %v3716_v2 = vsel %vm3715_vm2, %v3713_v58, %v3714_v60  ;;  %v3723_v4 = vsel %vm3715_vm2, %v3714_v60, %v3707_v34  ;;  %v3869_v7 = vrot.slane %v6172_v29, 3  ;;  %v3870_v10 = vrot.slane %v6184_v33, 3  ;;  %v4228_v34 = vld [vmem:[#allocation9 + $0x48] sm:$0xff] }
 0x2ee   : > { %5344 = vmatmul.mubr.msk.f32.gmra.mrb[2].mxu0 %vm3448_vm0, %v6169_v27  ;;  %5323 = vmatprep.mubr.msk.f32.mxu1 %vm3448_vm0, %v3440_v40  ;;  %v3879_v8 = vsel %vm3873_vm3, %v3866_v1, %v3867_v3  ;;  %v3878_v11 = vsel %vm3873_vm3, %v3867_v3, %v3868_v5  ;;  %v3871_v12 = vrot.slane %v6189_v37, 3  ;;  %v3872_v14 = vrot.slane %v6202_v42, 3  ;;  %v4223_v27 = vld [vmem:[#allocation9 + $0x20] sm:$0xff]  ;;  %v4232_v40 = vld [vmem:[#allocation9 + $0x68] sm:$0xff]  ;;  %p5652_p13 = pnand %p5651_p12, %p5645_p7 }
 0x2ef   : > { %5346 = vmatprep.mubr.msk.f32.mxu0 %vm3448_vm0, %v6172_v29  ;;  %5450 = vmatpush3.bf16.msra.mxu0 %v5447_v20  ;;  %v3877_v13 = vsel %vm3873_vm3, %v3868_v5, %v3869_v7  ;;  %v3876_v15 = vsel %vm3873_vm3, %v3869_v7, %v3870_v10  ;;  %v4219_v20 = vld [vmem:[#allocation9] sm:$0xff]  ;;  %v5723_v23 = vmov 0.0|0.0   ;;  %v5463_v26 = vpack.c.bf16 %v4222_v25, %v4221_v24 }
 0x2f0   : > { %5452 = vmatprep.subr.bf16.mxu0 %v5451_v30  ;;  %v3875_v17 = vsel %vm3873_vm3, %v3870_v10, %v3871_v12  ;;  %v3874_v18 = vsel %vm3873_vm3, %v3871_v12, %v3872_v14  ;;  %v3881_v19 = vsel %vm3873_vm3, %v3872_v14, %v3865_v0  ;;  %v5460_v22 = vpack.c.bf16 %v4220_v21, %v4219_v20 }
 0x2f1   : > { %5324 = vmatmul.mubr.msk.f32.gmra.mrb[2].mxu1 %vm3448_vm0, %v3439_v45  ;;  %5459 = vmatprep.subr.bf16.mxu1 %v5723_v23  ;;  %v5466_v29 = vpack.c.bf16 %v4224_v28, %v4223_v27  ;;  %v5478_v41 = vpack.c.bf16 %v4232_v40, %v4231_v39  ;;  %v5725_v45 = vmov 0.0   ;;  %v4127_v51 = vand.u32 127, %v3433_v9 }
 0x2f2   : > { %5347 = vmatmul.mubr.msk.f32.gmra.mrb[4].mxu0 %vm3448_vm0, %v6184_v33  ;;  %5326 = vmatprep.mubr.msk.f32.mxu1 %vm3448_vm0, %v3438_v49  ;;  %v4227_v33 = vld [vmem:[#allocation9 + $0x40] sm:$0xff]  ;;  %v4027_v9 = vadd.s32 40, %v6158_v16  ;;  %v4026_v1 = vadd.s32 32, %v6158_v16  ;;  %v4029_v5 = vadd.s32 56, %v6158_v16  ;;  %v4028_v7 = vadd.s32 48, %v6158_v16 }
 0x2f3   : > { %5349 = vmatprep.mubr.msk.f32.mxu0 %vm3448_vm0, %v6189_v37  ;;  %5461 = vmatpush3.bf16.msra.mxu1 %v5460_v22  ;;  %v5472_v35 = vpack.c.bf16 %v4228_v34, %v4227_v33  ;;  %v4230_v37 = vld [vmem:[#allocation9 + $0x58] sm:$0xff]  ;;  %vm4128_vm5 = vcmp.lt.s32.totalorder %v4127_v51, 16  ;;  %vm4130_vm6 = vcmp.lt.s32.totalorder %v4127_v51, 8  ;;  %vm4257_vm1 = vcmask 1043459  }
 0x2f4   : > { %5462 = vmatprep.subr.bf16.mxu1 %v5723_v23  ;;  %v5475_v38 = vpack.c.bf16 %v4230_v37, %v4229_v36  ;;  %v4069_v10 = vand.u32 7, %v4027_v9  ;;  %v4062_v14 = vand.u32 7, %v4026_v1  ;;  %v4076_v22 = vand.u32 7, %v4028_v7 }
 0x2f5   : > { %5327 = vmatmul.mubr.msk.f32.gmra.mrb[4].mxu1 %vm3448_vm0, %v3437_v56  ;;  %v5726_v56 = vmov 4   ;;  %vm4260_vm2 = vcmask 1044484   ;;  %vm4263_vm3 = vcmask 1045509  }
 0x2f6   : > { %5350 = vmatmul.mubr.msk.f32.gmra.mrb[6].mxu0 %vm3448_vm0, %v6202_v42  ;;  %5329 = vmatprep.mubr.msk.f32.mxu1 %vm3448_vm0, %v3436_v57  ;;  %v4233_v42 = vld [vmem:[#allocation9 + $0x70] sm:$0xff]  ;;  %v4129_v57 = vsel %vm4128_vm5, 5, %v5726_v56  ;;  %vm4269_vm5 = vcmask 1047559  }
 0x2f7   : > { %5360 = vmatprep.mubr.msk.f32.mxu0 %vm3448_vm0, %v3722_v44  ;;  %5464 = vmatpush3.bf16.msra.mxu1 %v5463_v26  ;;  %v5481_v44 = vpack.c.bf16 %v4234_v43, %v4233_v42  ;;  %v4131_v60 = vsel %vm4130_vm6, 6, %v4129_v57 }
 0x2f8   : > { %5465 = vmatprep.subr.bf16.mxu1 %v5723_v23  ;;  %vm6302_vm11 = vcmp.le.s32.totalorder %v4069_v10, %v4131_v60  ;;  %vm6306_vm12 = vcmp.le.s32.totalorder %v4062_v14, %v4131_v60  ;;  %vm6314_vm14 = vcmp.le.s32.totalorder %v4076_v22, %v4131_v60 }
 0x2f9   : > { %5330 = vmatmul.mubr.msk.f32.gmra.mrb[6].mxu1 %vm3448_vm0, %v3443_v62  ;;  %v4024_v62 = vadd.s32 16, %v6158_v16 }
 0x2fa   : > { %5361 = vmatmul.mubr.msk.f32.vlgmr.msra.gmra.mrb[0].mxu0 %vm3448_vm0, %v3721_v52  ;;  %5424 = vmatprep.mubr.msk.f32.mxu1 %vm5724_vm4, %v5725_v45  ;;  %vm4266_vm4 = vcmask 1046534  }
 0x2fb   : > { %5454 = vmatpush3.bf16.msra.mxu0 %v5451_v30  ;;  %5363 = vmatprep.mubr.msk.f32.mxu0 %vm3448_vm0, %v3720_v54  ;;  %v4225_v30 = vld [vmem:[#allocation9 + $0x30] sm:$0xff] }
 0x2fc   : > { %5456 = vmatprep.subr.bf16.mxu0 %v5455_v55  ;;  %5467 = vmatpush3.bf16.msra.mxu1 %v5466_v29  ;;  %v5469_v32 = vpack.c.bf16 %v4226_v31, %v4225_v30 }
 0x2fd   : > { %5468 = vmatprep.subr.bf16.mxu1 %v5723_v23 }
 0x2fe   : > { %5364 = vmatmul.mubr.msk.f32.gmra.mrb[2].mxu0 %vm3448_vm0, %v3719_v59  ;;  %v4025_v59 = vadd.s32 24, %v6158_v16 }
 0x2ff   : > { %5366 = vmatprep.mubr.msk.f32.mxu0 %vm3448_vm0, %v3718_v61  ;;  %5458 = vmatpush3.bf16.msra.mxu0 %v5455_v55  ;;  %v4023_v55 = vadd.s32 8, %v6158_v16  ;;  %v4034_v61 = vand.u32 7, %v6158_v16 }
 0x300   : > { %5470 = vmatpush3.bf16.msra.mxu1 %v5469_v32  ;;  %v4055_v0 = vand.u32 7, %v4025_v59 }
 0x301   : > { %5471 = vmatprep.subr.bf16.mxu1 %v5723_v23  ;;  %v4041_v58 = vand.u32 7, %v4023_v55  ;;  %vm4132_vm8 = vcmp.le.s32.totalorder %v4034_v61, %v4131_v60 }
 0x302   : > { %5367 = vmatmul.mubr.msk.f32.gmra.mrb[4].mxu0 %vm3448_vm0, %v3717_v63  ;;  %vm4135_vm9 = vcmp.le.s32.totalorder %v4055_v0, %v4131_v60 }
 0x303   : > { %5369 = vmatprep.mubr.msk.f32.mxu0 %vm3448_vm0, %v3716_v2  ;;  %vm4133_vm7 = vcmp.le.s32.totalorder %v4041_v58, %v4131_v60 }
 0x304   : > { %5473 = vmatpush3.bf16.msra.mxu1 %v5472_v35 }
 0x305   : > { %5474 = vmatprep.subr.bf16.mxu1 %v5723_v23 }
 0x306   : > { %5370 = vmatmul.mubr.msk.f32.gmra.mrb[6].mxu0 %vm3448_vm0, %v3723_v4  ;;  %v4048_v4 = vand.u32 7, %v4024_v62 }
 0x307   : > { %5380 = vmatprep.mubr.msk.f32.mxu0 %vm3448_vm0, %v3880_v6 }
 0x308   : > { %5476 = vmatpush3.bf16.msra.mxu1 %v5475_v38  ;;  %vm4134_vm10 = vcmp.le.s32.totalorder %v4048_v4, %v4131_v60 }
 0x309   : > { %5477 = vmatprep.subr.bf16.mxu1 %v5723_v23 }
 0x30a   : > { %5381 = vmatmul.mubr.msk.f32.vlgmr.msra.gmra.mrb[0].mxu0 %vm3448_vm0, %v3879_v8 }
 0x30b   : > { %5383 = vmatprep.mubr.msk.f32.mxu0 %vm3448_vm0, %v3878_v11 }
 0x30c   : > { %5479 = vmatpush3.bf16.msra.mxu1 %v5478_v41 }
 0x30d   : > { %5480 = vmatprep.subr.bf16.mxu1 %v5723_v23 }
 0x30e   : > { %5384 = vmatmul.mubr.msk.f32.gmra.mrb[2].mxu0 %vm3448_vm0, %v3877_v13 }
 0x30f   : > { %5386 = vmatprep.mubr.msk.f32.mxu0 %vm3448_vm0, %v3876_v15 }
 0x310   : > { %5482 = vmatpush3.bf16.msra.mxu1 %v5481_v44 }
 0x312   : > { %5387 = vmatmul.mubr.msk.f32.gmra.mrb[4].mxu0 %vm3448_vm0, %v3875_v17 }
 0x313   : > { %5389 = vmatprep.mubr.msk.f32.mxu0 %vm3448_vm0, %v3874_v18 }
 0x316   : > { %5390 = vmatmul.mubr.msk.f32.gmra.mrb[6].mxu0 %vm3448_vm0, %v3881_v19  ;;  %v4083_v19 = vand.u32 7, %v4029_v5  ;;  %vm4254_vm0 = vcmask 1042434  }
 0x318   : > { %vm6310_vm13 = vcmp.le.s32.totalorder %v4083_v19, %v4131_v60 }
 0x3c0   : > { %v5322_v46 = vpop.f32.mrb[0].mxu1 }
 0x3c1   : > { %v3539_v47 = vpop.f32.mrb[1].mxu1 }
 0x3c4   : > { %v5325_v48 = vpop.f32.mrb[2].mxu1 }
 0x3c5   : > { %v3549_v49 = vpop.f32.mrb[3].mxu1 }
 0x3c8   : > { %v5328_v50 = vpop.f32.mrb[4].mxu1 }
 0x3c9   : > { %v3559_v52 = vpop.f32.mrb[5].mxu1 }
 0x3cc   : > { %v6290_v53 = vpop.f32.mrb[6].mxu1 }
 0x3cd   : > { %v6292_v54 = vpop.f32.mrb[7].mxu1 }
 0x3dd   : > { %v5382_v63 = vpop.f32.mrb[0].mxu0 }
 0x3de   : > { %v5483_v2 = vadd.f32 %v5382_v63, %v5322_v46  ;;  %v3976_v3 = vpop.f32.mrb[1].mxu0 }
 0x3df   : > { %v5484_v6 = vadd.f32 %v3976_v3, %v3539_v47  ;;  %v6325_v47 = vld [vmem:[%s6400_s3] ss:$0 sm:$0xff] }
 0x3e0   : > { %v4141_v8 = vsel %vm4133_vm7, %v5483_v2, -1e+30 }
 0x3e1   : > { %v4154_v11 = vrot.slane %v4141_v8, 4  ;;  %v4140_v12 = vsel %vm4132_vm8, %v5484_v6, -1e+30  ;;  %v5385_v13 = vpop.f32.mrb[2].mxu0 }
 0x3e2   : > { %v4148_v15 = vrot.slane %v4140_v12, 4  ;;  %v5485_v17 = vadd.f32 %v5385_v13, %v5325_v48  ;;  %v3986_v18 = vpop.f32.mrb[3].mxu0 }
 0x3e3   : > { %v4155_v20 = vmax.f32 %v4141_v8, %v4154_v11  ;;  %v5486_v21 = vadd.f32 %v3986_v18, %v3549_v49 }
 0x3e4   : > { %v4149_v23 = vmax.f32 %v4140_v12, %v4148_v15  ;;  %v4143_v24 = vsel %vm4135_vm9, %v5485_v17, -1e+30 }
 0x3e5   : > { %v4156_v16 = vrot.slane %v4155_v20, 2  ;;  %v4166_v26 = vrot.slane %v4143_v24, 4  ;;  %v4142_v27 = vsel %vm4134_vm10, %v5486_v21, -1e+30  ;;  %v5388_v28 = vpop.f32.mrb[4].mxu0 }
 0x3e6   : > { %v4150_v30 = vrot.slane %v4149_v23, 2  ;;  %v4160_v31 = vrot.slane %v4142_v27, 4  ;;  %v5487_v32 = vadd.f32 %v5388_v28, %v5328_v50  ;;  %v3996_v33 = vpop.f32.mrb[5].mxu0 }
 0x3e7   : > { %v4157_v35 = vmax.f32 %v4155_v20, %v4156_v16  ;;  %v4167_v36 = vmax.f32 %v4143_v24, %v4166_v26  ;;  %v5488_v37 = vadd.f32 %v3996_v33, %v3559_v52 }
 0x3e8   : > { %v4151_v39 = vmax.f32 %v4149_v23, %v4150_v30  ;;  %v4161_v40 = vmax.f32 %v4142_v27, %v4160_v31  ;;  %v4145_v41 = vsel %vm6302_vm11, %v5487_v32, -1e+30 }
 0x3e9   : > { %v4158_v42 = vrot.slane %v4157_v35, 1  ;;  %v4168_v43 = vrot.slane %v4167_v36, 2  ;;  %v4178_v44 = vrot.slane %v4145_v41, 4  ;;  %v4144_v45 = vsel %vm6306_vm12, %v5488_v37, -1e+30  ;;  %v5391_v46 = vpop.f32.mrb[6].mxu0 }
 0x3ea   : > { %v4152_v48 = vrot.slane %v4151_v39, 1  ;;  %v4162_v49 = vrot.slane %v4161_v40, 2  ;;  %v4172_v50 = vrot.slane %v4144_v45, 4  ;;  %v5489_v51 = vadd.f32 %v5391_v46, %v6290_v53  ;;  %v4006_v52 = vpop.f32.mrb[7].mxu0 }
 0x3eb   : > { %v4159_v55 = vmax.f32 %v4157_v35, %v4158_v42  ;;  %v4169_v56 = vmax.f32 %v4167_v36, %v4168_v43  ;;  %v4179_v57 = vmax.f32 %v4145_v41, %v4178_v44  ;;  %v5490_v58 = vadd.f32 %v4006_v52, %v6292_v54 }
 0x3ec   : > { %v4153_v59 = vmax.f32 %v4151_v39, %v4152_v48  ;;  %v4163_v60 = vmax.f32 %v4161_v40, %v4162_v49  ;;  %v4173_v61 = vmax.f32 %v4144_v45, %v4172_v50  ;;  %v4147_v62 = vsel %vm6310_vm13, %v5489_v51, -1e+30 }
 0x3ed   : > { %v4204_v9 = vadd.f32 %v6325_v47, %v4159_v55  ;;  %v4170_v63 = vrot.slane %v4169_v56, 1  ;;  %v4180_v0 = vrot.slane %v4179_v57, 2  ;;  %v4190_v1 = vrot.slane %v4147_v62, 4  ;;  %v5241_v55 = vld [vmem:[%s6402_s5] ss:$0 sm:$0xff] }
 0x3ee   : > { %v4203_v2 = vadd.f32 %v6325_v47, %v4153_v59  ;;  %v4164_v53 = vrot.slane %v4163_v60, 1  ;;  %v4174_v3 = vrot.slane %v4173_v61, 2  ;;  %v4146_v4 = vsel %vm6314_vm14, %v5490_v58, -1e+30 }
 0x3ef   : > { %v4212_v5 = vmax.f32 %v4204_v9, 0.0  ;;  %v4171_v54 = vmax.f32 %v4169_v56, %v4170_v63  ;;  %v4181_v6 = vmax.f32 %v4179_v57, %v4180_v0  ;;  %v4191_v7 = vmax.f32 %v4147_v62, %v4190_v1 }
 0x3f0   : > { %v4211_v8 = vmax.f32 %v4203_v2, 0.0  ;;  %v4165_v10 = vmax.f32 %v4163_v60, %v4164_v53  ;;  %v4175_v11 = vmax.f32 %v4173_v61, %v4174_v3  ;;  %v4184_v12 = vrot.slane %v4146_v4, 4 }
 0x3f1   : > { %v4250_v13 = vrot.slane %v4212_v5, 7  ;;  %v4206_v14 = vadd.f32 %v6325_v47, %v4171_v54  ;;  %v4182_v15 = vrot.slane %v4181_v6, 1  ;;  %v4192_v17 = vrot.slane %v4191_v7, 2 }
 0x3f2   : > { %v4205_v18 = vadd.f32 %v6325_v47, %v4165_v10  ;;  %v4176_v19 = vrot.slane %v4175_v11, 1  ;;  %v4185_v20 = vmax.f32 %v4146_v4, %v4184_v12 }
 0x3f3   : > { %v4252_v21 = vsel %vm4251_vm15, %v4250_v13, %v4211_v8  ;;  %v4214_v22 = vmax.f32 %v4206_v14, 0.0  ;;  %v4183_v23 = vmax.f32 %v4181_v6, %v4182_v15  ;;  %v4193_v24 = vmax.f32 %v4191_v7, %v4192_v17 }
 0x3f4   : > { %v4213_v25 = vmax.f32 %v4205_v18, 0.0  ;;  %v4177_v16 = vmax.f32 %v4175_v11, %v4176_v19  ;;  %v4186_v26 = vrot.slane %v4185_v20, 2 }
 0x3f5   : > { %v4208_v27 = vadd.f32 %v6325_v47, %v4183_v23  ;;  %v4194_v28 = vrot.slane %v4193_v24, 1  ;;  %v4256_v32 = vrot.slane %v4214_v22, 5 }
 0x3f6   : > { %v4253_v29 = vrot.slane %v4213_v25, 6  ;;  %v4207_v30 = vadd.f32 %v6325_v47, %v4177_v16  ;;  %v4187_v31 = vmax.f32 %v4185_v20, %v4186_v26 }
 0x3f7   : > { %v4216_v33 = vmax.f32 %v4208_v27, 0.0  ;;  %v4195_v34 = vmax.f32 %v4193_v24, %v4194_v28 }
 0x3f8   : > { %v4255_v35 = vsel %vm4254_vm0, %v4253_v29, %v4252_v21  ;;  %v4215_v36 = vmax.f32 %v4207_v30, 0.0  ;;  %v4188_v37 = vrot.slane %v4187_v31, 1 }
 0x3f9   : > { %v4210_v38 = vadd.f32 %v6325_v47, %v4195_v34  ;;  %v4258_v39 = vsel %vm4257_vm1, %v4256_v32, %v4255_v35  ;;  %v4262_v42 = vrot.slane %v4216_v33, 3 }
 0x3fa   : > { %v4259_v40 = vrot.slane %v4215_v36, 4  ;;  %v4189_v41 = vmax.f32 %v4187_v31, %v4188_v37 }
 0x3fb   : > { %v4218_v45 = vmax.f32 %v4210_v38, 0.0 }
 0x3fc   : > { %v4209_v43 = vadd.f32 %v6325_v47, %v4189_v41  ;;  %v4261_v44 = vsel %vm4260_vm2, %v4259_v40, %v4258_v39 }
 0x3fd   : > { %v4264_v46 = vsel %vm4263_vm3, %v4262_v42, %v4261_v44  ;;  %v4268_v50 = vrot.slane %v4218_v45, 1 }
 0x3fe   : > { %v4217_v48 = vmax.f32 %v4209_v43, 0.0 }
 0x400   : > { %v4265_v49 = vrot.slane %v4217_v48, 2 }
 0x402   : > { %v4267_v51 = vsel %vm4266_vm4, %v4265_v49, %v4264_v46 }
 0x403   : > { %v4270_v52 = vsel %vm4269_vm5, %v4268_v50, %v4267_v51 }
 0x404   : > { %5425 = vmatmul.mubr.f32.vlgmr.msra.gmra.mrb[8].mxu1 %v4270_v52 }
 0x4d7   : > { %v4338_v47 = vpop.f32.mrb[8].mxu1 }
 0x4d8   : > { %v4339_v56 = vadd.f32 %v5241_v55, %v4338_v47  ;;  %v5426_v57 = vpop.f32.mrb[9].mxu1 }
 0x4da   : > { %4342 = vst [vmem:[%s213_s20] sm:$0xff] %v4339_v56 }
 0x4db   : > { %5655 = shalt.err (!%p5652_p13)
}
 0x4dc   : > { %s5656_s8 = scalar_lea.hbm %s6351_s17, 128  ;;  %s5660_s24 = scalar_lea.hbm %s6403_s6, 256 }
 0x4dd   : > { %p5657_p2 = scmp.ne.s32.totalorder %s6351_s17, %s5656_s8  ;;  %p5661_p5 = scmp.lt.u32.totalorder %s6351_s17, %s6403_s6 }
 0x4de   : > { %p5662_p11 = scmp.lt.u32.totalorder %s5660_s24, %s5656_s8  ;;  %p5664_p3 = scmp.lt.u32.totalorder %s5656_s8, %s6351_s17 }
 0x4df   : > { %p5658_p4 = pnand %p5657_p2, %p6426_p1 }
 0x4e0   : > { %p5663_p0 = por %p5662_p11, %p5661_p5 }
 0x4e1   : > { %p5659_p10 = pneg %p5658_p4 }
 0x4e2   : > { %p5665_p6 = por %p5664_p3, %p5663_p0 }
 0x4e4   : > { %p5666_p7 = pnand %p5665_p6, %p5659_p10 }
 0x4e6   : > { %5669 = shalt.err (!%p5666_p7)
}
 0x4e7   : > { %5515 = dma.vmem_to_hbm [thread:$0]  (%p6426_p1), %s6353_s14, 128, %s6351_s17, %s4344_s19  }
 0x4e8 PF: > { %p5532_p8 = scmp.ge.s32.totalorder %s5716_s28, 2  ;;  %s4369_s30 = sand.u32 1, %s5704_s26  }
 0x4e9   : > { %p6427_p9 = scmp.ne.s32.totalorder %s6409_s12, 0  ;;  %s4370_s9 = scalar_lea.sflag [#allocation8], %s4369_s30 }
 0x4eb   : > { %p5525_p12 = pnand %p5532_p8, %p6427_p9 }
 0x4ed   : > { %5699 = dma.done.wait (!%p5525_p12), %s4370_s9, 128  }
 0x4ee   : > { %5701 = vsyncadd (!%p5525_p12), %s4370_s9, 4294967168  ;;  %p24_p13 = scmp.ge.s32.totalorder %s5791_s7, 4   ;;  %s6428_s26 = smov %s5708_s0 }
 0x4ef   : > { %s6429_s0 = smov %s5712_s27  ;;  %s6430_s27 = smov %s5802_s10 }
 0x4f0   : > { %s6431_s28 = smov %s5791_s7  ;;  %26 = sbr.rel (!%p24_p13) target bundleno = 20 (0x14), region = 2764 }
 0x4f7   :  { %4375 = vsyncpa [#allocation7], 1 }
 0x4f8   :  { %4377 = vsyncpa [#allocation7 + $0x1], 1 }
 0x4f9   :  { %4378 = vsyncpa [#allocation10], 1 }
 0x4fa   :  { %4379 = vsyncpa [#allocation8], 1 }
 0x4fb   :  { %4381 = vsyncpa [#allocation8 + $0x1], 1 }
 0x4fc   :  { %4382 = vsyncmov [#allocation3] }
 0x4ff   :  { %s4383_s28 = vpop.sfrf %4382 }
 0x500   :  { %p5246_p1 = scmp.ne.s32.totalorder %s4383_s28, 0 }
 0x502   :  { %4387 = shalt.err (%p5246_p1)  }

</bundles_post_ra>
